<compile_context>
chip_gen: v5e
topology: v5e:2x2
jax: 0.10.0
libtpu: 0.0.40
codegen_flags: <defaults>
</compile_context>

<pallas_src>
import functools

import jax
import jax.numpy as jnp
from jax.experimental import pallas as pl
from jax.experimental.pallas import tpu as pltpu

_LANE = 128


# ----------------------------------------------------------------------------
# Tiling helpers
# ----------------------------------------------------------------------------
def _choose_lane_tile(m, bytes_per_lane, budget_bytes=2 << 20, max_tile=1024):
    """Pick a lane-dim tile (multiple of 128) keeping per-block VMEM ~budget."""
    lt = (budget_bytes // max(bytes_per_lane, 1)) // _LANE * _LANE
    lt = max(_LANE, min(lt, max_tile))
    m128 = ((m + _LANE - 1) // _LANE) * _LANE
    lt = min(lt, m128)
    mp = ((m + lt - 1) // lt) * lt
    return mp, lt


def _pad_lanes(a, mp):
    m = a.shape[-1]
    if m == mp:
        return a
    return jnp.pad(a, [(0, 0)] * (a.ndim - 1) + [(0, mp - m)])


# ----------------------------------------------------------------------------
# Kernel 1: channel projection (1x1 conv) -- (Cout,Cin) @ (Cin,M) + bias (MXU)
# ----------------------------------------------------------------------------
def _proj_kernel(w_ref, b_ref, x_ref, o_ref):
    o_ref[...] = (
        jnp.dot(w_ref[...], x_ref[...], preferred_element_type=jnp.float32)
        + b_ref[...]
    ).astype(o_ref.dtype)


def conv1x1_pallas(w, b, x_cm):
    """Pointwise conv in channels-major layout: (Cout,Cin)@(Cin,M)+b -> (Cout,M)."""
    cout, cin = w.shape
    m = x_cm.shape[-1]
    mp, lt = _choose_lane_tile(m, (cin + cout) * 4)
    x_p = _pad_lanes(x_cm, mp)
    out = pl.pallas_call(
        _proj_kernel,
        out_shape=jax.ShapeDtypeStruct((cout, mp), jnp.float32),
        grid_spec=pltpu.PrefetchScalarGridSpec(
            num_scalar_prefetch=0,
            grid=(mp // lt,),
            in_specs=[
                pl.BlockSpec((cout, cin), lambda i: (0, 0)),
                pl.BlockSpec((cout, 1), lambda i: (0, 0)),
                pl.BlockSpec((cin, lt), lambda i: (0, i)),
            ],
            out_specs=pl.BlockSpec((cout, lt), lambda i: (0, i)),
        ),
        compiler_params=pltpu.CompilerParams(dimension_semantics=("parallel",)),
    )(w, b.reshape(cout, 1), x_p)
    return out[:, :m]


# ----------------------------------------------------------------------------
# Kernel 2: CARAFE core -- softmax over k^2 taps + weighted reassembly (VPU)
# ----------------------------------------------------------------------------
def _reassembly_kernel(xp_ref, wl_ref, o_ref):
    # xp_ref: (k2, C, LT)  input kxk patches
    # wl_ref: (k2, P, LT)  reassembly-kernel logits (softmax over k2 axis)
    # o_ref : (P,  C, LT)  o[p,c,:] = sum_kk softmax(wl)[kk,p,:] * xp[kk,c,:]
    logits = wl_ref[...]
    mx = jnp.max(logits, axis=0, keepdims=True)
    e = jnp.exp(logits - mx)
    wsm = e / jnp.sum(e, axis=0, keepdims=True)          # (k2, P, LT)
    xpat = xp_ref[...]                                   # (k2, C, LT)
    k2 = xpat.shape[0]
    p_up = wsm.shape[1]
    for p in range(p_up):                                # static unroll, P = up^2
        acc = xpat[0] * wsm[0, p:p + 1, :]
        for kk in range(1, k2):                          # static unroll, k2 = k*k
            acc = acc + xpat[kk] * wsm[kk, p:p + 1, :]
        o_ref[p] = acc.astype(o_ref.dtype)


def carafe_reassemble_pallas(x_patches, w_logits):
    """x_patches: (k2, C, M); w_logits: (k2, P, M) -> (P, C, M)."""
    k2, c, m = x_patches.shape
    p_up = w_logits.shape[1]
    bytes_per_lane = (k2 * c + k2 * p_up + p_up * c) * 4
    mp, lt = _choose_lane_tile(m, bytes_per_lane)
    xp = _pad_lanes(x_patches, mp)
    wl = _pad_lanes(w_logits, mp)
    out = pl.pallas_call(
        _reassembly_kernel,
        out_shape=jax.ShapeDtypeStruct((p_up, c, mp), jnp.float32),
        grid_spec=pltpu.PrefetchScalarGridSpec(
            num_scalar_prefetch=0,
            grid=(mp // lt,),
            in_specs=[
                pl.BlockSpec((k2, c, lt), lambda i: (0, 0, i)),
                pl.BlockSpec((k2, p_up, lt), lambda i: (0, 0, i)),
            ],
            out_specs=pl.BlockSpec((p_up, c, lt), lambda i: (0, 0, i)),
        ),
        compiler_params=pltpu.CompilerParams(dimension_semantics=("parallel",)),
    )(xp, wl)
    return out[:, :, :m]


# ----------------------------------------------------------------------------
# Full CARAFE forward
# ----------------------------------------------------------------------------
def carafe_pallas(x, params, kernel_size=3, up_factor=2):
    w_down, b_down, w_enc, b_enc, w_out, b_out = params
    n, c1, h, w = x.shape
    k, up = kernel_size, up_factor
    k2, p_up = k * k, up * up
    pd = k // 2
    m = n * h * w

    # --- kernel-prediction branch -------------------------------------------
    # channels-major, spatial-in-lanes layout: (C, N*H*W)
    x_cm = x.transpose(1, 0, 2, 3).reshape(c1, m)

    # down: 1x1 conv (c1 -> c1//4)
    xd = conv1x1_pallas(w_down, b_down, x_cm)                      # (Cmid, M)
    cmid = xd.shape[0]

    # encoder: kxk conv (pad k//2) as im2col + matmul  (c1//4 -> k^2*up^2)
    xd_pad = jnp.pad(xd.reshape(cmid, n, h, w),
                     ((0, 0), (0, 0), (pd, pd), (pd, pd)))
    pat = jnp.stack(
        [xd_pad[:, :, ki:ki + h, kj:kj + w] for ki in range(k) for kj in range(k)],
        axis=1,
    ).reshape(cmid * k2, m)                                        # rows: ci*k2 + kk
    w_enc2 = w_enc.reshape(w_enc.shape[0], cmid * k2)
    enc = conv1x1_pallas(w_enc2, b_enc, pat)                       # (k2*up^2, M)

    # encoder channel index is kk*up^2 + p  ==  pixel_shuffle + unfold in torch
    w_logits = enc.reshape(k2, p_up, m)

    # --- reassembly branch ----------------------------------------------------
    x_pad = jnp.pad(x, ((0, 0), (0, 0), (pd, pd), (pd, pd)))
    x_patches = jnp.stack(
        [x_pad[:, :, ki:ki + h, kj:kj + w] for ki in range(k) for kj in range(k)],
        axis=0,
    ).transpose(0, 2, 1, 3, 4).reshape(k2, c1, m)                  # (k2, C, M)

    o = carafe_reassemble_pallas(x_patches, w_logits)              # (P, C, M)

    # pixel shuffle to (C, N*H*up*W*up)  (pure layout plumbing)
    o = o.reshape(up, up, c1, n, h, w).transpose(2, 3, 4, 0, 5, 1)
    o = o.reshape(c1, n * h * up * w * up)

    # out: 1x1 conv (c1 -> c2)
    y = conv1x1_pallas(w_out, b_out, o)                            # (C2, N*Hup*Wup)
    c2 = y.shape[0]
    return y.reshape(c2, n, h * up, w * up).transpose(1, 0, 2, 3)


# ----------------------------------------------------------------------------
# Pure-JAX reference (mirrors the PyTorch module op-for-op)
# ----------------------------------------------------------------------------
def carafe_ref(x, params, kernel_size=3, up_factor=2):
    w_down, b_down, w_enc, b_enc, w_out, b_out = params
    n, c1, h, w = x.shape
    k, r = kernel_size, up_factor
    pd = k // 2
    hp = jax.lax.Precision.HIGHEST
    dn = ('NCHW', 'OIHW', 'NCHW')

    kt = jax.lax.conv_general_dilated(
        x, w_down.reshape(w_down.shape[0], c1, 1, 1), (1, 1), 'VALID',
        dimension_numbers=dn, precision=hp) + b_down[None, :, None, None]
    kt = jax.lax.conv_general_dilated(
        kt, w_enc, (1, 1), [(pd, pd), (pd, pd)],
        dimension_numbers=dn, precision=hp) + b_enc[None, :, None, None]
    # pixel_shuffle by r: (N, k2*r2, H, W) -> (N, k2, H*r, W*r)
    kt = kt.reshape(n, k * k, r, r, h, w).transpose(0, 1, 4, 2, 5, 3)
    kt = kt.reshape(n, k * k, h * r, w * r)
    kt = jax.nn.softmax(kt, axis=1)
    # unfold(2,r,r).unfold(3,r,r).reshape.permute -> (N, H, W, k2, r2)
    kt = kt.reshape(n, k * k, h, r, w, r).transpose(0, 1, 2, 4, 3, 5)
    kt = kt.reshape(n, k * k, h, w, r * r).transpose(0, 2, 3, 1, 4)
    # pad + unfold x -> (N, H, W, C, k2)
    xp = jnp.pad(x, ((0, 0), (0, 0), (pd, pd), (pd, pd)))
    patches = jnp.stack(
        [xp[:, :, ki:ki + h, kj:kj + w] for ki in range(k) for kj in range(k)],
        axis=-1).transpose(0, 2, 3, 1, 4)
    out = jnp.einsum('nhwck,nhwkp->nhwcp', patches, kt, precision=hp)
    out = out.reshape(n, h, w, -1).transpose(0, 3, 1, 2)
    out = out.reshape(n, c1, r, r, h, w).transpose(0, 1, 4, 2, 5, 3)
    out = out.reshape(n, c1, h * r, w * r)
    out = jax.lax.conv_general_dilated(
        out, w_out.reshape(w_out.shape[0], c1, 1, 1), (1, 1), 'VALID',
        dimension_numbers=dn, precision=hp) + b_out[None, :, None, None]
    return out


if __name__ == "__main__":
    B, C1, H, W = 2, 16, 16, 16
    C2, K, UP = 16, 3, 2
    CMID = C1 // 4

    key = jax.random.PRNGKey(0)
    kx, ka, kb, kc, kd, ke, kf = jax.random.split(key, 7)
    x = jax.random.normal(kx, (B, C1, H, W), dtype=jnp.float32)
    w_down = 0.1 * jax.random.normal(ka, (CMID, C1), dtype=jnp.float32)
    b_down = 0.1 * jax.random.normal(kb, (CMID,), dtype=jnp.float32)
    w_enc = 0.1 * jax.random.normal(kc, (UP * UP * K * K, CMID, K, K), dtype=jnp.float32)
    b_enc = 0.1 * jax.random.normal(kd, (UP * UP * K * K,), dtype=jnp.float32)
    w_out = 0.1 * jax.random.normal(ke, (C2, C1), dtype=jnp.float32)
    b_out = 0.1 * jax.random.normal(kf, (C2,), dtype=jnp.float32)
    params = (w_down, b_down, w_enc, b_enc, w_out, b_out)

    fwd = jax.jit(functools.partial(carafe_pallas, kernel_size=K, up_factor=UP))
    out = fwd(x, params)
    jax.block_until_ready(out)

    ref = carafe_ref(x, params, kernel_size=K, up_factor=UP)
    assert out.shape == (B, C2, H * UP, W * UP), out.shape
    assert jnp.allclose(out, ref, rtol=2e-3, atol=2e-3), float(
        jnp.max(jnp.abs(out - ref)))
    print("KERNEL_OK")
</pallas_src>

<mosaic_0001>
module attributes {stable_mosaic.version = 11 : i64} {
  func.func @_proj_kernel(%arg0: i32, %arg1: memref<4x16xf32, #tpu.memory_space<vmem>>, %arg2: memref<4x1xf32, #tpu.memory_space<vmem>>, %arg3: memref<16x512xf32, #tpu.memory_space<vmem>>, %arg4: memref<4x512xf32, #tpu.memory_space<vmem>>) attributes {dimension_semantics = [#tpu.dimension_semantics<parallel>], iteration_bounds = array<i64: 1>, scalar_prefetch = 0 : i64, scratch_operands = 0 : i64, tpu.core_type = #tpu.core_type<tc>, window_params = [{pipeline_mode = #tpu.pipeline_mode<synchronous>, transform_indices = @transform_0, window_bounds = array<i64: 4, 16>}, {pipeline_mode = #tpu.pipeline_mode<synchronous>, transform_indices = @transform_1, window_bounds = array<i64: 4, 1>}, {transform_indices = @transform_2, window_bounds = array<i64: 16, 512>}, {transform_indices = @transform_3, window_bounds = array<i64: 4, 512>}]} {
    %c0 = arith.constant 0 : index
    %c0_0 = arith.constant 0 : index
    %0 = vector.load %arg1[%c0, %c0_0] : memref<4x16xf32, #tpu.memory_space<vmem>>, vector<4x16xf32>
    %c0_1 = arith.constant 0 : index
    %c0_2 = arith.constant 0 : index
    %1 = vector.load %arg3[%c0_1, %c0_2] : memref<16x512xf32, #tpu.memory_space<vmem>>, vector<16x512xf32>
    %cst = arith.constant dense<0.000000e+00> : vector<4x512xf32>
    %2 = tpu.matmul %0, %1, %cst {dimension_numbers = #tpu.dot_dimension_numbers<[1], [0], [0], [1], [0, 0, 1, 1], [], []>} : vector<4x16xf32>, vector<16x512xf32>, vector<4x512xf32> -> vector<4x512xf32>
    %c0_3 = arith.constant 0 : index
    %c0_4 = arith.constant 0 : index
    %3 = vector.load %arg2[%c0_3, %c0_4] : memref<4x1xf32, #tpu.memory_space<vmem>>, vector<4x1xf32>
    %4 = vector.broadcast %3 : vector<4x1xf32> to vector<4x512xf32>
    %5 = arith.addf %2, %4 : vector<4x512xf32>
    %c0_5 = arith.constant 0 : index
    %c0_6 = arith.constant 0 : index
    %6 = vector.load %arg4[%c0_5, %c0_6] : memref<4x512xf32, #tpu.memory_space<vmem>>, vector<4x512xf32>
    tpu.vector_store %arg4[%c0_5, %c0_6], %5 {strides = array<i32>} : memref<4x512xf32, #tpu.memory_space<vmem>>, vector<4x512xf32>,
    return
  }
  func.func @transform_0(%arg0: i32) -> (i32, i32) {
    %c0_i32 = arith.constant 0 : i32
    %c0_i32_0 = arith.constant 0 : i32
    %c0_i32_1 = arith.constant 0 : i32
    return %c0_i32, %c0_i32_0 : i32, i32
  }
  func.func @transform_1(%arg0: i32) -> (i32, i32) {
    %c0_i32 = arith.constant 0 : i32
    %c0_i32_0 = arith.constant 0 : i32
    %c0_i32_1 = arith.constant 0 : i32
    return %c0_i32, %c0_i32_0 : i32, i32
  }
  func.func @transform_2(%arg0: i32) -> (i32, i32) {
    %c0_i32 = arith.constant 0 : i32
    %c0_i32_0 = arith.constant 0 : i32
    return %c0_i32, %arg0 : i32, i32
  }
  func.func @transform_3(%arg0: i32) -> (i32, i32) {
    %c0_i32 = arith.constant 0 : i32
    %c0_i32_0 = arith.constant 0 : i32
    return %c0_i32, %arg0 : i32, i32
  }
}

module attributes {stable_mosaic.version = 11 : i64} {
  func.func @_proj_kernel(%arg0: i32, %arg1: memref<36x36xf32, #tpu.memory_space<vmem>>, %arg2: memref<36x1xf32, #tpu.memory_space<vmem>>, %arg3: memref<36x512xf32, #tpu.memory_space<vmem>>, %arg4: memref<36x512xf32, #tpu.memory_space<vmem>>) attributes {dimension_semantics = [#tpu.dimension_semantics<parallel>], iteration_bounds = array<i64: 1>, scalar_prefetch = 0 : i64, scratch_operands = 0 : i64, tpu.core_type = #tpu.core_type<tc>, window_params = [{pipeline_mode = #tpu.pipeline_mode<synchronous>, transform_indices = @transform_0, window_bounds = array<i64: 36, 36>}, {pipeline_mode = #tpu.pipeline_mode<synchronous>, transform_indices = @transform_1, window_bounds = array<i64: 36, 1>}, {transform_indices = @transform_2, window_bounds = array<i64: 36, 512>}, {transform_indices = @transform_3, window_bounds = array<i64: 36, 512>}]} {
    %c0 = arith.constant 0 : index
    %c0_0 = arith.constant 0 : index
    %0 = vector.load %arg1[%c0, %c0_0] : memref<36x36xf32, #tpu.memory_space<vmem>>, vector<36x36xf32>
    %c0_1 = arith.constant 0 : index
    %c0_2 = arith.constant 0 : index
    %1 = vector.load %arg3[%c0_1, %c0_2] : memref<36x512xf32, #tpu.memory_space<vmem>>, vector<36x512xf32>
    %cst = arith.constant dense<0.000000e+00> : vector<36x512xf32>
    %2 = tpu.matmul %0, %1, %cst {dimension_numbers = #tpu.dot_dimension_numbers<[1], [0], [0], [1], [0, 0, 1, 1], [], []>} : vector<36x36xf32>, vector<36x512xf32>, vector<36x512xf32> -> vector<36x512xf32>
    %c0_3 = arith.constant 0 : index
    %c0_4 = arith.constant 0 : index
    %3 = vector.load %arg2[%c0_3, %c0_4] : memref<36x1xf32, #tpu.memory_space<vmem>>, vector<36x1xf32>
    %4 = vector.broadcast %3 : vector<36x1xf32> to vector<36x512xf32>
    %5 = arith.addf %2, %4 : vector<36x512xf32>
    %c0_5 = arith.constant 0 : index
    %c0_6 = arith.constant 0 : index
    %6 = vector.load %arg4[%c0_5, %c0_6] : memref<36x512xf32, #tpu.memory_space<vmem>>, vector<36x512xf32>
    tpu.vector_store %arg4[%c0_5, %c0_6], %5 {strides = array<i32>} : memref<36x512xf32, #tpu.memory_space<vmem>>, vector<36x512xf32>,
    return
  }
  func.func @transform_0(%arg0: i32) -> (i32, i32) {
    %c0_i32 = arith.constant 0 : i32
    %c0_i32_0 = arith.constant 0 : i32
    %c0_i32_1 = arith.constant 0 : i32
    return %c0_i32, %c0_i32_0 : i32, i32
  }
  func.func @transform_1(%arg0: i32) -> (i32, i32) {
    %c0_i32 = arith.constant 0 : i32
    %c0_i32_0 = arith.constant 0 : i32
    %c0_i32_1 = arith.constant 0 : i32
    return %c0_i32, %c0_i32_0 : i32, i32
  }
  func.func @transform_2(%arg0: i32) -> (i32, i32) {
    %c0_i32 = arith.constant 0 : i32
    %c0_i32_0 = arith.constant 0 : i32
    return %c0_i32, %arg0 : i32, i32
  }
  func.func @transform_3(%arg0: i32) -> (i32, i32) {
    %c0_i32 = arith.constant 0 : i32
    %c0_i32_0 = arith.constant 0 : i32
    return %c0_i32, %arg0 : i32, i32
  }
}

module attributes {stable_mosaic.version = 11 : i64} {
  func.func @_reassembly_kernel(%arg0: i32, %arg1: memref<9x16x512xf32, #tpu.memory_space<vmem>>, %arg2: memref<9x4x512xf32, #tpu.memory_space<vmem>>, %arg3: memref<4x16x512xf32, #tpu.memory_space<vmem>>) attributes {dimension_semantics = [#tpu.dimension_semantics<parallel>], iteration_bounds = array<i64: 1>, scalar_prefetch = 0 : i64, scratch_operands = 0 : i64, tpu.core_type = #tpu.core_type<tc>, window_params = [{transform_indices = @transform_0, window_bounds = array<i64: 9, 16, 512>}, {transform_indices = @transform_1, window_bounds = array<i64: 9, 4, 512>}, {transform_indices = @transform_2, window_bounds = array<i64: 4, 16, 512>}]} {
    %c0 = arith.constant 0 : index
    %c0_0 = arith.constant 0 : index
    %c0_1 = arith.constant 0 : index
    %0 = vector.load %arg2[%c0, %c0_0, %c0_1] : memref<9x4x512xf32, #tpu.memory_space<vmem>>, vector<9x4x512xf32>
    %cst = arith.constant dense<0xFF800000> : vector<4x512xf32>
    %1 = vector.multi_reduction <maximumf>, %0, %cst [0] : vector<9x4x512xf32> to vector<4x512xf32>
    %2 = vector.shape_cast %1 : vector<4x512xf32> to vector<1x4x512xf32>
    %3 = vector.broadcast %2 : vector<1x4x512xf32> to vector<9x4x512xf32>
    %4 = arith.subf %0, %3 : vector<9x4x512xf32>
    %5 = math.exp %4 : vector<9x4x512xf32>
    %cst_2 = arith.constant dense<0.000000e+00> : vector<4x512xf32>
    %6 = vector.multi_reduction <add>, %5, %cst_2 [0] : vector<9x4x512xf32> to vector<4x512xf32>
    %7 = vector.shape_cast %6 : vector<4x512xf32> to vector<1x4x512xf32>
    %8 = vector.broadcast %7 : vector<1x4x512xf32> to vector<9x4x512xf32>
    %9 = arith.divf %5, %8 : vector<9x4x512xf32>
    %c0_3 = arith.constant 0 : index
    %c0_4 = arith.constant 0 : index
    %c0_5 = arith.constant 0 : index
    %10 = vector.load %arg1[%c0_3, %c0_4, %c0_5] : memref<9x16x512xf32, #tpu.memory_space<vmem>>, vector<9x16x512xf32>
    %11 = vector.extract_strided_slice %10 {offsets = [0, 0, 0], sizes = [1, 16, 512], strides = [1, 1, 1]} : vector<9x16x512xf32> to vector<1x16x512xf32>
    %12 = vector.shape_cast %11 : vector<1x16x512xf32> to vector<16x512xf32>
    %13 = vector.extract_strided_slice %9 {offsets = [0, 0, 0], sizes = [1, 1, 512], strides = [1, 1, 1]} : vector<9x4x512xf32> to vector<1x1x512xf32>
    %14 = vector.shape_cast %13 : vector<1x1x512xf32> to vector<1x512xf32>
    %15 = vector.broadcast %14 : vector<1x512xf32> to vector<16x512xf32>
    %16 = arith.mulf %12, %15 : vector<16x512xf32>
    %17 = vector.extract_strided_slice %10 {offsets = [1, 0, 0], sizes = [1, 16, 512], strides = [1, 1, 1]} : vector<9x16x512xf32> to vector<1x16x512xf32>
    %18 = vector.shape_cast %17 : vector<1x16x512xf32> to vector<16x512xf32>
    %19 = vector.extract_strided_slice %9 {offsets = [1, 0, 0], sizes = [1, 1, 512], strides = [1, 1, 1]} : vector<9x4x512xf32> to vector<1x1x512xf32>
    %20 = vector.shape_cast %19 : vector<1x1x512xf32> to vector<1x512xf32>
    %21 = vector.broadcast %20 : vector<1x512xf32> to vector<16x512xf32>
    %22 = arith.mulf %18, %21 : vector<16x512xf32>
    %23 = arith.addf %16, %22 : vector<16x512xf32>
    %24 = vector.extract_strided_slice %10 {offsets = [2, 0, 0], sizes = [1, 16, 512], strides = [1, 1, 1]} : vector<9x16x512xf32> to vector<1x16x512xf32>
    %25 = vector.shape_cast %24 : vector<1x16x512xf32> to vector<16x512xf32>
    %26 = vector.extract_strided_slice %9 {offsets = [2, 0, 0], sizes = [1, 1, 512], strides = [1, 1, 1]} : vector<9x4x512xf32> to vector<1x1x512xf32>
    %27 = vector.shape_cast %26 : vector<1x1x512xf32> to vector<1x512xf32>
    %28 = vector.broadcast %27 : vector<1x512xf32> to vector<16x512xf32>
    %29 = arith.mulf %25, %28 : vector<16x512xf32>
    %30 = arith.addf %23, %29 : vector<16x512xf32>
    %31 = vector.extract_strided_slice %10 {offsets = [3, 0, 0], sizes = [1, 16, 512], strides = [1, 1, 1]} : vector<9x16x512xf32> to vector<1x16x512xf32>
    %32 = vector.shape_cast %31 : vector<1x16x512xf32> to vector<16x512xf32>
    %33 = vector.extract_strided_slice %9 {offsets = [3, 0, 0], sizes = [1, 1, 512], strides = [1, 1, 1]} : vector<9x4x512xf32> to vector<1x1x512xf32>
    %34 = vector.shape_cast %33 : vector<1x1x512xf32> to vector<1x512xf32>
    %35 = vector.broadcast %34 : vector<1x512xf32> to vector<16x512xf32>
    %36 = arith.mulf %32, %35 : vector<16x512xf32>
    %37 = arith.addf %30, %36 : vector<16x512xf32>
    %38 = vector.extract_strided_slice %10 {offsets = [4, 0, 0], sizes = [1, 16, 512], strides = [1, 1, 1]} : vector<9x16x512xf32> to vector<1x16x512xf32>
    %39 = vector.shape_cast %38 : vector<1x16x512xf32> to vector<16x512xf32>
    %40 = vector.extract_strided_slice %9 {offsets = [4, 0, 0], sizes = [1, 1, 512], strides = [1, 1, 1]} : vector<9x4x512xf32> to vector<1x1x512xf32>
    %41 = vector.shape_cast %40 : vector<1x1x512xf32> to vector<1x512xf32>
    %42 = vector.broadcast %41 : vector<1x512xf32> to vector<16x512xf32>
    %43 = arith.mulf %39, %42 : vector<16x512xf32>
    %44 = arith.addf %37, %43 : vector<16x512xf32>
    %45 = vector.extract_strided_slice %10 {offsets = [5, 0, 0], sizes = [1, 16, 512], strides = [1, 1, 1]} : vector<9x16x512xf32> to vector<1x16x512xf32>
    %46 = vector.shape_cast %45 : vector<1x16x512xf32> to vector<16x512xf32>
    %47 = vector.extract_strided_slice %9 {offsets = [5, 0, 0], sizes = [1, 1, 512], strides = [1, 1, 1]} : vector<9x4x512xf32> to vector<1x1x512xf32>
    %48 = vector.shape_cast %47 : vector<1x1x512xf32> to vector<1x512xf32>
    %49 = vector.broadcast %48 : vector<1x512xf32> to vector<16x512xf32>
    %50 = arith.mulf %46, %49 : vector<16x512xf32>
    %51 = arith.addf %44, %50 : vector<16x512xf32>
    %52 = vector.extract_strided_slice %10 {offsets = [6, 0, 0], sizes = [1, 16, 512], strides = [1, 1, 1]} : vector<9x16x512xf32> to vector<1x16x512xf32>
    %53 = vector.shape_cast %52 : vector<1x16x512xf32> to vector<16x512xf32>
    %54 = vector.extract_strided_slice %9 {offsets = [6, 0, 0], sizes = [1, 1, 512], strides = [1, 1, 1]} : vector<9x4x512xf32> to vector<1x1x512xf32>
    %55 = vector.shape_cast %54 : vector<1x1x512xf32> to vector<1x512xf32>
    %56 = vector.broadcast %55 : vector<1x512xf32> to vector<16x512xf32>
    %57 = arith.mulf %53, %56 : vector<16x512xf32>
    %58 = arith.addf %51, %57 : vector<16x512xf32>
    %59 = vector.extract_strided_slice %10 {offsets = [7, 0, 0], sizes = [1, 16, 512], strides = [1, 1, 1]} : vector<9x16x512xf32> to vector<1x16x512xf32>
    %60 = vector.shape_cast %59 : vector<1x16x512xf32> to vector<16x512xf32>
    %61 = vector.extract_strided_slice %9 {offsets = [7, 0, 0], sizes = [1, 1, 512], strides = [1, 1, 1]} : vector<9x4x512xf32> to vector<1x1x512xf32>
    %62 = vector.shape_cast %61 : vector<1x1x512xf32> to vector<1x512xf32>
    %63 = vector.broadcast %62 : vector<1x512xf32> to vector<16x512xf32>
    %64 = arith.mulf %60, %63 : vector<16x512xf32>
    %65 = arith.addf %58, %64 : vector<16x512xf32>
    %66 = vector.extract_strided_slice %10 {offsets = [8, 0, 0], sizes = [1, 16, 512], strides = [1, 1, 1]} : vector<9x16x512xf32> to vector<1x16x512xf32>
    %67 = vector.shape_cast %66 : vector<1x16x512xf32> to vector<16x512xf32>
    %68 = vector.extract_strided_slice %9 {offsets = [8, 0, 0], sizes = [1, 1, 512], strides = [1, 1, 1]} : vector<9x4x512xf32> to vector<1x1x512xf32>
    %69 = vector.shape_cast %68 : vector<1x1x512xf32> to vector<1x512xf32>
    %70 = vector.broadcast %69 : vector<1x512xf32> to vector<16x512xf32>
    %71 = arith.mulf %67, %70 : vector<16x512xf32>
    %72 = arith.addf %65, %71 : vector<16x512xf32>
    %c0_6 = arith.constant 0 : index
    %c0_7 = arith.constant 0 : index
    %c0_8 = arith.constant 0 : index
    %73 = vector.load %arg3[%c0_6, %c0_7, %c0_8] : memref<4x16x512xf32, #tpu.memory_space<vmem>>, vector<1x16x512xf32>
    %74 = vector.shape_cast %73 : vector<1x16x512xf32> to vector<16x512xf32>
    %75 = vector.shape_cast %72 : vector<16x512xf32> to vector<1x16x512xf32>
    tpu.vector_store %arg3[%c0_6, %c0_7, %c0_8], %75 {strides = array<i32>} : memref<4x16x512xf32, #tpu.memory_space<vmem>>, vector<1x16x512xf32>,
    %76 = vector.extract_strided_slice %10 {offsets = [0, 0, 0], sizes = [1, 16, 512], strides = [1, 1, 1]} : vector<9x16x512xf32> to vector<1x16x512xf32>
    %77 = vector.shape_cast %76 : vector<1x16x512xf32> to vector<16x512xf32>
    %78 = vector.extract_strided_slice %9 {offsets = [0, 1, 0], sizes = [1, 1, 512], strides = [1, 1, 1]} : vector<9x4x512xf32> to vector<1x1x512xf32>
    %79 = vector.shape_cast %78 : vector<1x1x512xf32> to vector<1x512xf32>
    %80 = vector.broadcast %79 : vector<1x512xf32> to vector<16x512xf32>
    %81 = arith.mulf %77, %80 : vector<16x512xf32>
    %82 = vector.extract_strided_slice %10 {offsets = [1, 0, 0], sizes = [1, 16, 512], strides = [1, 1, 1]} : vector<9x16x512xf32> to vector<1x16x512xf32>
    %83 = vector.shape_cast %82 : vector<1x16x512xf32> to vector<16x512xf32>
    %84 = vector.extract_strided_slice %9 {offsets = [1, 1, 0], sizes = [1, 1, 512], strides = [1, 1, 1]} : vector<9x4x512xf32> to vector<1x1x512xf32>
    %85 = vector.shape_cast %84 : vector<1x1x512xf32> to vector<1x512xf32>
    %86 = vector.broadcast %85 : vector<1x512xf32> to vector<16x512xf32>
    %87 = arith.mulf %83, %86 : vector<16x512xf32>
    %88 = arith.addf %81, %87 : vector<16x512xf32>
    %89 = vector.extract_strided_slice %10 {offsets = [2, 0, 0], sizes = [1, 16, 512], strides = [1, 1, 1]} : vector<9x16x512xf32> to vector<1x16x512xf32>
    %90 = vector.shape_cast %89 : vector<1x16x512xf32> to vector<16x512xf32>
    %91 = vector.extract_strided_slice %9 {offsets = [2, 1, 0], sizes = [1, 1, 512], strides = [1, 1, 1]} : vector<9x4x512xf32> to vector<1x1x512xf32>
    %92 = vector.shape_cast %91 : vector<1x1x512xf32> to vector<1x512xf32>
    %93 = vector.broadcast %92 : vector<1x512xf32> to vector<16x512xf32>
    %94 = arith.mulf %90, %93 : vector<16x512xf32>
    %95 = arith.addf %88, %94 : vector<16x512xf32>
    %96 = vector.extract_strided_slice %10 {offsets = [3, 0, 0], sizes = [1, 16, 512], strides = [1, 1, 1]} : vector<9x16x512xf32> to vector<1x16x512xf32>
    %97 = vector.shape_cast %96 : vector<1x16x512xf32> to vector<16x512xf32>
    %98 = vector.extract_strided_slice %9 {offsets = [3, 1, 0], sizes = [1, 1, 512], strides = [1, 1, 1]} : vector<9x4x512xf32> to vector<1x1x512xf32>
    %99 = vector.shape_cast %98 : vector<1x1x512xf32> to vector<1x512xf32>
    %100 = vector.broadcast %99 : vector<1x512xf32> to vector<16x512xf32>
    %101 = arith.mulf %97, %100 : vector<16x512xf32>
    %102 = arith.addf %95, %101 : vector<16x512xf32>
    %103 = vector.extract_strided_slice %10 {offsets = [4, 0, 0], sizes = [1, 16, 512], strides = [1, 1, 1]} : vector<9x16x512xf32> to vector<1x16x512xf32>
    %104 = vector.shape_cast %103 : vector<1x16x512xf32> to vector<16x512xf32>
    %105 = vector.extract_strided_slice %9 {offsets = [4, 1, 0], sizes = [1, 1, 512], strides = [1, 1, 1]} : vector<9x4x512xf32> to vector<1x1x512xf32>
    %106 = vector.shape_cast %105 : vector<1x1x512xf32> to vector<1x512xf32>
    %107 = vector.broadcast %106 : vector<1x512xf32> to vector<16x512xf32>
    %108 = arith.mulf %104, %107 : vector<16x512xf32>
    %109 = arith.addf %102, %108 : vector<16x512xf32>
    %110 = vector.extract_strided_slice %10 {offsets = [5, 0, 0], sizes = [1, 16, 512], strides = [1, 1, 1]} : vector<9x16x512xf32> to vector<1x16x512xf32>
    %111 = vector.shape_cast %110 : vector<1x16x512xf32> to vector<16x512xf32>
    %112 = vector.extract_strided_slice %9 {offsets = [5, 1, 0], sizes = [1, 1, 512], strides = [1, 1, 1]} : vector<9x4x512xf32> to vector<1x1x512xf32>
    %113 = vector.shape_cast %112 : vector<1x1x512xf32> to vector<1x512xf32>
    %114 = vector.broadcast %113 : vector<1x512xf32> to vector<16x512xf32>
    %115 = arith.mulf %111, %114 : vector<16x512xf32>
    %116 = arith.addf %109, %115 : vector<16x512xf32>
    %117 = vector.extract_strided_slice %10 {offsets = [6, 0, 0], sizes = [1, 16, 512], strides = [1, 1, 1]} : vector<9x16x512xf32> to vector<1x16x512xf32>
    %118 = vector.shape_cast %117 : vector<1x16x512xf32> to vector<16x512xf32>
    %119 = vector.extract_strided_slice %9 {offsets = [6, 1, 0], sizes = [1, 1, 512], strides = [1, 1, 1]} : vector<9x4x512xf32> to vector<1x1x512xf32>
    %120 = vector.shape_cast %119 : vector<1x1x512xf32> to vector<1x512xf32>
    %121 = vector.broadcast %120 : vector<1x512xf32> to vector<16x512xf32>
    %122 = arith.mulf %118, %121 : vector<16x512xf32>
    %123 = arith.addf %116, %122 : vector<16x512xf32>
    %124 = vector.extract_strided_slice %10 {offsets = [7, 0, 0], sizes = [1, 16, 512], strides = [1, 1, 1]} : vector<9x16x512xf32> to vector<1x16x512xf32>
    %125 = vector.shape_cast %124 : vector<1x16x512xf32> to vector<16x512xf32>
    %126 = vector.extract_strided_slice %9 {offsets = [7, 1, 0], sizes = [1, 1, 512], strides = [1, 1, 1]} : vector<9x4x512xf32> to vector<1x1x512xf32>
    %127 = vector.shape_cast %126 : vector<1x1x512xf32> to vector<1x512xf32>
    %128 = vector.broadcast %127 : vector<1x512xf32> to vector<16x512xf32>
    %129 = arith.mulf %125, %128 : vector<16x512xf32>
    %130 = arith.addf %123, %129 : vector<16x512xf32>
    %131 = vector.extract_strided_slice %10 {offsets = [8, 0, 0], sizes = [1, 16, 512], strides = [1, 1, 1]} : vector<9x16x512xf32> to vector<1x16x512xf32>
    %132 = vector.shape_cast %131 : vector<1x16x512xf32> to vector<16x512xf32>
    %133 = vector.extract_strided_slice %9 {offsets = [8, 1, 0], sizes = [1, 1, 512], strides = [1, 1, 1]} : vector<9x4x512xf32> to vector<1x1x512xf32>
    %134 = vector.shape_cast %133 : vector<1x1x512xf32> to vector<1x512xf32>
    %135 = vector.broadcast %134 : vector<1x512xf32> to vector<16x512xf32>
    %136 = arith.mulf %132, %135 : vector<16x512xf32>
    %137 = arith.addf %130, %136 : vector<16x512xf32>
    %c1 = arith.constant 1 : index
    %c0_9 = arith.constant 0 : index
    %c0_10 = arith.constant 0 : index
    %138 = vector.load %arg3[%c1, %c0_9, %c0_10] : memref<4x16x512xf32, #tpu.memory_space<vmem>>, vector<1x16x512xf32>
    %139 = vector.shape_cast %138 : vector<1x16x512xf32> to vector<16x512xf32>
    %140 = vector.shape_cast %137 : vector<16x512xf32> to vector<1x16x512xf32>
    tpu.vector_store %arg3[%c1, %c0_9, %c0_10], %140 {strides = array<i32>} : memref<4x16x512xf32, #tpu.memory_space<vmem>>, vector<1x16x512xf32>,
    %141 = vector.extract_strided_slice %10 {offsets = [0, 0, 0], sizes = [1, 16, 512], strides = [1, 1, 1]} : vector<9x16x512xf32> to vector<1x16x512xf32>
    %142 = vector.shape_cast %141 : vector<1x16x512xf32> to vector<16x512xf32>
    %143 = vector.extract_strided_slice %9 {offsets = [0, 2, 0], sizes = [1, 1, 512], strides = [1, 1, 1]} : vector<9x4x512xf32> to vector<1x1x512xf32>
    %144 = vector.shape_cast %143 : vector<1x1x512xf32> to vector<1x512xf32>
    %145 = vector.broadcast %144 : vector<1x512xf32> to vector<16x512xf32>
    %146 = arith.mulf %142, %145 : vector<16x512xf32>
    %147 = vector.extract_strided_slice %10 {offsets = [1, 0, 0], sizes = [1, 16, 512], strides = [1, 1, 1]} : vector<9x16x512xf32> to vector<1x16x512xf32>
    %148 = vector.shape_cast %147 : vector<1x16x512xf32> to vector<16x512xf32>
    %149 = vector.extract_strided_slice %9 {offsets = [1, 2, 0], sizes = [1, 1, 512], strides = [1, 1, 1]} : vector<9x4x512xf32> to vector<1x1x512xf32>
    %150 = vector.shape_cast %149 : vector<1x1x512xf32> to vector<1x512xf32>
    %151 = vector.broadcast %150 : vector<1x512xf32> to vector<16x512xf32>
    %152 = arith.mulf %148, %151 : vector<16x512xf32>
    %153 = arith.addf %146, %152 : vector<16x512xf32>
    %154 = vector.extract_strided_slice %10 {offsets = [2, 0, 0], sizes = [1, 16, 512], strides = [1, 1, 1]} : vector<9x16x512xf32> to vector<1x16x512xf32>
    %155 = vector.shape_cast %154 : vector<1x16x512xf32> to vector<16x512xf32>
    %156 = vector.extract_strided_slice %9 {offsets = [2, 2, 0], sizes = [1, 1, 512], strides = [1, 1, 1]} : vector<9x4x512xf32> to vector<1x1x512xf32>
    %157 = vector.shape_cast %156 : vector<1x1x512xf32> to vector<1x512xf32>
    %158 = vector.broadcast %157 : vector<1x512xf32> to vector<16x512xf32>
    %159 = arith.mulf %155, %158 : vector<16x512xf32>
    %160 = arith.addf %153, %159 : vector<16x512xf32>
    %161 = vector.extract_strided_slice %10 {offsets = [3, 0, 0], sizes = [1, 16, 512], strides = [1, 1, 1]} : vector<9x16x512xf32> to vector<1x16x512xf32>
    %162 = vector.shape_cast %161 : vector<1x16x512xf32> to vector<16x512xf32>
    %163 = vector.extract_strided_slice %9 {offsets = [3, 2, 0], sizes = [1, 1, 512], strides = [1, 1, 1]} : vector<9x4x512xf32> to vector<1x1x512xf32>
    %164 = vector.shape_cast %163 : vector<1x1x512xf32> to vector<1x512xf32>
    %165 = vector.broadcast %164 : vector<1x512xf32> to vector<16x512xf32>
    %166 = arith.mulf %162, %165 : vector<16x512xf32>
    %167 = arith.addf %160, %166 : vector<16x512xf32>
    %168 = vector.extract_strided_slice %10 {offsets = [4, 0, 0], sizes = [1, 16, 512], strides = [1, 1, 1]} : vector<9x16x512xf32> to vector<1x16x512xf32>
    %169 = vector.shape_cast %168 : vector<1x16x512xf32> to vector<16x512xf32>
    %170 = vector.extract_strided_slice %9 {offsets = [4, 2, 0], sizes = [1, 1, 512], strides = [1, 1, 1]} : vector<9x4x512xf32> to vector<1x1x512xf32>
    %171 = vector.shape_cast %170 : vector<1x1x512xf32> to vector<1x512xf32>
    %172 = vector.broadcast %171 : vector<1x512xf32> to vector<16x512xf32>
    %173 = arith.mulf %169, %172 : vector<16x512xf32>
    %174 = arith.addf %167, %173 : vector<16x512xf32>
    %175 = vector.extract_strided_slice %10 {offsets = [5, 0, 0], sizes = [1, 16, 512], strides = [1, 1, 1]} : vector<9x16x512xf32> to vector<1x16x512xf32>
    %176 = vector.shape_cast %175 : vector<1x16x512xf32> to vector<16x512xf32>
    %177 = vector.extract_strided_slice %9 {offsets = [5, 2, 0], sizes = [1, 1, 512], strides = [1, 1, 1]} : vector<9x4x512xf32> to vector<1x1x512xf32>
    %178 = vector.shape_cast %177 : vector<1x1x512xf32> to vector<1x512xf32>
    %179 = vector.broadcast %178 : vector<1x512xf32> to vector<16x512xf32>
    %180 = arith.mulf %176, %179 : vector<16x512xf32>
    %181 = arith.addf %174, %180 : vector<16x512xf32>
    %182 = vector.extract_strided_slice %10 {offsets = [6, 0, 0], sizes = [1, 16, 512], strides = [1, 1, 1]} : vector<9x16x512xf32> to vector<1x16x512xf32>
    %183 = vector.shape_cast %182 : vector<1x16x512xf32> to vector<16x512xf32>
    %184 = vector.extract_strided_slice %9 {offsets = [6, 2, 0], sizes = [1, 1, 512], strides = [1, 1, 1]} : vector<9x4x512xf32> to vector<1x1x512xf32>
    %185 = vector.shape_cast %184 : vector<1x1x512xf32> to vector<1x512xf32>
    %186 = vector.broadcast %185 : vector<1x512xf32> to vector<16x512xf32>
    %187 = arith.mulf %183, %186 : vector<16x512xf32>
    %188 = arith.addf %181, %187 : vector<16x512xf32>
    %189 = vector.extract_strided_slice %10 {offsets = [7, 0, 0], sizes = [1, 16, 512], strides = [1, 1, 1]} : vector<9x16x512xf32> to vector<1x16x512xf32>
    %190 = vector.shape_cast %189 : vector<1x16x512xf32> to vector<16x512xf32>
    %191 = vector.extract_strided_slice %9 {offsets = [7, 2, 0], sizes = [1, 1, 512], strides = [1, 1, 1]} : vector<9x4x512xf32> to vector<1x1x512xf32>
    %192 = vector.shape_cast %191 : vector<1x1x512xf32> to vector<1x512xf32>
    %193 = vector.broadcast %192 : vector<1x512xf32> to vector<16x512xf32>
    %194 = arith.mulf %190, %193 : vector<16x512xf32>
    %195 = arith.addf %188, %194 : vector<16x512xf32>
    %196 = vector.extract_strided_slice %10 {offsets = [8, 0, 0], sizes = [1, 16, 512], strides = [1, 1, 1]} : vector<9x16x512xf32> to vector<1x16x512xf32>
    %197 = vector.shape_cast %196 : vector<1x16x512xf32> to vector<16x512xf32>
    %198 = vector.extract_strided_slice %9 {offsets = [8, 2, 0], sizes = [1, 1, 512], strides = [1, 1, 1]} : vector<9x4x512xf32> to vector<1x1x512xf32>
    %199 = vector.shape_cast %198 : vector<1x1x512xf32> to vector<1x512xf32>
    %200 = vector.broadcast %199 : vector<1x512xf32> to vector<16x512xf32>
    %201 = arith.mulf %197, %200 : vector<16x512xf32>
    %202 = arith.addf %195, %201 : vector<16x512xf32>
    %c2 = arith.constant 2 : index
    %c0_11 = arith.constant 0 : index
    %c0_12 = arith.constant 0 : index
    %203 = vector.load %arg3[%c2, %c0_11, %c0_12] : memref<4x16x512xf32, #tpu.memory_space<vmem>>, vector<1x16x512xf32>
    %204 = vector.shape_cast %203 : vector<1x16x512xf32> to vector<16x512xf32>
    %205 = vector.shape_cast %202 : vector<16x512xf32> to vector<1x16x512xf32>
    tpu.vector_store %arg3[%c2, %c0_11, %c0_12], %205 {strides = array<i32>} : memref<4x16x512xf32, #tpu.memory_space<vmem>>, vector<1x16x512xf32>,
    %206 = vector.extract_strided_slice %10 {offsets = [0, 0, 0], sizes = [1, 16, 512], strides = [1, 1, 1]} : vector<9x16x512xf32> to vector<1x16x512xf32>
    %207 = vector.shape_cast %206 : vector<1x16x512xf32> to vector<16x512xf32>
    %208 = vector.extract_strided_slice %9 {offsets = [0, 3, 0], sizes = [1, 1, 512], strides = [1, 1, 1]} : vector<9x4x512xf32> to vector<1x1x512xf32>
    %209 = vector.shape_cast %208 : vector<1x1x512xf32> to vector<1x512xf32>
    %210 = vector.broadcast %209 : vector<1x512xf32> to vector<16x512xf32>
    %211 = arith.mulf %207, %210 : vector<16x512xf32>
    %212 = vector.extract_strided_slice %10 {offsets = [1, 0, 0], sizes = [1, 16, 512], strides = [1, 1, 1]} : vector<9x16x512xf32> to vector<1x16x512xf32>
    %213 = vector.shape_cast %212 : vector<1x16x512xf32> to vector<16x512xf32>
    %214 = vector.extract_strided_slice %9 {offsets = [1, 3, 0], sizes = [1, 1, 512], strides = [1, 1, 1]} : vector<9x4x512xf32> to vector<1x1x512xf32>
    %215 = vector.shape_cast %214 : vector<1x1x512xf32> to vector<1x512xf32>
    %216 = vector.broadcast %215 : vector<1x512xf32> to vector<16x512xf32>
    %217 = arith.mulf %213, %216 : vector<16x512xf32>
    %218 = arith.addf %211, %217 : vector<16x512xf32>
    %219 = vector.extract_strided_slice %10 {offsets = [2, 0, 0], sizes = [1, 16, 512], strides = [1, 1, 1]} : vector<9x16x512xf32> to vector<1x16x512xf32>
    %220 = vector.shape_cast %219 : vector<1x16x512xf32> to vector<16x512xf32>
    %221 = vector.extract_strided_slice %9 {offsets = [2, 3, 0], sizes = [1, 1, 512], strides = [1, 1, 1]} : vector<9x4x512xf32> to vector<1x1x512xf32>
    %222 = vector.shape_cast %221 : vector<1x1x512xf32> to vector<1x512xf32>
    %223 = vector.broadcast %222 : vector<1x512xf32> to vector<16x512xf32>
    %224 = arith.mulf %220, %223 : vector<16x512xf32>
    %225 = arith.addf %218, %224 : vector<16x512xf32>
    %226 = vector.extract_strided_slice %10 {offsets = [3, 0, 0], sizes = [1, 16, 512], strides = [1, 1, 1]} : vector<9x16x512xf32> to vector<1x16x512xf32>
    %227 = vector.shape_cast %226 : vector<1x16x512xf32> to vector<16x512xf32>
    %228 = vector.extract_strided_slice %9 {offsets = [3, 3, 0], sizes = [1, 1, 512], strides = [1, 1, 1]} : vector<9x4x512xf32> to vector<1x1x512xf32>
    %229 = vector.shape_cast %228 : vector<1x1x512xf32> to vector<1x512xf32>
    %230 = vector.broadcast %229 : vector<1x512xf32> to vector<16x512xf32>
    %231 = arith.mulf %227, %230 : vector<16x512xf32>
    %232 = arith.addf %225, %231 : vector<16x512xf32>
    %233 = vector.extract_strided_slice %10 {offsets = [4, 0, 0], sizes = [1, 16, 512], strides = [1, 1, 1]} : vector<9x16x512xf32> to vector<1x16x512xf32>
    %234 = vector.shape_cast %233 : vector<1x16x512xf32> to vector<16x512xf32>
    %235 = vector.extract_strided_slice %9 {offsets = [4, 3, 0], sizes = [1, 1, 512], strides = [1, 1, 1]} : vector<9x4x512xf32> to vector<1x1x512xf32>
    %236 = vector.shape_cast %235 : vector<1x1x512xf32> to vector<1x512xf32>
    %237 = vector.broadcast %236 : vector<1x512xf32> to vector<16x512xf32>
    %238 = arith.mulf %234, %237 : vector<16x512xf32>
    %239 = arith.addf %232, %238 : vector<16x512xf32>
    %240 = vector.extract_strided_slice %10 {offsets = [5, 0, 0], sizes = [1, 16, 512], strides = [1, 1, 1]} : vector<9x16x512xf32> to vector<1x16x512xf32>
    %241 = vector.shape_cast %240 : vector<1x16x512xf32> to vector<16x512xf32>
    %242 = vector.extract_strided_slice %9 {offsets = [5, 3, 0], sizes = [1, 1, 512], strides = [1, 1, 1]} : vector<9x4x512xf32> to vector<1x1x512xf32>
    %243 = vector.shape_cast %242 : vector<1x1x512xf32> to vector<1x512xf32>
    %244 = vector.broadcast %243 : vector<1x512xf32> to vector<16x512xf32>
    %245 = arith.mulf %241, %244 : vector<16x512xf32>
    %246 = arith.addf %239, %245 : vector<16x512xf32>
    %247 = vector.extract_strided_slice %10 {offsets = [6, 0, 0], sizes = [1, 16, 512], strides = [1, 1, 1]} : vector<9x16x512xf32> to vector<1x16x512xf32>
    %248 = vector.shape_cast %247 : vector<1x16x512xf32> to vector<16x512xf32>
    %249 = vector.extract_strided_slice %9 {offsets = [6, 3, 0], sizes = [1, 1, 512], strides = [1, 1, 1]} : vector<9x4x512xf32> to vector<1x1x512xf32>
    %250 = vector.shape_cast %249 : vector<1x1x512xf32> to vector<1x512xf32>
    %251 = vector.broadcast %250 : vector<1x512xf32> to vector<16x512xf32>
    %252 = arith.mulf %248, %251 : vector<16x512xf32>
    %253 = arith.addf %246, %252 : vector<16x512xf32>
    %254 = vector.extract_strided_slice %10 {offsets = [7, 0, 0], sizes = [1, 16, 512], strides = [1, 1, 1]} : vector<9x16x512xf32> to vector<1x16x512xf32>
    %255 = vector.shape_cast %254 : vector<1x16x512xf32> to vector<16x512xf32>
    %256 = vector.extract_strided_slice %9 {offsets = [7, 3, 0], sizes = [1, 1, 512], strides = [1, 1, 1]} : vector<9x4x512xf32> to vector<1x1x512xf32>
    %257 = vector.shape_cast %256 : vector<1x1x512xf32> to vector<1x512xf32>
    %258 = vector.broadcast %257 : vector<1x512xf32> to vector<16x512xf32>
    %259 = arith.mulf %255, %258 : vector<16x512xf32>
    %260 = arith.addf %253, %259 : vector<16x512xf32>
    %261 = vector.extract_strided_slice %10 {offsets = [8, 0, 0], sizes = [1, 16, 512], strides = [1, 1, 1]} : vector<9x16x512xf32> to vector<1x16x512xf32>
    %262 = vector.shape_cast %261 : vector<1x16x512xf32> to vector<16x512xf32>
    %263 = vector.extract_strided_slice %9 {offsets = [8, 3, 0], sizes = [1, 1, 512], strides = [1, 1, 1]} : vector<9x4x512xf32> to vector<1x1x512xf32>
    %264 = vector.shape_cast %263 : vector<1x1x512xf32> to vector<1x512xf32>
    %265 = vector.broadcast %264 : vector<1x512xf32> to vector<16x512xf32>
    %266 = arith.mulf %262, %265 : vector<16x512xf32>
    %267 = arith.addf %260, %266 : vector<16x512xf32>
    %c3 = arith.constant 3 : index
    %c0_13 = arith.constant 0 : index
    %c0_14 = arith.constant 0 : index
    %268 = vector.load %arg3[%c3, %c0_13, %c0_14] : memref<4x16x512xf32, #tpu.memory_space<vmem>>, vector<1x16x512xf32>
    %269 = vector.shape_cast %268 : vector<1x16x512xf32> to vector<16x512xf32>
    %270 = vector.shape_cast %267 : vector<16x512xf32> to vector<1x16x512xf32>
    tpu.vector_store %arg3[%c3, %c0_13, %c0_14], %270 {strides = array<i32>} : memref<4x16x512xf32, #tpu.memory_space<vmem>>, vector<1x16x512xf32>,
    return
  }
  func.func @transform_0(%arg0: i32) -> (i32, i32, i32) {
    %c0_i32 = arith.constant 0 : i32
    %c0_i32_0 = arith.constant 0 : i32
    %c0_i32_1 = arith.constant 0 : i32
    return %c0_i32, %c0_i32_0, %arg0 : i32, i32, i32
  }
  func.func @transform_1(%arg0: i32) -> (i32, i32, i32) {
    %c0_i32 = arith.constant 0 : i32
    %c0_i32_0 = arith.constant 0 : i32
    %c0_i32_1 = arith.constant 0 : i32
    return %c0_i32, %c0_i32_0, %arg0 : i32, i32, i32
  }
  func.func @transform_2(%arg0: i32) -> (i32, i32, i32) {
    %c0_i32 = arith.constant 0 : i32
    %c0_i32_0 = arith.constant 0 : i32
    %c0_i32_1 = arith.constant 0 : i32
    return %c0_i32, %c0_i32_0, %arg0 : i32, i32, i32
  }
}

module attributes {stable_mosaic.version = 11 : i64} {
  func.func @_proj_kernel(%arg0: i32, %arg1: memref<16x16xf32, #tpu.memory_space<vmem>>, %arg2: memref<16x1xf32, #tpu.memory_space<vmem>>, %arg3: memref<16x1024xf32, #tpu.memory_space<vmem>>, %arg4: memref<16x1024xf32, #tpu.memory_space<vmem>>) attributes {dimension_semantics = [#tpu.dimension_semantics<parallel>], iteration_bounds = array<i64: 2>, scalar_prefetch = 0 : i64, scratch_operands = 0 : i64, tpu.core_type = #tpu.core_type<tc>, window_params = [{pipeline_mode = #tpu.pipeline_mode<synchronous>, transform_indices = @transform_0, window_bounds = array<i64: 16, 16>}, {pipeline_mode = #tpu.pipeline_mode<synchronous>, transform_indices = @transform_1, window_bounds = array<i64: 16, 1>}, {transform_indices = @transform_2, window_bounds = array<i64: 16, 1024>}, {transform_indices = @transform_3, window_bounds = array<i64: 16, 1024>}]} {
    %c0 = arith.constant 0 : index
    %c0_0 = arith.constant 0 : index
    %0 = vector.load %arg1[%c0, %c0_0] : memref<16x16xf32, #tpu.memory_space<vmem>>, vector<16x16xf32>
    %c0_1 = arith.constant 0 : index
    %c0_2 = arith.constant 0 : index
    %1 = vector.load %arg3[%c0_1, %c0_2] : memref<16x1024xf32, #tpu.memory_space<vmem>>, vector<16x1024xf32>
    %cst = arith.constant dense<0.000000e+00> : vector<16x1024xf32>
    %2 = tpu.matmul %0, %1, %cst {dimension_numbers = #tpu.dot_dimension_numbers<[1], [0], [0], [1], [0, 0, 1, 1], [], []>} : vector<16x16xf32>, vector<16x1024xf32>, vector<16x1024xf32> -> vector<16x1024xf32>
    %c0_3 = arith.constant 0 : index
    %c0_4 = arith.constant 0 : index
    %3 = vector.load %arg2[%c0_3, %c0_4] : memref<16x1xf32, #tpu.memory_space<vmem>>, vector<16x1xf32>
    %4 = vector.broadcast %3 : vector<16x1xf32> to vector<16x1024xf32>
    %5 = arith.addf %2, %4 : vector<16x1024xf32>
    %c0_5 = arith.constant 0 : index
    %c0_6 = arith.constant 0 : index
    %6 = vector.load %arg4[%c0_5, %c0_6] : memref<16x1024xf32, #tpu.memory_space<vmem>>, vector<16x1024xf32>
    tpu.vector_store %arg4[%c0_5, %c0_6], %5 {strides = array<i32>} : memref<16x1024xf32, #tpu.memory_space<vmem>>, vector<16x1024xf32>,
    return
  }
  func.func @transform_0(%arg0: i32) -> (i32, i32) {
    %c0_i32 = arith.constant 0 : i32
    %c0_i32_0 = arith.constant 0 : i32
    %c0_i32_1 = arith.constant 0 : i32
    return %c0_i32, %c0_i32_0 : i32, i32
  }
  func.func @transform_1(%arg0: i32) -> (i32, i32) {
    %c0_i32 = arith.constant 0 : i32
    %c0_i32_0 = arith.constant 0 : i32
    %c0_i32_1 = arith.constant 0 : i32
    return %c0_i32, %c0_i32_0 : i32, i32
  }
  func.func @transform_2(%arg0: i32) -> (i32, i32) {
    %c0_i32 = arith.constant 0 : i32
    %c0_i32_0 = arith.constant 0 : i32
    return %c0_i32, %arg0 : i32, i32
  }
  func.func @transform_3(%arg0: i32) -> (i32, i32) {
    %c0_i32 = arith.constant 0 : i32
    %c0_i32_0 = arith.constant 0 : i32
    return %c0_i32, %arg0 : i32, i32
  }
}

</mosaic_0001>

<bundles_post_ra>
// kernel: carafe_pallas.4
= control target key start
LH: loop header
LB: loop body
LE: loop exit
PB: predicated region body
PF: predicated region fallthrough
CT: control target
= control target key end

     0   :  { %v136_v3 = vmov 0   ;;  %vm29_vm0 = vcmask 130048   ;;  %vm119_vm1 = vcmask 1043456   ;;  %s197_s2 = inlined_call_operand.vmem [shape: f32[16,512], index: 2, kind: input, shape index: {}]   ;;  %s198_s0 = inlined_call_operand.vmem [shape: f32[4,16], index: 0, kind: input, shape index: {}]   ;;  %s199_s1 = inlined_call_operand.vmem [shape: f32[4,1], index: 1, kind: input, shape index: {}]   ;;  %s200_s3 = inlined_call_operand.vmem [shape: f32[4,512], index: 3, kind: output, shape index: {}]  }
   0x1   :  { %v21_v0 = vld [vmem:[%s197_s2 + $0x30] sm:$0xff]  ;;  %v22_v1 = vld [vmem:[%s197_s2 + $0x38] sm:$0xff]  ;;  %135 = vset.pattern.permute.xlu0 %v136_v3  ;;  %v14_v5 = vld [vmem:[%s198_s0] sm:$0xf] }
   0x2   :  { %v17_v2 = vld [vmem:[%s197_s2 + $0x10] sm:$0xff]  ;;  %87 = vmatpush.msra.mxu2 %v21_v0  ;;  %107 = vmatpush.msra.mxu3 %v22_v1  ;;  %v18_v4 = vld [vmem:[%s197_s2 + $0x18] sm:$0xff]  ;;  %v20_v6 = vld [vmem:[%s197_s2 + $0x28] sm:$0xff] }
   0x3   :  { %67 = vmatpush.msra.mxu1 %v20_v6  ;;  %v19_v7 = vld [vmem:[%s197_s2 + $0x20] sm:$0xff]  ;;  %v16_v8 = vld [vmem:[%s197_s2 + $0x8] sm:$0xff] }
   0x4   :  { %88 = vmatpush.msra.mxu2 %v17_v2  ;;  %108 = vmatpush.msra.mxu3 %v18_v4  ;;  %v23_v9 = vld [vmem:[%s199_s1] sm:$0xf] }
   0x5   :  { %132 = vmatmul.msk.f32.vlgmr.msra.gmra.mxu2 %vm29_vm0, %v14_v5  ;;  %133 = vmatmul.msk.f32.vlgmr.msra.gmra.mxu3 %vm29_vm0, %v14_v5  ;;  %v15_v10 = vld [vmem:[%s197_s2] sm:$0xff] }
   0x6   :  { %47 = vmatpush.msra.mxu0 %v19_v7  ;;  %68 = vmatpush.msra.mxu1 %v16_v8 }
   0x7   :  { %131 = vmatmul.msk.f32.vlgmr.msra.gmra.mxu1 %vm29_vm0, %v14_v5  ;;  %26 = vperm.xlu0 %135, %v23_v9  }
   0x8   :  { %48 = vmatpush.msra.mxu0 %v15_v10 }
   0x9   :  { %130 = vmatmul.msk.f32.vlgmr.msra.gmra.mxu0 %vm29_vm0, %v14_v5 }
  0x79   :  { %v27_v11 = vpop.permute.xlu0 %26 }
  0x84   :  { %v70_v12 = vpop.f32.mrf.mxu1 }
  0x85   :  { %v71_v13 = vadd.f32 %v70_v12, %v27_v11 }
  0x86   :  { %v50_v14 = vpop.f32.mrf.mxu0 }
  0x87   :  { %v117_v15 = vrot.slane %v71_v13, 4  ;;  %v51_v16 = vadd.f32 %v50_v14, %v27_v11 }
  0x88   :  { %v90_v17 = vpop.f32.mrf.mxu2  ;;  %v110_v18 = vpop.f32.mrf.mxu3 }
  0x89   :  { %v120_v19 = vsel %vm119_vm1, %v51_v16, %v117_v15  ;;  %v111_v20 = vadd.f32 %v110_v18, %v27_v11  ;;  %v91_v21 = vadd.f32 %v90_v17, %v27_v11 }
  0x8a   :  { %124 = vst [vmem:[%s200_s3] sm:$0xff] %v120_v19 }
  0x8b   :  { %v118_v22 = vrot.slane %v111_v20, 4 }
  0x8d   :  { %v121_v23 = vsel %vm119_vm1, %v91_v21, %v118_v22 }
  0x8e   :  { %125 = vst [vmem:[%s200_s3 + $0x8] sm:$0xff] %v121_v23 }

// kernel: carafe_pallas.5
= control target key start
LH: loop header
LB: loop body
LE: loop exit
PB: predicated region body
PF: predicated region fallthrough
CT: control target
= control target key end

     0   :  { %vm85_vm0 = vcmask 1043456   ;;  %v278_v3 = vmov 0   ;;  %vm69_vm1 = vcmask 293888   ;;  %s473_s2 = inlined_call_operand.vmem [shape: f32[36,512], index: 2, kind: input, shape index: {}]   ;;  %s474_s0 = inlined_call_operand.vmem [shape: f32[36,36], index: 0, kind: input, shape index: {}]   ;;  %s475_s1 = inlined_call_operand.vmem [shape: f32[36,1], index: 1, kind: input, shape index: {}]   ;;  %s476_s3 = inlined_call_operand.vmem [shape: f32[36,512], index: 3, kind: output, shape index: {}]  }
   0x1   :  { %v37_v0 = vld [vmem:[%s473_s2 + $0x90] sm:$0xf]  ;;  %v38_v1 = vld [vmem:[%s473_s2 + $0x98] sm:$0xf]  ;;  %275 = vset.pattern.permute.xlu0 %v278_v3  ;;  %276 = vset.pattern.permute.xlu1 %v278_v3  ;;  %v35_v7 = vld [vmem:[%s473_s2 + $0x80] sm:$0xf] }
   0x2   :  { %v33_v2 = vld [vmem:[%s473_s2 + $0x70] sm:$0xff]  ;;  %262 = vmatpush.msk.msra.mxu2 %vm85_vm0, %v37_v0  ;;  %268 = vmatpush.msk.msra.mxu3 %vm85_vm0, %v38_v1  ;;  %v34_v4 = vld [vmem:[%s473_s2 + $0x78] sm:$0xff]  ;;  %v36_v8 = vld [vmem:[%s473_s2 + $0x88] sm:$0xf] }
   0x3   :  { %v29_v5 = vld [vmem:[%s473_s2 + $0x50] sm:$0xff]  ;;  %v30_v6 = vld [vmem:[%s473_s2 + $0x58] sm:$0xff]  ;;  %277 = vset.pattern.permute.xlu2 %v278_v3  ;;  %v31_v9 = vld [vmem:[%s473_s2 + $0x60] sm:$0xff]  ;;  %250 = vmatpush.msk.msra.mxu0 %vm85_vm0, %v35_v7 }
   0x4   :  { %174 = vmatpush.msra.mxu2 %v33_v2  ;;  %206 = vmatpush.msra.mxu3 %v34_v4  ;;  %v32_v10 = vld [vmem:[%s473_s2 + $0x68] sm:$0xff]  ;;  %v25_v11 = vld [vmem:[%s473_s2 + $0x30] sm:$0xff]  ;;  %v26_v12 = vld [vmem:[%s473_s2 + $0x38] sm:$0xff] }
   0x5   :  { %256 = vmatpush.msk.msra.mxu1 %vm85_vm0, %v36_v8  ;;  %v27_v13 = vld [vmem:[%s473_s2 + $0x40] sm:$0xff]  ;;  %v28_v14 = vld [vmem:[%s473_s2 + $0x48] sm:$0xff]  ;;  %110 = vmatpush.msra.mxu0 %v31_v9  ;;  %v21_v15 = vld [vmem:[%s473_s2 + $0x10] sm:$0xff] }
   0x6   :  { %175 = vmatpush.msra.mxu2 %v29_v5  ;;  %207 = vmatpush.msra.mxu3 %v30_v6  ;;  %v22_v16 = vld [vmem:[%s473_s2 + $0x18] sm:$0xff]  ;;  %v14_v17 = vld [vmem:[%s474_s0] sm:$0xff]  ;;  %v24_v19 = vld [vmem:[%s473_s2 + $0x28] sm:$0xff] }
   0x7   :  { %142 = vmatpush.msra.mxu1 %v32_v10  ;;  %111 = vmatpush.msra.mxu0 %v27_v13  ;;  %v23_v18 = vld [vmem:[%s473_s2 + $0x20] sm:$0xff]  ;;  %v20_v22 = vld [vmem:[%s473_s2 + $0x8] sm:$0xff]  ;;  %v41_v23 = vld [vmem:[%s475_s1 + $0x10] sm:$0xff] }
   0x8   :  { %176 = vmatpush.msra.mxu2 %v25_v11  ;;  %208 = vmatpush.msra.mxu3 %v26_v12  ;;  %v39_v20 = vld [vmem:[%s475_s1] sm:$0xff]  ;;  %v15_v25 = vld [vmem:[%s474_s0 + $0x8] sm:$0xff]  ;;  %v42_v27 = vld [vmem:[%s475_s1 + $0x18] sm:$0xff] }
   0x9   :  { %143 = vmatpush.msra.mxu1 %v28_v14  ;;  %v19_v21 = vld [vmem:[%s473_s2] sm:$0xff]  ;;  %112 = vmatpush.msra.mxu0 %v23_v18  ;;  %v40_v26 = vld [vmem:[%s475_s1 + $0x8] sm:$0xff]  ;;  %v16_v28 = vld [vmem:[%s474_s0 + $0x10] sm:$0xff] }
   0xa   :  { %177 = vmatpush.msra.mxu2 %v21_v15  ;;  %209 = vmatpush.msra.mxu3 %v22_v16  ;;  %v43_v24 = vld [vmem:[%s475_s1 + $0x20] sm:$0xf]  ;;  %v17_v29 = vld [vmem:[%s474_s0 + $0x18] sm:$0xff] }
   0xb   :  { %263 = vmatmul.msk.f32.vlgmr.msra.gmra.mxu2 %vm69_vm1, %v14_v17  ;;  %269 = vmatmul.msk.f32.vlgmr.msra.gmra.mxu3 %vm69_vm1, %v14_v17  ;;  %v18_v30 = vld [vmem:[%s474_s0 + $0x20] sm:$0xf] }
   0xc   :  { %144 = vmatpush.msra.mxu1 %v24_v19  ;;  %46 = vperm.xlu0 %275, %v39_v20  }
   0xd   :  { %56 = vperm.xlu1 %276, %v41_v23   ;;  %113 = vmatpush.msra.mxu0 %v19_v21 }
   0xe   :  { %145 = vmatpush.msra.mxu1 %v20_v22  ;;  %251 = vmatmul.msk.f32.vlgmr.msra.gmra.mxu0 %vm69_vm1, %v14_v17 }
   0xf   :  { %257 = vmatmul.msk.f32.vlgmr.msra.gmra.mxu1 %vm69_vm1, %v14_v17  ;;  %66 = vperm.xlu2 %277, %v43_v24  }
  0x13   :  { %264 = vmatmul.msk.f32.gmra.mxu2 %vm69_vm1, %v15_v25  ;;  %270 = vmatmul.msk.f32.gmra.mxu3 %vm69_vm1, %v15_v25 }
  0x14   :  { %51 = vperm.xlu0 %275, %v40_v26  }
  0x15   :  { %61 = vperm.xlu1 %276, %v42_v27  }
  0x16   :  { %252 = vmatmul.msk.f32.gmra.mxu0 %vm69_vm1, %v15_v25 }
  0x17   :  { %258 = vmatmul.msk.f32.gmra.mxu1 %vm69_vm1, %v15_v25 }
  0x1b   :  { %265 = vmatmul.msk.f32.gmra.mxu2 %vm69_vm1, %v16_v28  ;;  %271 = vmatmul.msk.f32.gmra.mxu3 %vm69_vm1, %v16_v28 }
  0x1e   :  { %253 = vmatmul.msk.f32.gmra.mxu0 %vm69_vm1, %v16_v28 }
  0x1f   :  { %259 = vmatmul.msk.f32.gmra.mxu1 %vm69_vm1, %v16_v28 }
  0x23   :  { %266 = vmatmul.msk.f32.gmra.mxu2 %vm69_vm1, %v17_v29  ;;  %272 = vmatmul.msk.f32.gmra.mxu3 %vm69_vm1, %v17_v29 }
  0x26   :  { %254 = vmatmul.msk.f32.gmra.mxu0 %vm69_vm1, %v17_v29 }
  0x27   :  { %260 = vmatmul.msk.f32.gmra.mxu1 %vm69_vm1, %v17_v29 }
  0x2b   :  { %267 = vmatmul.msk.f32.gmra.mxu2 %vm69_vm1, %v18_v30  ;;  %273 = vmatmul.msk.f32.gmra.mxu3 %vm69_vm1, %v18_v30 }
  0x2e   :  { %255 = vmatmul.msk.f32.gmra.mxu0 %vm69_vm1, %v18_v30 }
  0x2f   :  { %261 = vmatmul.msk.f32.gmra.mxu1 %vm69_vm1, %v18_v30 }
  0x69   :  { %v67_v3 = vpop.permute.xlu2 %66 }
  0x7e   :  { %v47_v31 = vpop.permute.xlu0 %46 }
  0x7f   :  { %v57_v49 = vpop.permute.xlu1 %56 }
  0x86   :  { %v52_v40 = vpop.permute.xlu0 %51 }
  0x87   :  { %v62_v58 = vpop.permute.xlu1 %61 }
  0x8b   :  { %v115_v32 = vpop.f32.mrf.mxu0 }
  0x8c   :  { %v147_v33 = vpop.f32.mrf.mxu1  ;;  %v116_v34 = vadd.f32 %v115_v32, %v47_v31 }
  0x8d   :  { %v148_v35 = vadd.f32 %v147_v33, %v47_v31 }
  0x8e   :  { %v179_v36 = vpop.f32.mrf.mxu2  ;;  %v211_v37 = vpop.f32.mrf.mxu3  ;;  %226 = vst [vmem:[%s476_s3] sm:$0xff] %v116_v34 }
  0x8f   :  { %v180_v38 = vadd.f32 %v179_v36, %v47_v31  ;;  %v212_v39 = vadd.f32 %v211_v37, %v47_v31  ;;  %227 = vst [vmem:[%s476_s3 + $0x8] sm:$0xff] %v148_v35 }
  0x91   :  { %228 = vst [vmem:[%s476_s3 + $0x10] sm:$0xff] %v180_v38 }
  0x92   :  { %229 = vst [vmem:[%s476_s3 + $0x18] sm:$0xff] %v212_v39 }
  0x93   :  { %v118_v41 = vpop.f32.mrf.mxu0 }
  0x94   :  { %v150_v42 = vpop.f32.mrf.mxu1  ;;  %v119_v43 = vadd.f32 %v118_v41, %v52_v40 }
  0x95   :  { %v151_v44 = vadd.f32 %v150_v42, %v52_v40 }
  0x96   :  { %v182_v45 = vpop.f32.mrf.mxu2  ;;  %v214_v46 = vpop.f32.mrf.mxu3  ;;  %230 = vst [vmem:[%s476_s3 + $0x20] sm:$0xff] %v119_v43 }
  0x97   :  { %v183_v47 = vadd.f32 %v182_v45, %v52_v40  ;;  %v215_v48 = vadd.f32 %v214_v46, %v52_v40  ;;  %231 = vst [vmem:[%s476_s3 + $0x28] sm:$0xff] %v151_v44 }
  0x99   :  { %232 = vst [vmem:[%s476_s3 + $0x30] sm:$0xff] %v183_v47 }
  0x9a   :  { %233 = vst [vmem:[%s476_s3 + $0x38] sm:$0xff] %v215_v48 }
  0x9b   :  { %v121_v50 = vpop.f32.mrf.mxu0 }
  0x9c   :  { %v153_v51 = vpop.f32.mrf.mxu1  ;;  %v122_v52 = vadd.f32 %v121_v50, %v57_v49 }
  0x9d   :  { %v154_v53 = vadd.f32 %v153_v51, %v57_v49 }
  0x9e   :  { %v185_v54 = vpop.f32.mrf.mxu2  ;;  %v217_v55 = vpop.f32.mrf.mxu3  ;;  %234 = vst [vmem:[%s476_s3 + $0x40] sm:$0xff] %v122_v52 }
  0x9f   :  { %v186_v56 = vadd.f32 %v185_v54, %v57_v49  ;;  %v218_v57 = vadd.f32 %v217_v55, %v57_v49  ;;  %235 = vst [vmem:[%s476_s3 + $0x48] sm:$0xff] %v154_v53 }
  0xa1   :  { %236 = vst [vmem:[%s476_s3 + $0x50] sm:$0xff] %v186_v56 }
  0xa2   :  { %237 = vst [vmem:[%s476_s3 + $0x58] sm:$0xff] %v218_v57 }
  0xa3   :  { %v124_v59 = vpop.f32.mrf.mxu0 }
  0xa4   :  { %v156_v60 = vpop.f32.mrf.mxu1  ;;  %v125_v61 = vadd.f32 %v124_v59, %v62_v58 }
  0xa5   :  { %v157_v62 = vadd.f32 %v156_v60, %v62_v58 }
  0xa6   :  { %v188_v63 = vpop.f32.mrf.mxu2  ;;  %v220_v0 = vpop.f32.mrf.mxu3  ;;  %238 = vst [vmem:[%s476_s3 + $0x60] sm:$0xff] %v125_v61 }
  0xa7   :  { %v189_v1 = vadd.f32 %v188_v63, %v62_v58  ;;  %v221_v2 = vadd.f32 %v220_v0, %v62_v58  ;;  %239 = vst [vmem:[%s476_s3 + $0x68] sm:$0xff] %v157_v62 }
  0xa9   :  { %240 = vst [vmem:[%s476_s3 + $0x70] sm:$0xff] %v189_v1 }
  0xaa   :  { %241 = vst [vmem:[%s476_s3 + $0x78] sm:$0xff] %v221_v2 }
  0xab   :  { %v127_v4 = vpop.f32.mrf.mxu0 }
  0xac   :  { %v159_v5 = vpop.f32.mrf.mxu1  ;;  %v128_v6 = vadd.f32 %v127_v4, %v67_v3 }
  0xad   :  { %v160_v7 = vadd.f32 %v159_v5, %v67_v3 }
  0xae   :  { %v191_v8 = vpop.f32.mrf.mxu2  ;;  %v223_v9 = vpop.f32.mrf.mxu3  ;;  %242 = vst [vmem:[%s476_s3 + $0x80] sm:$0xf] %v128_v6 }
  0xaf   :  { %v192_v10 = vadd.f32 %v191_v8, %v67_v3  ;;  %v224_v11 = vadd.f32 %v223_v9, %v67_v3  ;;  %243 = vst [vmem:[%s476_s3 + $0x88] sm:$0xf] %v160_v7 }
  0xb1   :  { %244 = vst [vmem:[%s476_s3 + $0x90] sm:$0xf] %v192_v10 }
  0xb2   :  { %245 = vst [vmem:[%s476_s3 + $0x98] sm:$0xf] %v224_v11 }

// kernel: carafe_pallas.6
= control target key start
LH: loop header
LB: loop body
LE: loop exit
PB: predicated region body
PF: predicated region fallthrough
CT: control target
= control target key end

     0   :  { %vm210_vm0 = vcmask 1043456   ;;  %s3528_s1 = inlined_call_operand.vmem [shape: f32[9,4,512], index: 1, kind: input, shape index: {}]   ;;  %s3529_s0 = inlined_call_operand.vmem [shape: f32[9,16,512], index: 0, kind: input, shape index: {}]   ;;  %s3530_s2 = inlined_call_operand.vmem [shape: f32[4,16,512], index: 2, kind: output, shape index: {}]  }
   0x1   :  { %v11_v0 = vld [vmem:[%s3528_s1] sm:$0xff]  ;;  %v13_v1 = vld [vmem:[%s3528_s1 + $0x10] sm:$0xff]  ;;  %v12_v12 = vld [vmem:[%s3528_s1 + $0x8] sm:$0xff] }
   0x2   :  { %v15_v2 = vld [vmem:[%s3528_s1 + $0x20] sm:$0xff]  ;;  %v1603_v3 = vld [vmem:[%s3528_s1 + $0x30] sm:$0xff]  ;;  %v14_v13 = vld [vmem:[%s3528_s1 + $0x18] sm:$0xff] }
   0x3   :  { %v19_v4 = vld [vmem:[%s3528_s1 + $0x40] sm:$0xff]  ;;  %v1611_v5 = vld [vmem:[%s3528_s1 + $0x50] sm:$0xff]  ;;  %v29_v6 = vmax.f32 %v11_v0, %v15_v2  ;;  %v30_v10 = vmax.f32 %v13_v1, %v1603_v3  ;;  %v16_v14 = vld [vmem:[%s3528_s1 + $0x28] sm:$0xff] }
   0x4   :  { %v1616_v7 = vld [vmem:[%s3528_s1 + $0x60] sm:$0xff]  ;;  %v1621_v8 = vld [vmem:[%s3528_s1 + $0x70] sm:$0xff]  ;;  %v18_v16 = vld [vmem:[%s3528_s1 + $0x38] sm:$0xff]  ;;  %v37_v19 = vmax.f32 %v12_v12, %v16_v14 }
   0x5   :  { %v1626_v9 = vld [vmem:[%s3528_s1 + $0x80] sm:$0xff]  ;;  %v31_v11 = vmax.f32 %v29_v6, %v19_v4  ;;  %v32_v15 = vmax.f32 %v30_v10, %v1611_v5  ;;  %v20_v17 = vld [vmem:[%s3528_s1 + $0x48] sm:$0xff]  ;;  %v1648_v18 = vld [vmem:[%s3528_s1 + $0x58] sm:$0xff]  ;;  %v38_v22 = vmax.f32 %v14_v13, %v18_v16 }
   0x6   :  { %v1654_v21 = vld [vmem:[%s3528_s1 + $0x68] sm:$0xff]  ;;  %v1660_v24 = vld [vmem:[%s3528_s1 + $0x78] sm:$0xff]  ;;  %v39_v25 = vmax.f32 %v37_v19, %v20_v17 }
   0x7   :  { %v33_v20 = vmax.f32 %v31_v11, %v1616_v7  ;;  %v34_v23 = vmax.f32 %v32_v15, %v1621_v8  ;;  %v1666_v27 = vld [vmem:[%s3528_s1 + $0x88] sm:$0xff]  ;;  %v40_v28 = vmax.f32 %v38_v22, %v1648_v18 }
   0x8   :  { %v41_v29 = vmax.f32 %v39_v25, %v1654_v21 }
   0x9   :  { %v35_v26 = vmax.f32 %v33_v20, %v1626_v9  ;;  %v42_v31 = vmax.f32 %v40_v28, %v1660_v24 }
   0xa   :  { %v43_v32 = vmax.f32 %v41_v29, %v1666_v27 }
   0xb   :  { %v1670_v30 = vmax.f32 %v35_v26, %v34_v23 }
   0xc   :  { %v1675_v35 = vmax.f32 %v43_v32, %v42_v31 }
   0xd   :  { %v45_v33 = vsub.f32 %v11_v0, %v1670_v30  ;;  %v49_v36 = vsub.f32 %v15_v2, %v1670_v30  ;;  %v53_v41 = vsub.f32 %v19_v4, %v1670_v30  ;;  %v47_v43 = vsub.f32 %v13_v1, %v1670_v30 }
   0xe   :  { %v46_v37 = vsub.f32 %v12_v12, %v1675_v35  ;;  %v50_v42 = vsub.f32 %v16_v14, %v1675_v35  ;;  %v48_v44 = vsub.f32 %v14_v13, %v1675_v35  ;;  %v51_v51 = vsub.f32 %v1603_v3, %v1670_v30 }
   0xf   :  { %v63_v34 = vmul.f32 1.442695, %v45_v33  ;;  %v71_v38 = vmul.f32 1.442695, %v49_v36  ;;  %v79_v45 = vmul.f32 1.442695, %v53_v41  ;;  %v52_v54 = vsub.f32 %v18_v16, %v1675_v35 }
  0x10   :  { %v65_v39 = vmul.f32 1.442695, %v46_v37  ;;  %v73_v46 = vmul.f32 1.442695, %v50_v42  ;;  %v67_v47 = vmul.f32 1.442695, %v47_v43  ;;  %v54_v55 = vsub.f32 %v20_v17, %v1675_v35 }
  0x11   :  { %1464 = vpow2.f32 %v63_v34  ;;  %v69_v49 = vmul.f32 1.442695, %v48_v44  ;;  %v75_v56 = vmul.f32 1.442695, %v51_v51  ;;  %v57_v57 = vsub.f32 %v1616_v7, %v1670_v30 }
  0x12   :  { %1466 = vpow2.f32 %v71_v38  ;;  %v77_v59 = vmul.f32 1.442695, %v52_v54  ;;  %v81_v61 = vmul.f32 1.442695, %v54_v55  ;;  %v55_v63 = vsub.f32 %v1611_v5, %v1670_v30 }
  0x13   :  { %1468 = vpow2.f32 %v65_v39  ;;  %v87_v3 = vmul.f32 1.442695, %v57_v57  ;;  %v56_v4 = vsub.f32 %v1648_v18, %v1675_v35  ;;  %v59_v7 = vsub.f32 %v1621_v8, %v1670_v30 }
  0x14   :  { %1470 = vpow2.f32 %v79_v45  ;;  %v58_v5 = vsub.f32 %v1654_v21, %v1675_v35  ;;  %v83_v11 = vmul.f32 1.442695, %v55_v63  ;;  %v61_v12 = vsub.f32 %v1626_v9, %v1670_v30 }
  0x15   :  { %1472 = vpow2.f32 %v73_v46  ;;  %v85_v14 = vmul.f32 1.442695, %v56_v4  ;;  %v91_v15 = vmul.f32 1.442695, %v59_v7  ;;  %v60_v8 = vsub.f32 %v1660_v24, %v1675_v35 }
  0x16   :  { %1474 = vpow2.f32 %v67_v47  ;;  %v62_v16 = vsub.f32 %v1666_v27, %v1675_v35  ;;  %v89_v17 = vmul.f32 1.442695, %v58_v5  ;;  %v95_v21 = vmul.f32 1.442695, %v61_v12 }
  0x17   :  { %v1679_v40 = vpop.eup %1464  ;;  %1476 = vpow2.f32 %v69_v49  ;;  %v93_v25 = vmul.f32 1.442695, %v60_v8 }
  0x18   :  { %117 = vst [vmem:[#allocation1] ss:$2 sm:$0xff] %v1679_v40  ;;  %v1686_v48 = vpop.eup %1466  ;;  %1478 = vpow2.f32 %v75_v56  ;;  %v97_v24 = vmul.f32 1.442695, %v62_v16 }
  0x19   :  { %v1688_v50 = vpop.eup %1468  ;;  %1480 = vpow2.f32 %v77_v59 }
  0x1a   :  { %119 = vst [vmem:[#allocation1 + $0x10] ss:$2 sm:$0xff] %v1688_v50  ;;  %v1698_v58 = vpop.eup %1470  ;;  %1482 = vpow2.f32 %v81_v61 }
  0x1b   :  { %v1700_v60 = vpop.eup %1472  ;;  %1484 = vpow2.f32 %v87_v3 }
  0x1c   :  { %v1702_v62 = vpop.eup %1474  ;;  %1486 = vpow2.f32 %v83_v11 }
  0x1d   :  { %v1706_v2 = vpop.eup %1476  ;;  %125 = vst [vmem:[#allocation1 + $0x20] ss:$2 sm:$0xff] %v1702_v62  ;;  %1488 = vpow2.f32 %v85_v14 }
  0x1e   :  { %127 = vst [vmem:[#allocation1 + $0x30] ss:$2 sm:$0xff] %v1706_v2  ;;  %v1720_v13 = vpop.eup %1478  ;;  %1490 = vpow2.f32 %v89_v17 }
  0x1f   :  { %v120_v52 = vld.sshfl [vmem:[#allocation1] sm:$0xff pattern:$0x75316420]  ;;  %v121_v53 = vld.sshfl [vmem:[#allocation1 + $0x8] sm:$0xff pattern:$0x75316420]  ;;  %v1726_v18 = vpop.eup %1480  ;;  %1492 = vpow2.f32 %v95_v21 }
  0x20   :  { %132 = vst [vmem:[#allocation1] ss:$2 sm:$0xff] %v1686_v48  ;;  %v1729_v9 = vpop.eup %1482  ;;  %v211_v29 = vsel %vm210_vm0, %v120_v52, 0.0  ;;  %v228_v30 = vsel %vm210_vm0, %v121_v53, 0.0  ;;  %1494 = vpow2.f32 %v91_v15 }
  0x21   :  { %v122_v0 = vld.sshfl [vmem:[#allocation1 + $0x10] sm:$0xff pattern:$0x75316420]  ;;  %v123_v1 = vld.sshfl [vmem:[#allocation1 + $0x18] sm:$0xff pattern:$0x75316420]  ;;  %v1732_v26 = vpop.eup %1484  ;;  %1496 = vpow2.f32 %v93_v25 }
  0x22   :  { %133 = vst [vmem:[#allocation1 + $0x10] ss:$2 sm:$0xff] %v1700_v60  ;;  %v1738_v32 = vpop.eup %1486  ;;  %v262_v36 = vsel %vm210_vm0, %v123_v1, 0.0  ;;  %v245_v44 = vsel %vm210_vm0, %v122_v0, 0.0  ;;  %1498 = vpow2.f32 %v97_v24 }
  0x23   :  { %v1745_v39 = vpop.eup %1488 }
  0x24   :  { %v128_v19 = vld.sshfl [vmem:[#allocation1 + $0x20] sm:$0xff pattern:$0x75316420]  ;;  %v129_v20 = vld.sshfl [vmem:[#allocation1 + $0x28] sm:$0xff pattern:$0x75316420]  ;;  %v1752_v49 = vpop.eup %1490 }
  0x25   :  { %138 = vst [vmem:[#allocation1 + $0x20] ss:$2 sm:$0xff] %v1720_v13  ;;  %v130_v22 = vld.sshfl [vmem:[#allocation1 + $0x30] sm:$0xff pattern:$0x75316420]  ;;  %v229_v31 = vsel %vm210_vm0, %v129_v20, 0.0  ;;  %v1757_v59 = vpop.eup %1492 }
  0x26   :  { %v131_v23 = vld.sshfl [vmem:[#allocation1 + $0x38] sm:$0xff pattern:$0x75316420]  ;;  %v212_v35 = vsel %vm210_vm0, %v128_v19, 0.0  ;;  %v230_v41 = vadd.f32 %v229_v31, %v228_v30  ;;  %v246_v45 = vsel %vm210_vm0, %v130_v22, 0.0  ;;  %v1763_v5 = vpop.eup %1494 }
  0x27   :  { %v134_v6 = vld.sshfl [vmem:[#allocation1] sm:$0xff pattern:$0x75316420]  ;;  %v135_v10 = vld.sshfl [vmem:[#allocation1 + $0x8] sm:$0xff pattern:$0x75316420]  ;;  %v213_v51 = vadd.f32 %v212_v35, %v211_v29  ;;  %v247_v61 = vadd.f32 %v246_v45, %v245_v44  ;;  %v1769_v17 = vpop.eup %1496 }
  0x28   :  { %144 = vst [vmem:[#allocation1] ss:$2 sm:$0xff] %v1698_v58  ;;  %v263_v37 = vsel %vm210_vm0, %v131_v23, 0.0  ;;  %v231_v38 = vsel %vm210_vm0, %v135_v10, 0.0  ;;  %v214_v46 = vsel %vm210_vm0, %v134_v6, 0.0 }
  0x29   :  { %139 = vst [vmem:[#allocation1 + $0x30] ss:$2 sm:$0xff] %v1726_v18  ;;  %v136_v27 = vld.sshfl [vmem:[#allocation1 + $0x10] sm:$0xff pattern:$0x75316420]  ;;  %v264_v52 = vadd.f32 %v263_v37, %v262_v36  ;;  %v232_v53 = vadd.f32 %v231_v38, %v230_v41  ;;  %v215_v63 = vadd.f32 %v214_v46, %v213_v51 }
  0x2a   :  { %v137_v28 = vld.sshfl [vmem:[#allocation1 + $0x18] sm:$0xff pattern:$0x75316420]  ;;  %v248_v56 = vsel %vm210_vm0, %v136_v27, 0.0  ;;  %v1774_v27 = vpop.eup %1498 }
  0x2b   :  { %145 = vst [vmem:[#allocation1 + $0x10] ss:$2 sm:$0xff] %v1729_v9  ;;  %v265_v47 = vsel %vm210_vm0, %v137_v28, 0.0  ;;  %v249_v10 = vadd.f32 %v248_v56, %v247_v61 }
  0x2c   :  { %v140_v42 = vld.sshfl [vmem:[#allocation1 + $0x20] sm:$0xff pattern:$0x75316420]  ;;  %v141_v43 = vld.sshfl [vmem:[#allocation1 + $0x28] sm:$0xff pattern:$0x75316420]  ;;  %v266_v0 = vadd.f32 %v265_v47, %v264_v52 }
  0x2d   :  { %150 = vst [vmem:[#allocation1 + $0x20] ss:$2 sm:$0xff] %v1738_v32  ;;  %v233_v57 = vsel %vm210_vm0, %v141_v43, 0.0  ;;  %v216_v4 = vsel %vm210_vm0, %v140_v42, 0.0 }
  0x2e   :  { %v234_v11 = vadd.f32 %v233_v57, %v232_v53  ;;  %v217_v19 = vadd.f32 %v216_v4, %v215_v63 }
  0x2f   :  { %v146_v33 = vld.sshfl [vmem:[#allocation1] sm:$0xff pattern:$0x75316420]  ;;  %v147_v34 = vld.sshfl [vmem:[#allocation1 + $0x8] sm:$0xff pattern:$0x75316420] }
  0x30   :  { %156 = vst [vmem:[#allocation1] ss:$2 sm:$0xff] %v1732_v26  ;;  %v142_v54 = vld.sshfl [vmem:[#allocation1 + $0x30] sm:$0xff pattern:$0x75316420]  ;;  %v235_v6 = vsel %vm210_vm0, %v147_v34, 0.0 }
  0x31   :  { %v143_v55 = vld.sshfl [vmem:[#allocation1 + $0x38] sm:$0xff pattern:$0x75316420]  ;;  %v218_v15 = vsel %vm210_vm0, %v146_v33, 0.0  ;;  %v250_v8 = vsel %vm210_vm0, %v142_v54, 0.0  ;;  %v236_v20 = vadd.f32 %v235_v6, %v234_v11 }
  0x32   :  { %151 = vst [vmem:[#allocation1 + $0x30] ss:$2 sm:$0xff] %v1745_v39  ;;  %v148_v1 = vld.sshfl [vmem:[#allocation1 + $0x10] sm:$0xff pattern:$0x75316420]  ;;  %v267_v7 = vsel %vm210_vm0, %v143_v55, 0.0  ;;  %v219_v28 = vadd.f32 %v218_v15, %v217_v19  ;;  %v251_v29 = vadd.f32 %v250_v8, %v249_v10 }
  0x33   :  { %v149_v3 = vld.sshfl [vmem:[#allocation1 + $0x18] sm:$0xff pattern:$0x75316420]  ;;  %v268_v21 = vadd.f32 %v267_v7, %v266_v0  ;;  %v252_v25 = vsel %vm210_vm0, %v148_v1, 0.0 }
  0x34   :  { %157 = vst [vmem:[#allocation1 + $0x10] ss:$2 sm:$0xff] %v1752_v49  ;;  %v269_v16 = vsel %vm210_vm0, %v149_v3, 0.0  ;;  %v152_v22 = vld.sshfl [vmem:[#allocation1 + $0x20] sm:$0xff pattern:$0x75316420]  ;;  %v253_v37 = vadd.f32 %v252_v25, %v251_v29 }
  0x35   :  { %v153_v23 = vld.sshfl [vmem:[#allocation1 + $0x28] sm:$0xff pattern:$0x75316420]  ;;  %v270_v30 = vadd.f32 %v269_v16, %v268_v21  ;;  %v220_v34 = vsel %vm210_vm0, %v152_v22, 0.0 }
  0x36   :  { %162 = vst [vmem:[#allocation1 + $0x20] ss:$2 sm:$0xff] %v1763_v5  ;;  %v237_v24 = vsel %vm210_vm0, %v153_v23, 0.0  ;;  %v221_v46 = vadd.f32 %v220_v34, %v219_v28 }
  0x37   :  { %v158_v12 = vld.sshfl [vmem:[#allocation1] sm:$0xff pattern:$0x75316420]  ;;  %v159_v14 = vld.sshfl [vmem:[#allocation1 + $0x8] sm:$0xff pattern:$0x75316420]  ;;  %v238_v38 = vadd.f32 %v237_v24, %v236_v20 }
  0x38   :  { %168 = vst [vmem:[#allocation1] ss:$2 sm:$0xff] %v1757_v59  ;;  %v239_v35 = vsel %vm210_vm0, %v159_v14, 0.0  ;;  %v222_v43 = vsel %vm210_vm0, %v158_v12, 0.0 }
  0x39   :  { %v154_v31 = vld.sshfl [vmem:[#allocation1 + $0x30] sm:$0xff pattern:$0x75316420]  ;;  %v155_v33 = vld.sshfl [vmem:[#allocation1 + $0x38] sm:$0xff pattern:$0x75316420]  ;;  %v240_v47 = vadd.f32 %v239_v35, %v238_v38  ;;  %v223_v57 = vadd.f32 %v222_v43, %v221_v46 }
  0x3a   :  { %163 = vst [vmem:[#allocation1 + $0x30] ss:$2 sm:$0xff] %v1769_v17  ;;  %v271_v36 = vsel %vm210_vm0, %v155_v33, 0.0  ;;  %v254_v44 = vsel %vm210_vm0, %v154_v31, 0.0 }
  0x3b   :  { %v160_v41 = vld.sshfl [vmem:[#allocation1 + $0x10] sm:$0xff pattern:$0x75316420]  ;;  %v161_v42 = vld.sshfl [vmem:[#allocation1 + $0x18] sm:$0xff pattern:$0x75316420]  ;;  %v272_v51 = vadd.f32 %v271_v36, %v270_v30  ;;  %v255_v61 = vadd.f32 %v254_v44, %v253_v37 }
  0x3c   :  { %v273_v45 = vsel %vm210_vm0, %v161_v42, 0.0  ;;  %169 = vst [vmem:[#allocation1 + $0x10] ss:$2 sm:$0xff] %v1774_v27  ;;  %v256_v53 = vsel %vm210_vm0, %v160_v41, 0.0 }
  0x3d   :  { %v164_v55 = vld.sshfl [vmem:[#allocation1 + $0x20] sm:$0xff pattern:$0x75316420]  ;;  %v165_v56 = vld.sshfl [vmem:[#allocation1 + $0x28] sm:$0xff pattern:$0x75316420]  ;;  %v274_v63 = vadd.f32 %v273_v45, %v272_v51  ;;  %v257_v10 = vadd.f32 %v256_v53, %v255_v61 }
  0x3e   :  { %v224_v0 = vsel %vm210_vm0, %v164_v55, 0.0  ;;  %v241_v1 = vsel %vm210_vm0, %v165_v56, 0.0  ;;  %v1934_v56 = vld [vmem:[%s3529_s0 + $0x200] sm:$0xff] }
  0x3f   :  { %v171_v52 = vld.sshfl [vmem:[#allocation1 + $0x8] sm:$0xff pattern:$0x75316420]  ;;  %v170_v54 = vld.sshfl [vmem:[#allocation1] sm:$0xff pattern:$0x75316420]  ;;  %v242_v4 = vadd.f32 %v241_v1, %v240_v47  ;;  %v225_v15 = vadd.f32 %v224_v0, %v223_v57 }
  0x40   :  { %v243_v3 = vsel %vm210_vm0, %v171_v52, 0.0  ;;  %v226_v14 = vsel %vm210_vm0, %v170_v54, 0.0  ;;  %3755 = vst [vmem:[#allocation21_spill] sm:$0xff] %v1934_v56 }
  0x41   :  { %v166_v6 = vld.sshfl [vmem:[#allocation1 + $0x30] sm:$0xff pattern:$0x75316420]  ;;  %v167_v7 = vld.sshfl [vmem:[#allocation1 + $0x38] sm:$0xff pattern:$0x75316420]  ;;  %v244_v20 = vadd.f32 %v243_v3, %v242_v4  ;;  %v227_v25 = vadd.f32 %v226_v14, %v225_v15 }
  0x42   :  { %v258_v11 = vsel %vm210_vm0, %v166_v6, 0.0  ;;  %v275_v12 = vsel %vm210_vm0, %v167_v7, 0.0 }
  0x43   :  { %v276_v8 = vadd.f32 %v275_v12, %v274_v63  ;;  %v172_v16 = vld.sshfl [vmem:[#allocation1 + $0x10] sm:$0xff pattern:$0x75316420]  ;;  %v173_v19 = vld.sshfl [vmem:[#allocation1 + $0x18] sm:$0xff pattern:$0x75316420]  ;;  %v259_v23 = vadd.f32 %v258_v11, %v257_v10 }
  0x44   :  { %v260_v21 = vsel %vm210_vm0, %v172_v16, 0.0  ;;  %v277_v22 = vsel %vm210_vm0, %v173_v19, 0.0  ;;  %v283_v28 = vrot.slane %v244_v20, 4  ;;  %v1850_v11 = vld [vmem:[%s3529_s0 + $0x80] sm:$0xff] }
  0x45   :  { %v278_v24 = vadd.f32 %v277_v22, %v276_v8  ;;  %v261_v29 = vadd.f32 %v260_v21, %v259_v23  ;;  %3747 = vst [vmem:[#allocation13_spill] sm:$0xff] %v1850_v11  ;;  %v1855_v12 = vld [vmem:[%s3529_s0 + $0xc0] sm:$0xff] }
  0x46   :  { %v285_v31 = vsel %vm210_vm0, %v227_v25, %v283_v28  ;;  %3748 = vst [vmem:[#allocation14_spill] sm:$0xff] %v1855_v12  ;;  %v1865_v19 = vld [vmem:[%s3529_s0 + $0x100] sm:$0xff] }
  0x47   :  { %v284_v30 = vrot.slane %v278_v24, 4  ;;  %1500 = vrcp.f32 %v285_v31  ;;  %v300_v41 = vand.u32 2147483648, %v285_v31  ;;  %v298_v43 = vand.u32 2147483647, %v285_v31  ;;  %3749 = vst [vmem:[#allocation15_spill] sm:$0xff] %v1865_v19  ;;  %v1870_v20 = vld [vmem:[%s3529_s0 + $0x140] sm:$0xff] }
  0x48   :  { %vm294_vm2 = vweird.f32 %v285_v31  ;;  %3750 = vst [vmem:[#allocation16_spill] sm:$0xff] %v1870_v20 }
  0x49   :  { %v286_v33 = vsel %vm210_vm0, %v261_v29, %v284_v30  ;;  %v301_v52 = vor.u32 1.1754944e-38, %v300_v41  ;;  %vm299_vm5 = vcmp.eq.f32.partialorder %v298_v43, 8.507059e+37  ;;  %v1906_v41 = vld [vmem:[%s3529_s0 + $0x180] sm:$0xff] }
  0x4a   :  { %1502 = vrcp.f32 %v286_v33  ;;  %v313_v45 = vand.u32 2147483647, %v286_v33  ;;  %v315_v51 = vand.u32 2147483648, %v286_v33  ;;  %vm309_vm6 = vweird.f32 %v286_v33  ;;  %3751 = vst [vmem:[#allocation17_spill] sm:$0xff] %v1906_v41 }
  0x4c   :  { %vm1795_vm7 = vcmp.eq.f32.partialorder %v313_v45, 8.507059e+37  ;;  %v316_v61 = vor.u32 1.1754944e-38, %v315_v51  ;;  %v1921_v51 = vld [vmem:[%s3529_s0 + $0x8] sm:$0xff] }
  0x4d   :  { %v1501_v34 = vpop.eup %1500  ;;  %3753 = vst [vmem:[#allocation19_spill] sm:$0xff] %v1921_v51 }
  0x4e   :  { %v290_v35 = vmul.f32 %v1501_v34, %v285_v31  ;;  %vm295_vm1 = vweird.f32 %v1501_v34 }
  0x4f   :  { %vm296_vm3 = vmor %vm294_vm2, %vm295_vm1 }
  0x50   :  { %v1503_v36 = vpop.eup %1502  ;;  %v291_v37 = vsub.f32 1.0, %v290_v35 }
  0x51   :  { %v305_v38 = vmul.f32 %v1503_v36, %v286_v33  ;;  %vm310_vm4 = vweird.f32 %v1503_v36 }
  0x52   :  { %v292_v42 = vmul.f32 %v1501_v34, %v291_v37  ;;  %vm1799_vm8 = vmor %vm309_vm6, %vm310_vm4 }
  0x53   :  { %v306_v44 = vsub.f32 1.0, %v305_v38 }
  0x54   :  { %v293_v46 = vadd.f32 %v1501_v34, %v292_v42  ;;  %v1911_v42 = vld [vmem:[%s3529_s0 + $0x1c0] sm:$0xff] }
  0x55   :  { %v307_v47 = vmul.f32 %v1503_v36, %v306_v44  ;;  %3752 = vst [vmem:[#allocation18_spill] sm:$0xff] %v1911_v42 }
  0x56   :  { %v297_v53 = vsel %vm296_vm3, %v1501_v34, %v293_v46 }
  0x57   :  { %v308_v54 = vadd.f32 %v1503_v36, %v307_v47  ;;  %v302_v55 = vsel %vm299_vm5, %v301_v52, %v297_v53  ;;  %v1926_v52 = vld [vmem:[%s3529_s0 + $0x48] sm:$0xff] }
  0x58   :  { %v1804_v63 = vmul.f32 %v1679_v40, %v302_v55  ;;  %v1807_v0 = vmul.f32 %v1702_v62, %v302_v55  ;;  %v1810_v1 = vmul.f32 %v1686_v48, %v302_v55  ;;  %v1815_v4 = vmul.f32 %v1720_v13, %v302_v55  ;;  %v1836_v13 = vld [vmem:[%s3529_s0] sm:$0xff]  ;;  %3754 = vst [vmem:[#allocation20_spill] sm:$0xff] %v1926_v52 }
  0x59   :  { %v312_v3 = vsel %vm1799_vm8, %v1503_v36, %v308_v54  ;;  %v1818_v6 = vmul.f32 %v1698_v58, %v302_v55  ;;  %v1821_v7 = vmul.f32 %v1738_v32, %v302_v55  ;;  %v1824_v40 = vmul.f32 %v1732_v26, %v302_v55  ;;  %3745 = vst [vmem:[#allocation11_spill] sm:$0xff] %v1836_v13  ;;  %v1841_v58 = vld [vmem:[%s3529_s0 + $0x40] sm:$0xff] }
  0x5a   :  { %3736 = vst [vmem:[#allocation2_spill] sm:$0xff] %v1804_v63  ;;  %v1827_v62 = vmul.f32 %v1763_v5, %v302_v55  ;;  %v1830_v48 = vmul.f32 %v1757_v59, %v302_v55  ;;  %v409_v10 = vperm.slane %v1804_v63, 0  ;;  %v431_v26 = vperm.slane %v1807_v0, 0 }
  0x5b   :  { %3737 = vst [vmem:[#allocation3_spill] sm:$0xff] %v1807_v0  ;;  %v461_v32 = vperm.slane %v1810_v1, 0  ;;  %v491_v5 = vperm.slane %v1815_v4, 0  ;;  %v521_v59 = vperm.slane %v1818_v6, 0  ;;  %v551_v15 = vperm.slane %v1821_v7, 0 }
  0x5c   :  { %3738 = vst [vmem:[#allocation4_spill] sm:$0xff] %v1810_v1  ;;  %v1857_v14 = vperm.slane %v409_v10, 0  ;;  %v581_v8 = vperm.slane %v1824_v40, 0  ;;  %v611_v16 = vperm.slane %v1827_v62, 0  ;;  %v1872_v21 = vperm.slane %v431_v26, 0 }
  0x5d   :  { %3739 = vst [vmem:[#allocation5_spill] sm:$0xff] %v1815_v4  ;;  %v1874_v22 = vperm.slane %v461_v32, 0  ;;  %v1876_v23 = vperm.slane %v491_v5, 0  ;;  %v1878_v25 = vperm.slane %v521_v59, 0  ;;  %v1882_v24 = vsel %vm1795_vm7, %v316_v61, %v312_v3  ;;  %v1939_v61 = vld [vmem:[%s3529_s0 + $0x88] sm:$0xff] }
  0x5e   :  { %3740 = vst [vmem:[#allocation6_spill] sm:$0xff] %v1818_v6  ;;  %v421_v28 = vmul.f32 %v1857_v14, %v1836_v13  ;;  %v1886_v29 = vperm.slane %v551_v15, 0  ;;  %v443_v30 = vmul.f32 %v1872_v21, %v1841_v58  ;;  %v1892_v33 = vperm.slane %v581_v8, 0  ;;  %v1944_v3 = vld [vmem:[%s3529_s0 + $0xc8] sm:$0xff]  ;;  %v2273_v13 = vld [vmem:[%s3529_s0 + $0x1a0] sm:$0xff] }
  0x5f   :  { %3741 = vst [vmem:[#allocation7_spill] sm:$0xff] %v1821_v7  ;;  %v473_v31 = vmul.f32 %v1874_v22, %v1850_v11  ;;  %v1894_v34 = vperm.slane %v611_v16, 0  ;;  %v503_v35 = vmul.f32 %v1876_v23, %v1855_v12  ;;  %v533_v36 = vmul.f32 %v1878_v25, %v1865_v19 }
  0x60   :  { %3742 = vst [vmem:[#allocation8_spill] sm:$0xff] %v1824_v40  ;;  %v563_v37 = vmul.f32 %v1886_v29, %v1870_v20  ;;  %v641_v38 = vperm.slane %v1830_v48, 0  ;;  %v451_v43 = vadd.f32 %v443_v30, %v421_v28  ;;  %v410_v44 = vperm.slane %v1804_v63, 4  ;;  %v1965_v30 = vld [vmem:[%s3529_s0 + $0x108] sm:$0xff] }
  0x61   :  { %3743 = vst [vmem:[#allocation9_spill] sm:$0xff] %v1827_v62  ;;  %v432_v45 = vperm.slane %v1807_v0, 4  ;;  %v462_v46 = vperm.slane %v1810_v1, 4  ;;  %v492_v53 = vperm.slane %v1815_v4, 4  ;;  %v522_v54 = vperm.slane %v1818_v6, 4 }
  0x62   :  { %3744 = vst [vmem:[#allocation10_spill] sm:$0xff] %v1830_v48  ;;  %v1916_v47 = vperm.slane %v641_v38, 0  ;;  %v552_v55 = vperm.slane %v1821_v7, 4  ;;  %v481_v57 = vadd.f32 %v473_v31, %v451_v43  ;;  %v1946_v10 = vperm.slane %v410_v44, 0  ;;  %v1970_v31 = vld [vmem:[%s3529_s0 + $0x148] sm:$0xff]  ;;  %v2241_v7 = vld [vmem:[%s3529_s0 + $0xa0] sm:$0xff] }
  0x63   :  { %3746 = vst [vmem:[#allocation12_spill] sm:$0xff] %v1841_v58  ;;  %v1948_v26 = vperm.slane %v432_v45, 0  ;;  %v1950_v32 = vperm.slane %v462_v46, 0  ;;  %v593_v5 = vmul.f32 %v1892_v33, %v1906_v41  ;;  %v1954_v59 = vperm.slane %v492_v53, 0 }
  0x64   :  { %3756 = vst [vmem:[#allocation22_spill] sm:$0xff] %v1939_v61  ;;  %v1956_v15 = vperm.slane %v522_v54, 0  ;;  %v1958_v8 = vperm.slane %v552_v55, 0  ;;  %v511_v16 = vadd.f32 %v503_v35, %v481_v57  ;;  %v623_v28 = vmul.f32 %v1894_v34, %v1911_v42  ;;  %v1988_v42 = vld [vmem:[%s3529_s0 + $0x188] sm:$0xff] }
  0x65   :  { %3757 = vst [vmem:[#allocation23_spill] sm:$0xff] %v1944_v3  ;;  %v422_v38 = vmul.f32 %v1946_v10, %v1921_v51  ;;  %v444_v43 = vmul.f32 %v1948_v26, %v1926_v52  ;;  %v653_v35 = vmul.f32 %v1916_v47, %v1934_v56  ;;  %v474_v44 = vmul.f32 %v1950_v32, %v1939_v61 }
  0x66   :  { %3758 = vst [vmem:[#allocation24_spill] sm:$0xff] %v1965_v30  ;;  %v504_v45 = vmul.f32 %v1954_v59, %v1944_v3  ;;  %v582_v46 = vperm.slane %v1824_v40, 4  ;;  %v541_v53 = vadd.f32 %v533_v36, %v511_v16  ;;  %v612_v55 = vperm.slane %v1827_v62, 4 }
  0x67   :  { %3759 = vst [vmem:[#allocation25_spill] sm:$0xff] %v1970_v31  ;;  %v452_v54 = vadd.f32 %v444_v43, %v422_v38  ;;  %v642_v57 = vperm.slane %v1830_v48, 4  ;;  %v534_v56 = vmul.f32 %v1956_v15, %v1965_v30  ;;  %v564_v61 = vmul.f32 %v1958_v8, %v1970_v31 }
  0x68   :  { %3760 = vst [vmem:[#allocation26_spill] sm:$0xff] %v1988_v42  ;;  %v1994_v3 = vperm.slane %v582_v46, 0  ;;  %v1998_v36 = vmul.f32 %v1688_v50, %v1882_v24  ;;  %v571_v16 = vadd.f32 %v563_v37, %v541_v53  ;;  %v2002_v43 = vmul.f32 %v1706_v2, %v1882_v24 }
  0x69   :  { %v482_v38 = vadd.f32 %v474_v44, %v452_v54  ;;  %v2006_v52 = vmul.f32 %v1700_v60, %v1882_v24  ;;  %v2008_v30 = vperm.slane %v612_v55, 0  ;;  %v2012_v46 = vmul.f32 %v1726_v18, %v1882_v24 }
  0x6a   :  { %3761 = vst [vmem:[#allocation27_spill] sm:$0xff] %v1998_v36  ;;  %v2016_v50 = vmul.f32 %v1729_v9, %v1882_v24  ;;  %v2020_v37 = vmul.f32 %v1745_v39, %v1882_v24  ;;  %v601_v2 = vadd.f32 %v593_v5, %v571_v16  ;;  %v594_v60 = vmul.f32 %v1994_v3, %v1988_v42  ;;  %v2069_v42 = vld [vmem:[%s3529_s0 + $0x90] sm:$0xff] }
  0x6b   :  { %3762 = vst [vmem:[#allocation28_spill] sm:$0xff] %v2002_v43  ;;  %v512_v44 = vadd.f32 %v504_v45, %v482_v38  ;;  %v2024_v53 = vperm.slane %v642_v57, 0  ;;  %v2028_v54 = vmul.f32 %v1752_v49, %v1882_v24  ;;  %v2032_v18 = vmul.f32 %v1769_v17, %v1882_v24  ;;  %v2042_v45 = vld [vmem:[%s3529_s0 + $0x1c8] sm:$0xff]  ;;  %v2047_v49 = vld [vmem:[%s3529_s0 + $0x10] sm:$0xff] }
  0x6c   :  { %3763 = vst [vmem:[#allocation29_spill] sm:$0xff] %v2006_v52  ;;  %v2036_v9 = vmul.f32 %v1774_v27, %v1882_v24  ;;  %v411_v39 = vperm.slane %v1998_v36, 0  ;;  %v631_v5 = vadd.f32 %v623_v28, %v601_v2  ;;  %v433_v17 = vperm.slane %v2002_v43, 0  ;;  %v2054_v27 = vld [vmem:[%s3529_s0 + $0x50] sm:$0xff]  ;;  %v2064_v2 = vld [vmem:[%s3529_s0 + $0x208] sm:$0xff] }
  0x6d   :  { %3764 = vst [vmem:[#allocation30_spill] sm:$0xff] %v2012_v46  ;;  %v542_v55 = vadd.f32 %v534_v56, %v512_v44  ;;  %v463_v57 = vperm.slane %v2006_v52, 0  ;;  %v493_v28 = vperm.slane %v2012_v46, 0  ;;  %v523_v56 = vperm.slane %v2016_v50, 0 }
  0x6e   :  { %3765 = vst [vmem:[#allocation31_spill] sm:$0xff] %v2016_v50  ;;  %v2056_v24 = vperm.slane %v411_v39, 0  ;;  %v553_v16 = vperm.slane %v2020_v37, 0  ;;  %v661_v38 = vadd.f32 %v653_v35, %v631_v5  ;;  %v2074_v39 = vld [vmem:[%s3529_s0 + $0xd0] sm:$0xff]  ;;  %v2076_v31 = vperm.slane %v433_v17, 0 }
  0x6f   :  { %3766 = vst [vmem:[#allocation32_spill] sm:$0xff] %v2020_v37  ;;  %v572_v44 = vadd.f32 %v564_v61, %v542_v55  ;;  %v2078_v51 = vperm.slane %v463_v57, 0  ;;  %v624_v35 = vmul.f32 %v2008_v30, %v2042_v45  ;;  %v2084_v5 = vperm.slane %v493_v28, 0  ;;  %v2094_v17 = vld [vmem:[%s3529_s0 + $0x110] sm:$0xff] }
  0x70   :  { %3767 = vst [vmem:[#allocation33_spill] sm:$0xff] %v2028_v54  ;;  %v423_v61 = vmul.f32 %v2056_v24, %v2047_v49  ;;  %v2086_v55 = vperm.slane %v523_v56, 0  ;;  %v445_v57 = vmul.f32 %v2076_v31, %v2054_v27  ;;  %v583_v28 = vperm.slane %v2028_v54, 0 }
  0x71   :  { %3768 = vst [vmem:[#allocation34_spill] sm:$0xff] %v2032_v18  ;;  %v602_v41 = vadd.f32 %v594_v60, %v572_v44  ;;  %v654_v56 = vmul.f32 %v2024_v53, %v2064_v2  ;;  %v475_v60 = vmul.f32 %v2078_v51, %v2069_v42  ;;  %v505_v44 = vmul.f32 %v2084_v5, %v2074_v39 }
  0x72   :  { %3769 = vst [vmem:[#allocation35_spill] sm:$0xff] %v2036_v9  ;;  %v2118_v20 = vperm.slane %v583_v28, 0  ;;  %v643_v19 = vperm.slane %v2036_v9, 0  ;;  %v535_v12 = vmul.f32 %v2086_v55, %v2094_v17  ;;  %v464_v48 = vperm.slane %v2006_v52, 4  ;;  %v2143_v28 = vld [vmem:[%s3529_s0 + $0x98] sm:$0xff] }
  0x73   :  { %3770 = vst [vmem:[#allocation36_spill] sm:$0xff] %v2042_v45  ;;  %v2098_v45 = vperm.slane %v553_v16, 0  ;;  %v632_v16 = vadd.f32 %v624_v35, %v602_v41  ;;  %v524_v52 = vperm.slane %v2016_v50, 4 }
  0x74   :  { %3771 = vst [vmem:[#allocation37_spill] sm:$0xff] %v2047_v49  ;;  %v2116_v49 = vld [vmem:[%s3529_s0 + $0x190] sm:$0xff] }
  0x75   :  { %3772 = vst [vmem:[#allocation38_spill] sm:$0xff] %v2054_v27  ;;  %v613_v27 = vperm.slane %v2032_v18, 0  ;;  %v662_v41 = vadd.f32 %v654_v56, %v632_v16 }
  0x76   :  { %3773 = vst [vmem:[#allocation39_spill] sm:$0xff] %v2064_v2  ;;  %v453_v2 = vadd.f32 %v445_v57, %v423_v61  ;;  %v2133_v61 = vld [vmem:[%s3529_s0 + $0x18] sm:$0xff] }
  0x77   :  { %3774 = vst [vmem:[#allocation40_spill] sm:$0xff] %v2069_v42  ;;  %v412_v42 = vperm.slane %v1998_v36, 4  ;;  %v2128_v40 = vperm.slane %v613_v27, 0  ;;  %v2138_v57 = vld [vmem:[%s3529_s0 + $0x58] sm:$0xff] }
  0x78   :  { %3775 = vst [vmem:[#allocation41_spill] sm:$0xff] %v2074_v39  ;;  %v434_v39 = vperm.slane %v2002_v43, 4  ;;  %v483_v35 = vadd.f32 %v475_v60, %v453_v2  ;;  %v595_v2 = vmul.f32 %v2118_v20, %v2116_v49  ;;  %v2151_v60 = vperm.slane %v464_v48, 0  ;;  %v2168_v48 = vld [vmem:[%s3529_s0 + $0x210] sm:$0xff] }
  0x79   :  { %669 = vst [vmem:[%s3530_s2] sm:$0xff] %v661_v38  ;;  %v2106_v38 = vld [vmem:[%s3529_s0 + $0x150] sm:$0xff]  ;;  %v2147_v27 = vperm.slane %v412_v42, 0 }
  0x7a   :  { %3776 = vst [vmem:[#allocation42_spill] sm:$0xff] %v2094_v17  ;;  %v565_v62 = vmul.f32 %v2098_v45, %v2106_v38  ;;  %v2149_v56 = vperm.slane %v434_v39, 0  ;;  %v513_v16 = vadd.f32 %v505_v44, %v483_v35  ;;  %v494_v17 = vperm.slane %v2012_v46, 4  ;;  %v2163_v42 = vld [vmem:[%s3529_s0 + $0x1d0] sm:$0xff] }
  0x7b   :  { %3777 = vst [vmem:[#allocation43_spill] sm:$0xff] %v2106_v38  ;;  %v2156_v38 = vperm.slane %v643_v19, 0  ;;  %v424_v39 = vmul.f32 %v2147_v27, %v2133_v61  ;;  %v476_v44 = vmul.f32 %v2151_v60, %v2143_v28  ;;  %v2184_v46 = vperm.slane %v524_v52, 0  ;;  %v2204_v52 = vld [vmem:[%s3529_s0 + $0x60] sm:$0xff] }
  0x7c   :  { %3778 = vst [vmem:[#allocation44_spill] sm:$0xff] %v2116_v49  ;;  %v446_v19 = vmul.f32 %v2149_v56, %v2138_v57  ;;  %v543_v35 = vadd.f32 %v535_v12, %v513_v16  ;;  %v2180_v49 = vld [vmem:[%s3529_s0 + $0xd8] sm:$0xff]  ;;  %v2182_v50 = vperm.slane %v494_v17, 0  ;;  %v614_v12 = vperm.slane %v2032_v18, 4  ;;  %v2199_v17 = vld [vmem:[%s3529_s0 + $0x20] sm:$0xff] }
  0x7d   :  { %3779 = vst [vmem:[#allocation45_spill] sm:$0xff] %v2133_v61  ;;  %v584_v61 = vperm.slane %v2028_v54, 4  ;;  %v644_v16 = vperm.slane %v2036_v9, 4  ;;  %v2218_v9 = vld [vmem:[%s3529_s0 + $0x198] sm:$0xff] }
  0x7e   :  { %3780 = vst [vmem:[#allocation46_spill] sm:$0xff] %v2138_v57  ;;  %v2190_v57 = vld [vmem:[%s3529_s0 + $0x118] sm:$0xff]  ;;  %v573_v54 = vadd.f32 %v565_v62, %v543_v35  ;;  %v506_v18 = vmul.f32 %v2182_v50, %v2180_v49 }
  0x7f   :  { %3781 = vst [vmem:[#allocation47_spill] sm:$0xff] %v2143_v28  ;;  %v454_v28 = vadd.f32 %v446_v19, %v424_v39  ;;  %v625_v39 = vmul.f32 %v2128_v40, %v2163_v42  ;;  %v655_v19 = vmul.f32 %v2156_v38, %v2168_v48  ;;  %v2223_v62 = vld [vmem:[%s3529_s0 + $0x1d8] sm:$0xff]  ;;  %v2225_v35 = vperm.slane %v584_v61, 0 }
  0x80   :  { %670 = vst [vmem:[%s3530_s2 + $0x8] sm:$0xff] %v662_v41  ;;  %v554_v41 = vperm.slane %v2020_v37, 4  ;;  %v2234_v37 = vperm.slane %v614_v12, 0  ;;  %v2236_v36 = vperm.slane %v644_v16, 0  ;;  %v603_v61 = vadd.f32 %v595_v2, %v573_v54  ;;  %v2258_v12 = vld [vmem:[%s3529_s0 + $0x160] sm:$0xff] }
  0x81   :  { %3782 = vst [vmem:[#allocation48_spill] sm:$0xff] %v2163_v42  ;;  %v484_v42 = vadd.f32 %v476_v44, %v454_v28  ;;  %v536_v11 = vmul.f32 %v2184_v46, %v2190_v57  ;;  %v2248_v28 = vld [vmem:[%s3529_s0 + $0xe0] sm:$0xff]  ;;  %v425_v54 = vmul.f32 %v1857_v14, %v2199_v17  ;;  %v447_v2 = vmul.f32 %v1872_v21, %v2204_v52  ;;  %v2278_v14 = vld [vmem:[%s3529_s0 + $0x28] sm:$0xff] }
  0x82   :  { %3783 = vst [vmem:[#allocation49_spill] sm:$0xff] %v2168_v48  ;;  %v2192_v43 = vperm.slane %v554_v41, 0  ;;  %v2213_v41 = vld [vmem:[%s3529_s0 + $0x158] sm:$0xff]  ;;  %v2253_v44 = vld [vmem:[%s3529_s0 + $0x120] sm:$0xff]  ;;  %v626_v58 = vmul.f32 %v2234_v37, %v2223_v62  ;;  %v633_v21 = vadd.f32 %v625_v39, %v603_v61  ;;  %v2297_v39 = vld [vmem:[%s3529_s0 + $0x68] sm:$0xff] }
  0x83   :  { %3784 = vst [vmem:[#allocation50_spill] sm:$0xff] %v2180_v49  ;;  %v2230_v48 = vld [vmem:[%s3529_s0 + $0x218] sm:$0xff]  ;;  %v514_v16 = vadd.f32 %v506_v18, %v484_v42  ;;  %v596_v49 = vmul.f32 %v2225_v35, %v2218_v9  ;;  %v2285_v42 = vld [vmem:[%s3529_s0 + $0x1e0] sm:$0xff] }
  0x84   :  { %3785 = vst [vmem:[#allocation51_spill] sm:$0xff] %v2190_v57  ;;  %v566_v57 = vmul.f32 %v2192_v43, %v2213_v41  ;;  %v656_v18 = vmul.f32 %v2236_v36, %v2230_v48 }
  0x85   :  { %3786 = vst [vmem:[#allocation52_spill] sm:$0xff] %v2199_v17  ;;  %v544_v61 = vadd.f32 %v536_v11, %v514_v16  ;;  %v537_v17 = vmul.f32 %v1878_v25, %v2253_v44  ;;  %v2318_v11 = vld [vmem:[%s3529_s0 + $0x128] sm:$0xff] }
  0x86   :  { %3787 = vst [vmem:[#allocation53_spill] sm:$0xff] %v2204_v52  ;;  %v455_v52 = vadd.f32 %v447_v2, %v425_v54  ;;  %v2308_v54 = vld [vmem:[%s3529_s0 + $0xa8] sm:$0xff] }
  0x87   :  { %3788 = vst [vmem:[#allocation54_spill] sm:$0xff] %v2213_v41  ;;  %v567_v41 = vmul.f32 %v1886_v29, %v2258_v12  ;;  %v597_v29 = vmul.f32 %v1892_v33, %v2273_v13  ;;  %v2325_v2 = vld [vmem:[%s3529_s0 + $0x168] sm:$0xff] }
  0x88   :  { %3789 = vst [vmem:[#allocation55_spill] sm:$0xff] %v2218_v9  ;;  %v477_v9 = vmul.f32 %v1874_v22, %v2241_v7  ;;  %v2313_v22 = vld [vmem:[%s3529_s0 + $0xe8] sm:$0xff] }
  0x89   :  { %3790 = vst [vmem:[#allocation56_spill] sm:$0xff] %v2223_v62  ;;  %v2290_v62 = vld [vmem:[%s3529_s0 + $0x220] sm:$0xff]  ;;  %v2330_v16 = vld [vmem:[%s3529_s0 + $0x1a8] sm:$0xff] }
  0x8a   :  { %3791 = vst [vmem:[#allocation57_spill] sm:$0xff] %v2230_v48  ;;  %v507_v48 = vmul.f32 %v1876_v23, %v2248_v28  ;;  %v663_v23 = vadd.f32 %v655_v19, %v633_v21  ;;  %v485_v25 = vadd.f32 %v477_v9, %v455_v52  ;;  %v627_v9 = vmul.f32 %v1894_v34, %v2285_v42  ;;  %v2341_v52 = vld [vmem:[%s3529_s0 + $0x1e8] sm:$0xff]  ;;  %v2348_v21 = vld [vmem:[%s3529_s0 + $0x30] sm:$0xff] }
  0x8b   :  { %3792 = vst [vmem:[#allocation58_spill] sm:$0xff] %v2253_v44  ;;  %v574_v44 = vadd.f32 %v566_v57, %v544_v61  ;;  %v657_v33 = vmul.f32 %v1916_v47, %v2290_v62  ;;  %v448_v19 = vmul.f32 %v1948_v26, %v2297_v39  ;;  %v2353_v34 = vld [vmem:[%s3529_s0 + $0x70] sm:$0xff]  ;;  %v478_v26 = vmul.f32 %v1950_v32, %v2308_v54 }
  0x8c   :  { %3793 = vst [vmem:[#allocation59_spill] sm:$0xff] %v2258_v12  ;;  %v426_v12 = vmul.f32 %v1946_v10, %v2278_v14  ;;  %v515_v47 = vadd.f32 %v507_v48, %v485_v25  ;;  %v2361_v10 = vld [vmem:[%s3529_s0 + $0x228] sm:$0xff]  ;;  %v508_v57 = vmul.f32 %v1954_v59, %v2313_v22  ;;  %v538_v61 = vmul.f32 %v1956_v15, %v2318_v11  ;;  %v2381_v32 = vld [vmem:[%s3529_s0 + $0xf0] sm:$0xff] }
  0x8d   :  { %3794 = vst [vmem:[#allocation60_spill] sm:$0xff] %v2285_v42  ;;  %v604_v48 = vadd.f32 %v596_v49, %v574_v44  ;;  %v568_v25 = vmul.f32 %v1958_v8, %v2325_v2  ;;  %v598_v42 = vmul.f32 %v1994_v3, %v2330_v16  ;;  %v2386_v59 = vld [vmem:[%s3529_s0 + $0x130] sm:$0xff]  ;;  %v628_v49 = vmul.f32 %v2008_v30, %v2341_v52 }
  0x8e   :  { %3795 = vst [vmem:[#allocation61_spill] sm:$0xff] %v2290_v62  ;;  %v2372_v62 = vld [vmem:[%s3529_s0 + $0xb0] sm:$0xff]  ;;  %v545_v15 = vadd.f32 %v537_v17, %v515_v47  ;;  %v427_v44 = vmul.f32 %v2056_v24, %v2348_v21  ;;  %v658_v30 = vmul.f32 %v2024_v53, %v2361_v10  ;;  %v2416_v24 = vld [vmem:[%s3529_s0 + $0x78] sm:$0xff]  ;;  %v509_v53 = vmul.f32 %v2084_v5, %v2381_v32 }
  0x8f   :  { %3796 = vst [vmem:[#allocation62_spill] sm:$0xff] %v2325_v2  ;;  %v2393_v8 = vld [vmem:[%s3529_s0 + $0x170] sm:$0xff]  ;;  %v634_v17 = vadd.f32 %v626_v58, %v604_v48  ;;  %v479_v47 = vmul.f32 %v2078_v51, %v2372_v62  ;;  %v2444_v5 = vld [vmem:[%s3529_s0 + $0xf8] sm:$0xff] }
  0x90   :  { %3797 = vst [vmem:[#allocation63_spill] sm:$0xff] %v2330_v16  ;;  %v2398_v3 = vld [vmem:[%s3529_s0 + $0x1b0] sm:$0xff] }
  0x91   :  { %3798 = vst [vmem:[#allocation64_spill] sm:$0xff] %v2341_v52  ;;  %v2411_v52 = vld [vmem:[%s3529_s0 + $0x38] sm:$0xff]  ;;  %v2421_v58 = vld [vmem:[%s3529_s0 + $0x1f0] sm:$0xff]  ;;  %v664_v48 = vadd.f32 %v656_v18, %v634_v17 }
  0x92   :  { %3799 = vst [vmem:[#allocation65_spill] sm:$0xff] %v2348_v21  ;;  %v575_v21 = vadd.f32 %v567_v41, %v545_v15  ;;  %v2426_v51 = vld [vmem:[%s3529_s0 + $0x230] sm:$0xff]  ;;  %v2435_v41 = vld [vmem:[%s3529_s0 + $0xb8] sm:$0xff]  ;;  %v569_v15 = vmul.f32 %v2098_v45, %v2393_v8  ;;  %v428_v45 = vmul.f32 %v2147_v27, %v2411_v52 }
  0x93   :  { %3800 = vst [vmem:[#allocation66_spill] sm:$0xff] %v2353_v34  ;;  %v2454_v18 = vld [vmem:[%s3529_s0 + $0x178] sm:$0xff]  ;;  %v659_v17 = vmul.f32 %v2156_v38, %v2426_v51 }
  0x94   :  { %671 = vst [vmem:[%s3530_s2 + $0x10] sm:$0xff] %v663_v23  ;;  %v456_v23 = vadd.f32 %v448_v19, %v426_v12  ;;  %v449_v12 = vmul.f32 %v2076_v31, %v2353_v34 }
  0x95   :  { %3801 = vst [vmem:[#allocation67_spill] sm:$0xff] %v2361_v10 }
  0x96   :  { %3802 = vst [vmem:[#allocation68_spill] sm:$0xff] %v2372_v62  ;;  %v486_v19 = vadd.f32 %v478_v26, %v456_v23  ;;  %v457_v31 = vadd.f32 %v449_v12, %v427_v44  ;;  %v539_v26 = vmul.f32 %v2086_v55, %v2386_v59  ;;  %v599_v62 = vmul.f32 %v2118_v20, %v2398_v3  ;;  %v2449_v12 = vld [vmem:[%s3529_s0 + $0x138] sm:$0xff] }
  0x97   :  { %3803 = vst [vmem:[#allocation69_spill] sm:$0xff] %v2381_v32  ;;  %v605_v44 = vadd.f32 %v597_v29, %v575_v21  ;;  %v2459_v20 = vld [vmem:[%s3529_s0 + $0x1b8] sm:$0xff]  ;;  %v450_v29 = vmul.f32 %v2149_v56, %v2416_v24  ;;  %v510_v56 = vmul.f32 %v2182_v50, %v2444_v5  ;;  %v677_v50 = vperm.slane %v1804_v63, 1  ;;  %v3855_v32 = vld [vmem:[#allocation41_spill] sm:$0xff] }
  0x98   :  { %3804 = vst [vmem:[#allocation70_spill] sm:$0xff] %v2386_v59  ;;  %v516_v23 = vadd.f32 %v508_v57, %v486_v19  ;;  %v487_v55 = vadd.f32 %v479_v47, %v457_v31  ;;  %v629_v57 = vmul.f32 %v2128_v40, %v2421_v58  ;;  %v480_v19 = vmul.f32 %v2151_v60, %v2435_v41  ;;  %v2485_v60 = vld [vmem:[%s3529_s0 + $0x1f8] sm:$0xff] }
  0x99   :  { %3805 = vst [vmem:[#allocation71_spill] sm:$0xff] %v2393_v8  ;;  %v635_v47 = vadd.f32 %v627_v9, %v605_v44  ;;  %v458_v27 = vadd.f32 %v450_v29, %v428_v45  ;;  %v600_v40 = vmul.f32 %v2225_v35, %v2459_v20  ;;  %v725_v35 = vperm.slane %v1810_v1, 1  ;;  %v3854_v8 = vld [vmem:[#allocation35_spill] sm:$0xff] }
  0x9a   :  { %3806 = vst [vmem:[#allocation72_spill] sm:$0xff] %v2398_v3  ;;  %v546_v21 = vadd.f32 %v538_v61, %v516_v23  ;;  %v517_v31 = vadd.f32 %v509_v53, %v487_v55  ;;  %v570_v61 = vmul.f32 %v2192_v43, %v2454_v18  ;;  %v697_v43 = vperm.slane %v1807_v0, 1 }
  0x9b   :  { %3807 = vst [vmem:[#allocation73_spill] sm:$0xff] %v2411_v52  ;;  %v665_v38 = vadd.f32 %v657_v33, %v635_v47  ;;  %v488_v9 = vadd.f32 %v480_v19, %v458_v27  ;;  %v753_v33 = vperm.slane %v1815_v4, 1  ;;  %v2499_v44 = vperm.slane %v677_v50, 1  ;;  %v3820_v50 = vld [vmem:[#allocation13_spill] sm:$0xff] }
  0x9c   :  { %3808 = vst [vmem:[#allocation74_spill] sm:$0xff] %v2416_v24  ;;  %v576_v24 = vadd.f32 %v568_v25, %v546_v21  ;;  %v547_v23 = vadd.f32 %v539_v26, %v517_v31  ;;  %v630_v55 = vmul.f32 %v2234_v37, %v2485_v60  ;;  %v2504_v45 = vperm.slane %v697_v43, 1  ;;  %v3818_v31 = vld [vmem:[#allocation11_spill] sm:$0xff] }
  0x9d   :  { %3809 = vst [vmem:[#allocation75_spill] sm:$0xff] %v2421_v58  ;;  %v518_v26 = vadd.f32 %v510_v56, %v488_v9  ;;  %v2506_v29 = vperm.slane %v725_v35, 1  ;;  %v3819_v56 = vld [vmem:[#allocation12_spill] sm:$0xff]  ;;  %v3823_v35 = vld [vmem:[#allocation9_spill] sm:$0xff] }
  0x9e   :  { %3810 = vst [vmem:[#allocation76_spill] sm:$0xff] %v2426_v51  ;;  %v606_v25 = vadd.f32 %v598_v42, %v576_v24  ;;  %v577_v53 = vadd.f32 %v569_v15, %v547_v23  ;;  %v781_v42 = vperm.slane %v1818_v6, 1  ;;  %v689_v15 = vmul.f32 %v2499_v44, %v3818_v31  ;;  %v3852_v51 = vld [vmem:[#allocation33_spill] sm:$0xff] }
  0x9f   :  { %3811 = vst [vmem:[#allocation77_spill] sm:$0xff] %v2435_v41  ;;  %v839_v58 = vperm.slane %v3852_v51, 1 }
  0xa0   :  { %3812 = vst [vmem:[#allocation78_spill] sm:$0xff] %v2444_v5  ;;  %v636_v24 = vadd.f32 %v628_v49, %v606_v25  ;;  %v607_v21 = vadd.f32 %v599_v62, %v577_v53  ;;  %v2514_v49 = vperm.slane %v753_v33, 1  ;;  %v2516_v23 = vperm.slane %v781_v42, 1  ;;  %v3824_v33 = vld [vmem:[#allocation10_spill] sm:$0xff]  ;;  %v3845_v5 = vld [vmem:[#allocation36_spill] sm:$0xff] }
  0xa1   :  { %3813 = vst [vmem:[#allocation79_spill] sm:$0xff] %v2449_v12  ;;  %v737_v62 = vmul.f32 %v2506_v29, %v3820_v50  ;;  %v865_v53 = vperm.slane %v3823_v35, 1  ;;  %v3827_v50 = vld [vmem:[#allocation16_spill] sm:$0xff]  ;;  %v2628_v59 = vperm.slane %v839_v58, 1 }
  0xa2   :  { %3814 = vst [vmem:[#allocation80_spill] sm:$0xff] %v2454_v18  ;;  %v666_v27 = vadd.f32 %v658_v30, %v636_v24  ;;  %v637_v37 = vadd.f32 %v629_v57, %v607_v21  ;;  %v3822_v30 = vld [vmem:[#allocation8_spill] sm:$0xff] }
  0xa3   :  { %3815 = vst [vmem:[#allocation81_spill] sm:$0xff] %v2459_v20  ;;  %v837_v43 = vperm.slane %v3822_v30, 1 }
  0xa4   :  { %672 = vst [vmem:[%s3530_s2 + $0x18] sm:$0xff] %v664_v48  ;;  %v540_v48 = vmul.f32 %v2184_v46, %v2449_v12  ;;  %v2491_v46 = vld [vmem:[%s3529_s0 + $0x238] sm:$0xff]  ;;  %v667_v42 = vadd.f32 %v659_v17, %v637_v37  ;;  %v2539_v17 = vperm.slane %v865_v53, 1  ;;  %v698_v37 = vperm.slane %v1807_v0, 5  ;;  %v3839_v0 = vld [vmem:[#allocation29_spill] sm:$0xff] }
  0xa5   :  { %3816 = vst [vmem:[#allocation82_spill] sm:$0xff] %v2485_v60  ;;  %v660_v47 = vmul.f32 %v2236_v36, %v2491_v46  ;;  %v726_v53 = vperm.slane %v1810_v1, 5 }
  0xa6   :  { %3817 = vst [vmem:[#allocation83_spill] sm:$0xff] %v2491_v46  ;;  %v548_v19 = vadd.f32 %v540_v48, %v518_v26  ;;  %v3821_v48 = vld [vmem:[#allocation7_spill] sm:$0xff]  ;;  %v893_v26 = vperm.slane %v3824_v33, 1 }
  0xa7   :  { %673 = vst [vmem:[%s3530_s2 + $0x20] sm:$0xff] %v665_v38  ;;  %v709_v38 = vmul.f32 %v2504_v45, %v3819_v56  ;;  %v809_v25 = vperm.slane %v3821_v48, 1  ;;  %v3826_v56 = vld [vmem:[#allocation15_spill] sm:$0xff] }
  0xa8   :  { %v578_v9 = vadd.f32 %v570_v61, %v548_v19  ;;  %674 = vst [vmem:[%s3530_s2 + $0x28] sm:$0xff] %v666_v27  ;;  %v678_v61 = vperm.slane %v1804_v63, 5  ;;  %v3825_v19 = vld [vmem:[#allocation14_spill] sm:$0xff]  ;;  %v793_v27 = vmul.f32 %v2516_v23, %v3826_v56  ;;  %v3829_v56 = vld [vmem:[#allocation19_spill] sm:$0xff] }
  0xa9   :  { %v717_v36 = vadd.f32 %v709_v38, %v689_v15  ;;  %v2527_v57 = vperm.slane %v809_v25, 1  ;;  %v765_v31 = vmul.f32 %v2514_v49, %v3825_v19  ;;  %v2534_v15 = vperm.slane %v837_v43, 1  ;;  %675 = vst [vmem:[%s3530_s2 + $0x30] sm:$0xff] %v667_v42  ;;  %v3828_v25 = vld [vmem:[#allocation17_spill] sm:$0xff] }
  0xaa   :  { %v608_v24 = vadd.f32 %v600_v40, %v578_v9  ;;  %v2541_v40 = vperm.slane %v678_v61, 1  ;;  %v2548_v43 = vperm.slane %v893_v26, 1  ;;  %v754_v61 = vperm.slane %v1815_v4, 5  ;;  %v3830_v26 = vld [vmem:[#allocation20_spill] sm:$0xff]  ;;  %v3834_v4 = vld [vmem:[#allocation23_spill] sm:$0xff] }
  0xab   :  { %v745_v21 = vadd.f32 %v737_v62, %v717_v36  ;;  %v821_v62 = vmul.f32 %v2527_v57, %v3827_v50  ;;  %v849_v36 = vmul.f32 %v2534_v15, %v3828_v25  ;;  %v866_v50 = vperm.slane %v3823_v35, 5 }
  0xac   :  { %v638_v38 = vadd.f32 %v630_v55, %v608_v24  ;;  %v690_v42 = vmul.f32 %v2541_v40, %v3829_v56  ;;  %v2552_v55 = vperm.slane %v698_v37, 1  ;;  %v838_v37 = vperm.slane %v3822_v30, 5 }
  0xad   :  { %v773_v9 = vadd.f32 %v765_v31, %v745_v21  ;;  %v782_v21 = vperm.slane %v1818_v6, 5  ;;  %v810_v31 = vperm.slane %v3821_v48, 5  ;;  %v3831_v48 = vld [vmem:[#allocation18_spill] sm:$0xff] }
  0xae   :  { %v668_v19 = vadd.f32 %v660_v47, %v638_v38  ;;  %v710_v47 = vmul.f32 %v2552_v55, %v3830_v26  ;;  %v2563_v38 = vperm.slane %v726_v53, 1  ;;  %v877_v46 = vmul.f32 %v2539_v17, %v3831_v48  ;;  %v3833_v53 = vld [vmem:[#allocation22_spill] sm:$0xff]  ;;  %v3836_v48 = vld [vmem:[#allocation25_spill] sm:$0xff] }
  0xaf   :  { %v801_v24 = vadd.f32 %v793_v27, %v773_v9  ;;  %v2567_v9 = vperm.slane %v754_v61, 1  ;;  %v2569_v25 = vperm.slane %v782_v21, 1  ;;  %v2571_v56 = vperm.slane %v810_v31, 1  ;;  %v3835_v31 = vld [vmem:[#allocation24_spill] sm:$0xff] }
  0xb0   :  { %676 = vst [vmem:[%s3530_s2 + $0x38] sm:$0xff] %v668_v19  ;;  %v3832_v19 = vld [vmem:[#allocation21_spill] sm:$0xff]  ;;  %v718_v26 = vadd.f32 %v710_v47, %v690_v42  ;;  %v738_v60 = vmul.f32 %v2563_v38, %v3833_v53  ;;  %v2583_v61 = vperm.slane %v866_v50, 1  ;;  %v894_v42 = vperm.slane %v3824_v33, 5  ;;  %v3841_v50 = vld [vmem:[#allocation30_spill] sm:$0xff] }
  0xb1   :  { %v829_v27 = vadd.f32 %v821_v62, %v801_v24  ;;  %v905_v6 = vmul.f32 %v2548_v43, %v3832_v19  ;;  %v766_v62 = vmul.f32 %v2567_v9, %v3834_v4  ;;  %v2581_v24 = vperm.slane %v838_v37, 1  ;;  %v3837_v19 = vld [vmem:[#allocation27_spill] sm:$0xff] }
  0xb2   :  { %v746_v21 = vadd.f32 %v738_v60, %v718_v26  ;;  %v794_v35 = vmul.f32 %v2569_v25, %v3835_v31  ;;  %v822_v1 = vmul.f32 %v2571_v56, %v3836_v48  ;;  %v679_v53 = vperm.slane %v3837_v19, 1  ;;  %v3842_v26 = vld [vmem:[#allocation31_spill] sm:$0xff] }
  0xb3   :  { %v857_v30 = vadd.f32 %v849_v36, %v829_v27  ;;  %v3838_v36 = vld [vmem:[#allocation28_spill] sm:$0xff]  ;;  %v727_v4 = vperm.slane %v3839_v0, 1  ;;  %v2593_v63 = vperm.slane %v894_v42, 1  ;;  %v755_v60 = vperm.slane %v3841_v50, 1 }
  0xb4   :  { %v699_v27 = vperm.slane %v3838_v36, 1  ;;  %v774_v37 = vadd.f32 %v766_v62, %v746_v21  ;;  %v783_v20 = vperm.slane %v3842_v26, 1  ;;  %v2597_v18 = vperm.slane %v679_v53, 1 }
  0xb5   :  { %v885_v47 = vadd.f32 %v877_v46, %v857_v30  ;;  %3840 = vst [vmem:[#allocation11_spill] sm:$0xff] %v2593_v63  ;;  %v2601_v33 = vperm.slane %v727_v4, 1  ;;  %v3844_v30 = vld [vmem:[#allocation26_spill] sm:$0xff]  ;;  %v878_v62 = vmul.f32 %v2583_v61, %v3845_v5  ;;  %v2607_v21 = vperm.slane %v755_v60, 1  ;;  %v3851_v60 = vld [vmem:[#allocation40_spill] sm:$0xff] }
  0xb6   :  { %v2599_v48 = vperm.slane %v699_v27, 1  ;;  %v802_v46 = vadd.f32 %v794_v35, %v774_v37  ;;  %v850_v12 = vmul.f32 %v2581_v24, %v3844_v30  ;;  %v2616_v27 = vperm.slane %v783_v20, 1  ;;  %v3849_v35 = vld [vmem:[#allocation32_spill] sm:$0xff]  ;;  %v3850_v30 = vld [vmem:[#allocation39_spill] sm:$0xff] }
  0xb7   :  { %v913_v31 = vadd.f32 %v905_v6, %v885_v47  ;;  %3843 = vst [vmem:[#allocation12_spill] sm:$0xff] %v2601_v33  ;;  %v3846_v6 = vld [vmem:[#allocation37_spill] sm:$0xff]  ;;  %v3847_v47 = vld [vmem:[#allocation38_spill] sm:$0xff]  ;;  %v811_v4 = vperm.slane %v3849_v35, 1  ;;  %v906_v5 = vmul.f32 %v2593_v63, %v3850_v30  ;;  %v739_v41 = vmul.f32 %v2601_v33, %v3851_v60 }
  0xb8   :  { %v691_v42 = vmul.f32 %v2597_v18, %v3846_v6  ;;  %v711_v53 = vmul.f32 %v2599_v48, %v3847_v47  ;;  %3848 = vst [vmem:[#allocation13_spill] sm:$0xff] %v2616_v27  ;;  %v830_v37 = vadd.f32 %v822_v1, %v802_v46  ;;  %v3853_v6 = vld [vmem:[#allocation34_spill] sm:$0xff]  ;;  %v895_v47 = vperm.slane %v3854_v8, 1 }
  0xb9   :  { %1440 = vst [vmem:[%s3530_s2 + $0x40] sm:$0xff] %v913_v31  ;;  %v2624_v52 = vperm.slane %v811_v4, 1  ;;  %v867_v3 = vperm.slane %v3853_v6, 1  ;;  %v680_v1 = vperm.slane %v3837_v19, 5  ;;  %v700_v46 = vperm.slane %v3838_v36, 5  ;;  %v3856_v33 = vld [vmem:[#allocation42_spill] sm:$0xff] }
  0xba   :  { %v719_v31 = vadd.f32 %v711_v53, %v691_v42  ;;  %v858_v20 = vadd.f32 %v850_v12, %v830_v37  ;;  %v767_v60 = vmul.f32 %v2607_v21, %v3855_v32  ;;  %v795_v42 = vmul.f32 %v2616_v27, %v3856_v33  ;;  %v3857_v53 = vld [vmem:[#allocation43_spill] sm:$0xff]  ;;  %v3858_v19 = vld [vmem:[#allocation44_spill] sm:$0xff]  ;;  %v3859_v33 = vld [vmem:[#allocation45_spill] sm:$0xff] }
  0xbb   :  { %v823_v4 = vmul.f32 %v2624_v52, %v3857_v53  ;;  %v2638_v10 = vperm.slane %v867_v3, 1  ;;  %v2640_v12 = vperm.slane %v680_v1, 1  ;;  %v2642_v58 = vperm.slane %v700_v46, 1  ;;  %v3860_v53 = vld [vmem:[#allocation46_spill] sm:$0xff] }
  0xbc   :  { %v747_v30 = vadd.f32 %v739_v41, %v719_v31  ;;  %v886_v63 = vadd.f32 %v878_v62, %v858_v20  ;;  %v851_v41 = vmul.f32 %v2628_v59, %v3858_v19  ;;  %v2646_v31 = vperm.slane %v895_v47, 1  ;;  %v3863_v19 = vld [vmem:[#allocation48_spill] sm:$0xff] }
  0xbd   :  { %v728_v32 = vperm.slane %v3839_v0, 5  ;;  %v692_v27 = vmul.f32 %v2640_v12, %v3859_v33  ;;  %v712_v3 = vmul.f32 %v2642_v58, %v3860_v53  ;;  %v756_v62 = vperm.slane %v3841_v50, 5  ;;  %v3861_v33 = vld [vmem:[#allocation47_spill] sm:$0xff] }
  0xbe   :  { %v775_v37 = vadd.f32 %v767_v60, %v747_v30  ;;  %v914_v36 = vadd.f32 %v906_v5, %v886_v63  ;;  %v784_v30 = vperm.slane %v3842_v26, 5  ;;  %v812_v60 = vperm.slane %v3849_v35, 5 }
  0xbf   :  { %v2654_v1 = vperm.slane %v728_v32, 1  ;;  %v720_v63 = vadd.f32 %v712_v3, %v692_v27  ;;  %v2661_v5 = vperm.slane %v756_v62, 1  ;;  %v840_v47 = vperm.slane %v3852_v51, 5  ;;  %v3864_v62 = vld [vmem:[#allocation49_spill] sm:$0xff]  ;;  %v3867_v51 = vld [vmem:[#allocation54_spill] sm:$0xff] }
  0xc0   :  { %v803_v20 = vadd.f32 %v795_v42, %v775_v37  ;;  %1441 = vst [vmem:[%s3530_s2 + $0x48] sm:$0xff] %v914_v36  ;;  %v868_v46 = vperm.slane %v3853_v6, 5  ;;  %v2667_v42 = vperm.slane %v784_v30, 1  ;;  %v2669_v37 = vperm.slane %v812_v60, 1  ;;  %v3865_v6 = vld [vmem:[#allocation50_spill] sm:$0xff] }
  0xc1   :  { %v740_v32 = vmul.f32 %v2654_v1, %v3861_v33  ;;  %v879_v35 = vmul.f32 %v2638_v10, %v3863_v19  ;;  %v2673_v26 = vperm.slane %v840_v47, 1  ;;  %v896_v27 = vperm.slane %v3854_v8, 5  ;;  %v3866_v33 = vld [vmem:[#allocation51_spill] sm:$0xff] }
  0xc2   :  { %v831_v53 = vadd.f32 %v823_v4, %v803_v20  ;;  %3862 = vst [vmem:[#allocation14_spill] sm:$0xff] %v2667_v42  ;;  %v2675_v36 = vperm.slane %v868_v46, 1  ;;  %v907_v4 = vmul.f32 %v2646_v31, %v3864_v62  ;;  %v768_v30 = vmul.f32 %v2661_v5, %v3865_v6  ;;  %v3868_v46 = vld [vmem:[#allocation52_spill] sm:$0xff] }
  0xc3   :  { %v748_v20 = vadd.f32 %v740_v32, %v720_v63  ;;  %v796_v60 = vmul.f32 %v2667_v42, %v3866_v33  ;;  %v824_v19 = vmul.f32 %v2669_v37, %v3867_v51  ;;  %v2686_v47 = vperm.slane %v896_v27, 1  ;;  %v3870_v63 = vld [vmem:[#allocation53_spill] sm:$0xff]  ;;  %v3871_v6 = vld [vmem:[#allocation56_spill] sm:$0xff]  ;;  %v3874_v51 = vld [vmem:[#allocation59_spill] sm:$0xff] }
  0xc4   :  { %v859_v3 = vadd.f32 %v851_v41, %v831_v53  ;;  %v693_v50 = vmul.f32 %v2499_v44, %v3868_v46  ;;  %v3869_v41 = vld [vmem:[#allocation55_spill] sm:$0xff]  ;;  %v713_v32 = vmul.f32 %v2504_v45, %v3870_v63  ;;  %v880_v0 = vmul.f32 %v2675_v36, %v3871_v6  ;;  %v3872_v33 = vld [vmem:[#allocation57_spill] sm:$0xff] }
  0xc5   :  { %v776_v53 = vadd.f32 %v768_v30, %v748_v20  ;;  %v852_v62 = vmul.f32 %v2673_v26, %v3869_v41  ;;  %v908_v42 = vmul.f32 %v2686_v47, %v3872_v33  ;;  %v741_v27 = vmul.f32 %v2506_v29, %v2241_v7  ;;  %v3873_v30 = vld [vmem:[#allocation58_spill] sm:$0xff] }
  0xc6   :  { %v887_v8 = vadd.f32 %v879_v35, %v859_v3  ;;  %v769_v44 = vmul.f32 %v2514_v49, %v2248_v28  ;;  %v721_v20 = vadd.f32 %v713_v32, %v693_v50  ;;  %v797_v41 = vmul.f32 %v2516_v23, %v3873_v30  ;;  %v3875_v50 = vld [vmem:[#allocation60_spill] sm:$0xff] }
  0xc7   :  { %v804_v3 = vadd.f32 %v796_v60, %v776_v53  ;;  %v825_v45 = vmul.f32 %v2527_v57, %v3874_v51  ;;  %v853_v6 = vmul.f32 %v2534_v15, %v2273_v13  ;;  %v694_v33 = vmul.f32 %v2541_v40, %v2278_v14 }
  0xc8   :  { %v915_v35 = vadd.f32 %v907_v4, %v887_v8  ;;  %v714_v29 = vmul.f32 %v2552_v55, %v2297_v39  ;;  %v749_v49 = vadd.f32 %v741_v27, %v721_v20  ;;  %v881_v23 = vmul.f32 %v2539_v17, %v3875_v50  ;;  %v3876_v4 = vld [vmem:[#allocation61_spill] sm:$0xff] }
  0xc9   :  { %v832_v8 = vadd.f32 %v824_v19, %v804_v3  ;;  %v909_v57 = vmul.f32 %v2548_v43, %v3876_v4  ;;  %v742_v15 = vmul.f32 %v2563_v38, %v2308_v54  ;;  %v770_v40 = vmul.f32 %v2567_v9, %v2313_v22  ;;  %v3877_v43 = vld [vmem:[#allocation64_spill] sm:$0xff] }
  0xca   :  { %1442 = vst [vmem:[%s3530_s2 + $0x50] sm:$0xff] %v915_v35  ;;  %v722_v60 = vadd.f32 %v714_v29, %v694_v33  ;;  %v798_v55 = vmul.f32 %v2569_v25, %v2318_v11  ;;  %v777_v32 = vadd.f32 %v769_v44, %v749_v49  ;;  %v826_v19 = vmul.f32 %v2571_v56, %v2325_v2  ;;  %v3878_v35 = vld [vmem:[#allocation65_spill] sm:$0xff]  ;;  %v3880_v44 = vld [vmem:[#allocation11_spill] sm:$0xff]  ;;  %v3881_v29 = vld [vmem:[#allocation68_spill] sm:$0xff] }
  0xcb   :  { %v860_v53 = vadd.f32 %v852_v62, %v832_v8  ;;  %v854_v17 = vmul.f32 %v2581_v24, %v2330_v16  ;;  %v882_v33 = vmul.f32 %v2583_v61, %v3877_v43  ;;  %v695_v38 = vmul.f32 %v2597_v18, %v3878_v35  ;;  %v3879_v62 = vld [vmem:[#allocation67_spill] sm:$0xff]  ;;  %v3882_v56 = vld [vmem:[#allocation12_spill] sm:$0xff]  ;;  %v3884_v61 = vld [vmem:[#allocation70_spill] sm:$0xff] }
  0xcc   :  { %v750_v27 = vadd.f32 %v742_v15, %v722_v60  ;;  %v715_v9 = vmul.f32 %v2599_v48, %v2353_v34  ;;  %v805_v25 = vadd.f32 %v797_v41, %v777_v32  ;;  %v910_v20 = vmul.f32 %v3880_v44, %v3879_v62  ;;  %v3883_v60 = vld [vmem:[#allocation69_spill] sm:$0xff]  ;;  %v3886_v2 = vld [vmem:[#allocation71_spill] sm:$0xff]  ;;  %v3887_v48 = vld [vmem:[#allocation72_spill] sm:$0xff] }
  0xcd   :  { %v888_v3 = vadd.f32 %v880_v0, %v860_v53  ;;  %v743_v8 = vmul.f32 %v3882_v56, %v3881_v29  ;;  %v771_v15 = vmul.f32 %v2607_v21, %v3883_v60  ;;  %v3885_v43 = vld [vmem:[#allocation13_spill] sm:$0xff]  ;;  %v827_v0 = vmul.f32 %v2624_v52, %v3886_v2  ;;  %v3891_v52 = vld [vmem:[#allocation76_spill] sm:$0xff] }
  0xce   :  { %v778_v49 = vadd.f32 %v770_v40, %v750_v27  ;;  %v723_v24 = vadd.f32 %v715_v9, %v695_v38  ;;  %v799_v16 = vmul.f32 %v3885_v43, %v3884_v61  ;;  %v833_v35 = vadd.f32 %v825_v45, %v805_v25  ;;  %v3888_v44 = vld [vmem:[#allocation73_spill] sm:$0xff]  ;;  %v3889_v27 = vld [vmem:[#allocation74_spill] sm:$0xff] }
  0xcf   :  { %v916_v18 = vadd.f32 %v908_v42, %v888_v3  ;;  %v855_v41 = vmul.f32 %v2628_v59, %v3887_v48  ;;  %v696_v40 = vmul.f32 %v2640_v12, %v3888_v44  ;;  %v716_v38 = vmul.f32 %v2642_v58, %v3889_v27  ;;  %v3890_v42 = vld [vmem:[#allocation75_spill] sm:$0xff]  ;;  %v3892_v59 = vld [vmem:[#allocation77_spill] sm:$0xff]  ;;  %v3893_v25 = vld [vmem:[#allocation78_spill] sm:$0xff] }
  0xd0   :  { %v806_v53 = vadd.f32 %v798_v55, %v778_v49  ;;  %v751_v32 = vadd.f32 %v743_v8, %v723_v24  ;;  %v861_v21 = vadd.f32 %v853_v6, %v833_v35  ;;  %v883_v45 = vmul.f32 %v2638_v10, %v3890_v42  ;;  %v3894_v8 = vld [vmem:[#allocation79_spill] sm:$0xff]  ;;  %v3895_v49 = vld [vmem:[#allocation14_spill] sm:$0xff]  ;;  %v3896_v6 = vld [vmem:[#allocation80_spill] sm:$0xff] }
  0xd1   :  { %1443 = vst [vmem:[%s3530_s2 + $0x58] sm:$0xff] %v916_v18  ;;  %v911_v43 = vmul.f32 %v2646_v31, %v3891_v52  ;;  %v744_v55 = vmul.f32 %v2654_v1, %v3892_v59  ;;  %v724_v12 = vadd.f32 %v716_v38, %v696_v40  ;;  %v772_v58 = vmul.f32 %v2661_v5, %v3893_v25  ;;  %v3897_v10 = vld [vmem:[#allocation81_spill] sm:$0xff]  ;;  %v3898_v1 = vld [vmem:[#allocation2_spill] sm:$0xff]  ;;  %v3900_v40 = vld [vmem:[#allocation4_spill] sm:$0xff] }
  0xd2   :  { %v834_v9 = vadd.f32 %v826_v19, %v806_v53  ;;  %v779_v3 = vadd.f32 %v771_v15, %v751_v32  ;;  %v889_v56 = vadd.f32 %v881_v23, %v861_v21  ;;  %v800_v24 = vmul.f32 %v3895_v49, %v3894_v8  ;;  %v3899_v53 = vld [vmem:[#allocation3_spill] sm:$0xff]  ;;  %v3901_v23 = vld [vmem:[#allocation5_spill] sm:$0xff]  ;;  %v3941_v61 = vld [vmem:[#allocation34_spill] sm:$0xff] }
  0xd3   :  { %v828_v35 = vmul.f32 %v2669_v37, %v3896_v6  ;;  %v856_v18 = vmul.f32 %v2673_v26, %v3897_v10  ;;  %v752_v42 = vadd.f32 %v744_v55, %v724_v12  ;;  %v930_v19 = vperm.slane %v3898_v1, 2  ;;  %v2796_v12 = vld [vmem:[%s3529_s0 + $0x40] sm:$0xff]  ;;  %v3933_v48 = vld [vmem:[#allocation31_spill] sm:$0xff] }
  0xd4   :  { %v862_v31 = vadd.f32 %v854_v17, %v834_v9  ;;  %v807_v52 = vadd.f32 %v799_v16, %v779_v3  ;;  %v917_v15 = vadd.f32 %v909_v57, %v889_v56  ;;  %v950_v32 = vperm.slane %v3899_v53, 2  ;;  %v3902_v16 = vld [vmem:[#allocation82_spill] sm:$0xff]  ;;  %3906 = vst [vmem:[#allocation16_spill] sm:$0xff] %v2796_v12  ;;  %v3939_v44 = vld [vmem:[#allocation39_spill] sm:$0xff] }
  0xd5   :  { %v978_v5 = vperm.slane %v3900_v40, 2  ;;  %v1006_v38 = vperm.slane %v3901_v23, 2  ;;  %v780_v8 = vadd.f32 %v772_v58, %v752_v42  ;;  %v2772_v25 = vperm.slane %v930_v19, 2  ;;  %v3903_v17 = vld [vmem:[#allocation6_spill] sm:$0xff] }
  0xd6   :  { %v890_v21 = vadd.f32 %v882_v33, %v862_v31  ;;  %v835_v49 = vadd.f32 %v827_v0, %v807_v52  ;;  %1444 = vst [vmem:[%s3530_s2 + $0x60] sm:$0xff] %v917_v15  ;;  %v884_v26 = vmul.f32 %v2675_v36, %v3902_v16  ;;  %v2779_v37 = vperm.slane %v950_v32, 2  ;;  %v2787_v0 = vld [vmem:[%s3529_s0] sm:$0xff]  ;;  %v3905_v52 = vld [vmem:[#allocation83_spill] sm:$0xff]  ;;  %v3908_v31 = vld [vmem:[#allocation8_spill] sm:$0xff] }
  0xd7   :  { %v2781_v57 = vperm.slane %v978_v5, 2  ;;  %v1034_v55 = vperm.slane %v3903_v17, 2  ;;  %v808_v33 = vadd.f32 %v800_v24, %v780_v8  ;;  %3904 = vst [vmem:[#allocation15_spill] sm:$0xff] %v2787_v0  ;;  %v942_v42 = vmul.f32 %v2787_v0, %v2772_v25  ;;  %v3907_v24 = vld [vmem:[#allocation7_spill] sm:$0xff]  ;;  %v2812_v32 = vld [vmem:[%s3529_s0 + $0x80] sm:$0xff] }
  0xd8   :  { %v918_v9 = vadd.f32 %v910_v20, %v890_v21  ;;  %v863_v3 = vadd.f32 %v855_v41, %v835_v49  ;;  %v912_v36 = vmul.f32 %v2686_v47, %v3905_v52  ;;  %v962_v20 = vmul.f32 %v2796_v12, %v2779_v37  ;;  %3909 = vst [vmem:[#allocation17_spill] sm:$0xff] %v2812_v32  ;;  %v3911_v49 = vld [vmem:[#allocation10_spill] sm:$0xff]  ;;  %v2832_v52 = vld [vmem:[%s3529_s0 + $0x100] sm:$0xff] }
  0xd9   :  { %v2800_v41 = vperm.slane %v1006_v38, 2  ;;  %v2802_v58 = vperm.slane %v1034_v55, 2  ;;  %v836_v8 = vadd.f32 %v828_v35, %v808_v33  ;;  %v1062_v47 = vperm.slane %v3907_v24, 2  ;;  %v3910_v38 = vld [vmem:[#allocation9_spill] sm:$0xff]  ;;  %3913 = vst [vmem:[#allocation20_spill] sm:$0xff] %v2832_v52 }
  0xda   :  { %1445 = vst [vmem:[%s3530_s2 + $0x68] sm:$0xff] %v918_v9  ;;  %v891_v56 = vadd.f32 %v883_v45, %v863_v3  ;;  %v1090_v19 = vperm.slane %v3908_v31, 2  ;;  %v970_v15 = vadd.f32 %v962_v20, %v942_v42  ;;  %v990_v5 = vmul.f32 %v2812_v32, %v2781_v57  ;;  %v2825_v42 = vld [vmem:[%s3529_s0 + $0xc0] sm:$0xff] }
  0xdb   :  { %v1118_v21 = vperm.slane %v3910_v38, 2  ;;  %v1146_v55 = vperm.slane %v3911_v49, 2  ;;  %v864_v45 = vadd.f32 %v856_v18, %v836_v8  ;;  %v2818_v35 = vperm.slane %v1062_v47, 2  ;;  %3912 = vst [vmem:[#allocation19_spill] sm:$0xff] %v2825_v42  ;;  %v2897_v0 = vld [vmem:[%s3529_s0 + $0x1c0] sm:$0xff] }
  0xdc   :  { %v919_v9 = vadd.f32 %v911_v43, %v891_v56  ;;  %v2820_v3 = vperm.slane %v1090_v19, 2  ;;  %v998_v33 = vadd.f32 %v990_v5, %v970_v15  ;;  %v1018_v20 = vmul.f32 %v2825_v42, %v2800_v41  ;;  %v2848_v5 = vld [vmem:[%s3529_s0 + $0x140] sm:$0xff]  ;;  %3918 = vst [vmem:[#allocation24_spill] sm:$0xff] %v2897_v0 }
  0xdd   :  { %v1046_v43 = vmul.f32 %v2832_v52, %v2802_v58  ;;  %v931_v18 = vperm.slane %v3898_v1, 6  ;;  %v892_v56 = vadd.f32 %v884_v26, %v864_v45  ;;  %v2840_v8 = vperm.slane %v1118_v21, 2  ;;  %3914 = vst [vmem:[#allocation18_spill] sm:$0xff] %v2848_v5  ;;  %v3930_v1 = vld [vmem:[#allocation30_spill] sm:$0xff] }
  0xde   :  { %1446 = vst [vmem:[%s3530_s2 + $0x70] sm:$0xff] %v919_v9  ;;  %v2842_v47 = vperm.slane %v1146_v55, 2  ;;  %v951_v19 = vperm.slane %v3899_v53, 6  ;;  %v1026_v15 = vadd.f32 %v1018_v20, %v998_v33  ;;  %v1074_v52 = vmul.f32 %v2848_v5, %v2818_v35  ;;  %v2855_v9 = vld [vmem:[%s3529_s0 + $0x180] sm:$0xff]  ;;  %v2868_v5 = vld [vmem:[%s3529_s0 + $0x8] sm:$0xff] }
  0xdf   :  { %3915 = vst [vmem:[#allocation21_spill] sm:$0xff] %v2855_v9  ;;  %v1102_v26 = vmul.f32 %v2855_v9, %v2820_v3  ;;  %v2859_v21 = vperm.slane %v931_v18, 2  ;;  %v920_v55 = vadd.f32 %v912_v36, %v892_v56  ;;  %v979_v33 = vperm.slane %v3900_v40, 6  ;;  %v2880_v36 = vld [vmem:[%s3529_s0 + $0x48] sm:$0xff] }
  0xe0   :  { %v2861_v45 = vperm.slane %v951_v19, 2  ;;  %v1007_v20 = vperm.slane %v3901_v23, 6  ;;  %v1054_v42 = vadd.f32 %v1046_v43, %v1026_v15  ;;  %3916 = vst [vmem:[#allocation22_spill] sm:$0xff] %v2868_v5  ;;  %v1035_v9 = vperm.slane %v3903_v17, 6  ;;  %v3926_v23 = vld [vmem:[#allocation28_spill] sm:$0xff] }
  0xe1   :  { %v943_v32 = vmul.f32 %v2868_v5, %v2859_v21  ;;  %v1063_v18 = vperm.slane %v3907_v24, 6  ;;  %1447 = vst [vmem:[%s3530_s2 + $0x78] sm:$0xff] %v920_v55  ;;  %v2884_v56 = vperm.slane %v979_v33, 2  ;;  %v1091_v15 = vperm.slane %v3908_v31, 6  ;;  %v3924_v31 = vld [vmem:[#allocation27_spill] sm:$0xff] }
  0xe2   :  { %3917 = vst [vmem:[#allocation23_spill] sm:$0xff] %v2880_v36  ;;  %v963_v43 = vmul.f32 %v2880_v36, %v2861_v45  ;;  %v2886_v19 = vperm.slane %v1007_v20, 2  ;;  %v1082_v5 = vadd.f32 %v1074_v52, %v1054_v42  ;;  %v2889_v24 = vperm.slane %v1035_v9, 2  ;;  %v2904_v20 = vld [vmem:[%s3529_s0 + $0x200] sm:$0xff]  ;;  %v2911_v9 = vld [vmem:[%s3529_s0 + $0x88] sm:$0xff] }
  0xe3   :  { %v2891_v12 = vperm.slane %v1063_v18, 2  ;;  %v1119_v55 = vperm.slane %v3910_v38, 6  ;;  %v1130_v33 = vmul.f32 %v2897_v0, %v2840_v8  ;;  %3919 = vst [vmem:[#allocation25_spill] sm:$0xff] %v2904_v20  ;;  %v1158_v52 = vmul.f32 %v2904_v20, %v2842_v47  ;;  %v2918_v0 = vld [vmem:[%s3529_s0 + $0xc8] sm:$0xff] }
  0xe4   :  { %v971_v42 = vadd.f32 %v963_v43, %v943_v32  ;;  %3920 = vst [vmem:[#allocation26_spill] sm:$0xff] %v2911_v9  ;;  %v991_v18 = vmul.f32 %v2911_v9, %v2884_v56  ;;  %v1110_v36 = vadd.f32 %v1102_v26, %v1082_v5  ;;  %v1019_v38 = vmul.f32 %v2918_v0, %v2886_v19  ;;  %v2925_v32 = vld [vmem:[%s3529_s0 + $0x108] sm:$0xff] }
  0xe5   :  { %3921 = vst [vmem:[#allocation52_spill] sm:$0xff] %v2918_v0  ;;  %v1047_v43 = vmul.f32 %v2925_v32, %v2889_v24  ;;  %v2929_v20 = vperm.slane %v1091_v15, 2  ;;  %v2934_v5 = vld [vmem:[%s3529_s0 + $0x148] sm:$0xff]  ;;  %v1147_v0 = vperm.slane %v3911_v49, 6  ;;  %v932_v16 = vperm.slane %v3924_v31, 2  ;;  %v3927_v15 = vld [vmem:[#allocation29_spill] sm:$0xff] }
  0xe6   :  { %3922 = vst [vmem:[#allocation53_spill] sm:$0xff] %v2925_v32  ;;  %v999_v9 = vadd.f32 %v991_v18, %v971_v42  ;;  %v1075_v26 = vmul.f32 %v2934_v5, %v2891_v12  ;;  %v1138_v10 = vadd.f32 %v1130_v33, %v1110_v36  ;;  %v2940_v17 = vperm.slane %v1119_v55, 2  ;;  %v2957_v33 = vld [vmem:[%s3529_s0 + $0x188] sm:$0xff] }
  0xe7   :  { %3923 = vst [vmem:[#allocation58_spill] sm:$0xff] %v2934_v5  ;;  %v952_v32 = vperm.slane %v3926_v23, 2  ;;  %v980_v40 = vperm.slane %v3927_v15, 2  ;;  %v2944_v18 = vperm.slane %v1147_v0, 2  ;;  %v2946_v53 = vperm.slane %v932_v16, 2  ;;  %v3935_v16 = vld [vmem:[#allocation37_spill] sm:$0xff] }
  0xe8   :  { %3925 = vst [vmem:[#allocation59_spill] sm:$0xff] %v2940_v17  ;;  %v1027_v42 = vadd.f32 %v1019_v38, %v999_v9  ;;  %v1008_v6 = vperm.slane %v3930_v1, 2  ;;  %v1166_v59 = vadd.f32 %v1158_v52, %v1138_v10  ;;  %v1036_v36 = vperm.slane %v3933_v48, 2  ;;  %v3936_v10 = vld [vmem:[#allocation36_spill] sm:$0xff]  ;;  %v3937_v52 = vld [vmem:[#allocation38_spill] sm:$0xff] }
  0xe9   :  { %3928 = vst [vmem:[#allocation60_spill] sm:$0xff] %v2944_v18  ;;  %v2949_v5 = vperm.slane %v952_v32, 2  ;;  %v2951_v49 = vperm.slane %v980_v40, 2  ;;  %v1103_v0 = vmul.f32 %v2957_v33, %v2929_v20  ;;  %v944_v38 = vmul.f32 %v2946_v53, %v3935_v16 }
  0xea   :  { %3929 = vst [vmem:[#allocation61_spill] sm:$0xff] %v2946_v53  ;;  %v1055_v55 = vadd.f32 %v1047_v43, %v1027_v42  ;;  %v2963_v9 = vperm.slane %v1008_v6, 2  ;;  %v1131_v40 = vmul.f32 %v2940_v17, %v3936_v10  ;;  %v2972_v43 = vperm.slane %v1036_v36, 2  ;;  %v3938_v42 = vld [vmem:[#allocation32_spill] sm:$0xff]  ;;  %v3940_v6 = vld [vmem:[#allocation33_spill] sm:$0xff]  ;;  %v3943_v17 = vld [vmem:[#allocation35_spill] sm:$0xff] }
  0xeb   :  { %3931 = vst [vmem:[#allocation11_spill] sm:$0xff] %v2949_v5  ;;  %v964_v32 = vmul.f32 %v2949_v5, %v3937_v52  ;;  %v1064_v27 = vperm.slane %v3938_v42, 2  ;;  %v1159_v16 = vmul.f32 %v2944_v18, %v3939_v44  ;;  %v1092_v2 = vperm.slane %v3940_v6, 2  ;;  %v3944_v5 = vld [vmem:[#allocation41_spill] sm:$0xff]  ;;  %v3945_v18 = vld [vmem:[#allocation42_spill] sm:$0xff] }
  0xec   :  { %3932 = vst [vmem:[#allocation12_spill] sm:$0xff] %v2951_v49  ;;  %v1120_v60 = vperm.slane %v3941_v61, 2  ;;  %v1148_v52 = vperm.slane %v3943_v17, 2  ;;  %v1020_v34 = vmul.f32 %v2963_v9, %v3944_v5  ;;  %v933_v44 = vperm.slane %v3924_v31, 6  ;;  %v3947_v5 = vld [vmem:[#allocation44_spill] sm:$0xff] }
  0xed   :  { %3934 = vst [vmem:[#allocation13_spill] sm:$0xff] %v2957_v33  ;;  %v1083_v33 = vadd.f32 %v1075_v26, %v1055_v55  ;;  %v972_v29 = vadd.f32 %v964_v32, %v944_v38  ;;  %v2981_v10 = vperm.slane %v1064_v27, 2  ;;  %v2986_v26 = vperm.slane %v1092_v2, 2 }
  0xee   :  { %1448 = vst [vmem:[%s3530_s2 + $0x80] sm:$0xff] %v1166_v59  ;;  %v3942_v59 = vld [vmem:[#allocation40_spill] sm:$0xff]  ;;  %v1048_v53 = vmul.f32 %v2972_v43, %v3945_v18  ;;  %v2991_v38 = vperm.slane %v1120_v60, 2  ;;  %v953_v32 = vperm.slane %v3926_v23, 6  ;;  %v3948_v18 = vld [vmem:[#allocation45_spill] sm:$0xff] }
  0xef   :  { %v992_v62 = vmul.f32 %v2951_v49, %v3942_v59  ;;  %v1111_v36 = vadd.f32 %v1103_v0, %v1083_v33  ;;  %v3946_v59 = vld [vmem:[#allocation43_spill] sm:$0xff]  ;;  %v2996_v33 = vperm.slane %v1148_v52, 2  ;;  %v2998_v0 = vperm.slane %v933_v44, 2 }
  0xf0   :  { %v1076_v49 = vmul.f32 %v2981_v10, %v3946_v59  ;;  %v1104_v31 = vmul.f32 %v2986_v26, %v3947_v5  ;;  %v3949_v59 = vld [vmem:[#allocation46_spill] sm:$0xff]  ;;  %v1121_v5 = vperm.slane %v3941_v61, 6 }
  0xf1   :  { %v1000_v55 = vadd.f32 %v992_v62, %v972_v29  ;;  %v1139_v27 = vadd.f32 %v1131_v40, %v1111_v36  ;;  %v3002_v62 = vperm.slane %v953_v32, 2  ;;  %v981_v29 = vperm.slane %v3927_v15, 6  ;;  %v3952_v15 = vld [vmem:[#allocation50_spill] sm:$0xff] }
  0xf2   :  { %v945_v23 = vmul.f32 %v2998_v0, %v3948_v18  ;;  %v1009_v40 = vperm.slane %v3930_v1, 6  ;;  %v1037_v36 = vperm.slane %v3933_v48, 6  ;;  %v3950_v18 = vld [vmem:[#allocation47_spill] sm:$0xff] }
  0xf3   :  { %v1028_v2 = vadd.f32 %v1020_v34, %v1000_v55  ;;  %v1167_v60 = vadd.f32 %v1159_v16, %v1139_v27  ;;  %v965_v44 = vmul.f32 %v3002_v62, %v3949_v59  ;;  %v3011_v34 = vperm.slane %v981_v29, 2 }
  0xf4   :  { %v1065_v55 = vperm.slane %v3938_v42, 6  ;;  %v3017_v16 = vperm.slane %v1009_v40, 2  ;;  %v3019_v32 = vperm.slane %v1037_v36, 2  ;;  %v1093_v27 = vperm.slane %v3940_v6, 6  ;;  %v3951_v42 = vld [vmem:[#allocation48_spill] sm:$0xff] }
  0xf5   :  { %v1056_v52 = vadd.f32 %v1048_v53, %v1028_v2  ;;  %1449 = vst [vmem:[%s3530_s2 + $0x88] sm:$0xff] %v1167_v60  ;;  %v973_v2 = vadd.f32 %v965_v44, %v945_v23  ;;  %v993_v29 = vmul.f32 %v3011_v34, %v3950_v18  ;;  %v1132_v48 = vmul.f32 %v2991_v38, %v3951_v42  ;;  %v3953_v23 = vld [vmem:[#allocation49_spill] sm:$0xff]  ;;  %v3954_v44 = vld [vmem:[#allocation51_spill] sm:$0xff] }
  0xf6   :  { %v3025_v59 = vperm.slane %v1065_v55, 2  ;;  %v3029_v1 = vperm.slane %v1093_v27, 2  ;;  %v3031_v60 = vperm.slane %v1121_v5, 2  ;;  %v1021_v6 = vmul.f32 %v3017_v16, %v3952_v15  ;;  %v3956_v18 = vld [vmem:[#allocation55_spill] sm:$0xff] }
  0xf7   :  { %v1084_v53 = vadd.f32 %v1076_v49, %v1056_v52  ;;  %v1001_v36 = vadd.f32 %v993_v29, %v973_v2  ;;  %v1149_v49 = vperm.slane %v3943_v17, 6  ;;  %v1160_v52 = vmul.f32 %v2996_v33, %v3953_v23  ;;  %v3957_v23 = vld [vmem:[#allocation56_spill] sm:$0xff] }
  0xf8   :  { %v1049_v55 = vmul.f32 %v3019_v32, %v3954_v44  ;;  %v946_v42 = vmul.f32 %v2772_v25, %v3868_v46  ;;  %v966_v27 = vmul.f32 %v2779_v37, %v3870_v63  ;;  %v1105_v29 = vmul.f32 %v3029_v1, %v3956_v18  ;;  %v3958_v37 = vld [vmem:[#allocation57_spill] sm:$0xff] }
  0xf9   :  { %v1112_v40 = vadd.f32 %v1104_v31, %v1084_v53  ;;  %v1029_v31 = vadd.f32 %v1021_v6, %v1001_v36  ;;  %v3955_v53 = vld [vmem:[#allocation54_spill] sm:$0xff]  ;;  %v3046_v15 = vperm.slane %v1149_v49, 2  ;;  %v1133_v17 = vmul.f32 %v3031_v60, %v3957_v23 }
  0xfa   :  { %v1077_v2 = vmul.f32 %v3025_v59, %v3955_v53  ;;  %v974_v44 = vadd.f32 %v966_v27, %v946_v42  ;;  %v994_v46 = vmul.f32 %v2781_v57, %v2241_v7  ;;  %v1022_v63 = vmul.f32 %v2800_v41, %v2248_v28  ;;  %v3966_v42 = vld [vmem:[#allocation59_spill] sm:$0xff]  ;;  %v3969_v53 = vld [vmem:[#allocation68_spill] sm:$0xff] }
  0xfb   :  { %v1140_v5 = vadd.f32 %v1132_v48, %v1112_v40  ;;  %v1057_v61 = vadd.f32 %v1049_v55, %v1029_v31  ;;  %v1050_v48 = vmul.f32 %v2802_v58, %v3873_v30  ;;  %v1161_v6 = vmul.f32 %v3046_v15, %v3958_v37 }
  0xfc   :  { %v1002_v40 = vadd.f32 %v994_v46, %v974_v44  ;;  %v1078_v36 = vmul.f32 %v2818_v35, %v3874_v51  ;;  %v947_v49 = vmul.f32 %v2859_v21, %v2278_v14  ;;  %v1106_v28 = vmul.f32 %v2820_v3, %v2273_v13  ;;  %v3959_v3 = vld [vmem:[#allocation62_spill] sm:$0xff] }
  0xfd   :  { %v1168_v25 = vadd.f32 %v1160_v52, %v1140_v5  ;;  %v1085_v7 = vadd.f32 %v1077_v2, %v1057_v61  ;;  %v1134_v30 = vmul.f32 %v2840_v8, %v3875_v50  ;;  %v967_v57 = vmul.f32 %v2861_v45, %v2297_v39  ;;  %v3960_v39 = vld [vmem:[#allocation63_spill] sm:$0xff]  ;;  %v3961_v45 = vld [vmem:[#allocation65_spill] sm:$0xff]  ;;  %v3963_v52 = vld [vmem:[#allocation66_spill] sm:$0xff] }
  0xfe   :  { %v1030_v41 = vadd.f32 %v1022_v63, %v1002_v40  ;;  %v1162_v51 = vmul.f32 %v2842_v47, %v3876_v4  ;;  %v995_v14 = vmul.f32 %v2884_v56, %v2308_v54  ;;  %v1023_v58 = vmul.f32 %v2886_v19, %v2313_v22  ;;  %v3962_v4 = vld [vmem:[#allocation61_spill] sm:$0xff]  ;;  %v3964_v54 = vld [vmem:[#allocation11_spill] sm:$0xff]  ;;  %v3965_v19 = vld [vmem:[#allocation64_spill] sm:$0xff] }
  0xff   :  { %1450 = vst [vmem:[%s3530_s2 + $0x90] sm:$0xff] %v1168_v25  ;;  %v1113_v61 = vadd.f32 %v1105_v29, %v1085_v7  ;;  %v975_v35 = vadd.f32 %v967_v57, %v947_v49  ;;  %v1051_v13 = vmul.f32 %v2889_v24, %v2318_v11  ;;  %v1079_v50 = vmul.f32 %v2891_v12, %v3959_v3  ;;  %v3967_v5 = vld [vmem:[#allocation67_spill] sm:$0xff]  ;;  %v3968_v11 = vld [vmem:[#allocation60_spill] sm:$0xff]  ;;  %v3972_v46 = vld [vmem:[#allocation70_spill] sm:$0xff] }
 0x100   :  { %v1058_v8 = vadd.f32 %v1050_v48, %v1030_v41  ;;  %v1107_v21 = vmul.f32 %v2929_v20, %v3960_v39  ;;  %v948_v47 = vmul.f32 %v3962_v4, %v3961_v45  ;;  %v968_v56 = vmul.f32 %v3964_v54, %v3963_v52  ;;  %v3970_v2 = vld [vmem:[#allocation12_spill] sm:$0xff]  ;;  %v3971_v20 = vld [vmem:[#allocation69_spill] sm:$0xff]  ;;  %v3973_v25 = vld [vmem:[#allocation71_spill] sm:$0xff] }
 0x101   :  { %v1141_v55 = vadd.f32 %v1133_v17, %v1113_v61  ;;  %v1003_v22 = vadd.f32 %v995_v14, %v975_v35  ;;  %v1135_v27 = vmul.f32 %v3966_v42, %v3965_v19  ;;  %v1163_v24 = vmul.f32 %v3968_v11, %v3967_v5  ;;  %v3974_v40 = vld [vmem:[#allocation73_spill] sm:$0xff]  ;;  %v3975_v49 = vld [vmem:[#allocation74_spill] sm:$0xff]  ;;  %v3984_v54 = vld [vmem:[#allocation3_spill] sm:$0xff] }
 0x102   :  { %v1086_v31 = vadd.f32 %v1078_v36, %v1058_v8  ;;  %v976_v12 = vadd.f32 %v968_v56, %v948_v47  ;;  %v996_v18 = vmul.f32 %v3970_v2, %v3969_v53  ;;  %v1024_v29 = vmul.f32 %v2963_v9, %v3971_v20  ;;  %v3979_v61 = vld [vmem:[#allocation77_spill] sm:$0xff]  ;;  %v3980_v3 = vld [vmem:[#allocation78_spill] sm:$0xff]  ;;  %v3990_v20 = vld [vmem:[#allocation15_spill] sm:$0xff] }
 0x103   :  { %v1169_v23 = vadd.f32 %v1161_v6, %v1141_v55  ;;  %v1031_v44 = vadd.f32 %v1023_v58, %v1003_v22  ;;  %v1052_v17 = vmul.f32 %v2972_v43, %v3972_v46  ;;  %v1080_v63 = vmul.f32 %v2981_v10, %v3973_v25  ;;  %v3976_v6 = vld [vmem:[#allocation72_spill] sm:$0xff]  ;;  %v3977_v43 = vld [vmem:[#allocation75_spill] sm:$0xff]  ;;  %v3988_v5 = vld [vmem:[#allocation81_spill] sm:$0xff] }
 0x104   :  { %v1114_v48 = vadd.f32 %v1106_v28, %v1086_v31  ;;  %v1004_v37 = vadd.f32 %v996_v18, %v976_v12  ;;  %v949_v36 = vmul.f32 %v2998_v0, %v3974_v40  ;;  %v969_v7 = vmul.f32 %v3002_v62, %v3975_v49  ;;  %v3978_v10 = vld [vmem:[#allocation76_spill] sm:$0xff]  ;;  %v3989_v2 = vld [vmem:[#allocation82_spill] sm:$0xff]  ;;  %v3995_v49 = vld [vmem:[#allocation9_spill] sm:$0xff] }
 0x105   :  { %1451 = vst [vmem:[%s3530_s2 + $0x98] sm:$0xff] %v1169_v23  ;;  %v1059_v9 = vadd.f32 %v1051_v13, %v1031_v44  ;;  %v1108_v57 = vmul.f32 %v2986_v26, %v3976_v6  ;;  %v1136_v41 = vmul.f32 %v2991_v38, %v3977_v43  ;;  %v1164_v28 = vmul.f32 %v2996_v33, %v3978_v10  ;;  %v3981_v13 = vld [vmem:[#allocation79_spill] sm:$0xff]  ;;  %v3982_v26 = vld [vmem:[#allocation80_spill] sm:$0xff]  ;;  %v3983_v33 = vld [vmem:[#allocation2_spill] sm:$0xff] }
 0x106   :  { %v1142_v14 = vadd.f32 %v1134_v30, %v1114_v48  ;;  %v1032_v58 = vadd.f32 %v1024_v29, %v1004_v37  ;;  %v977_v0 = vadd.f32 %v969_v7, %v949_v36  ;;  %v997_v62 = vmul.f32 %v3011_v34, %v3979_v61  ;;  %v3985_v55 = vld [vmem:[#allocation4_spill] sm:$0xff]  ;;  %v3993_v37 = vld [vmem:[#allocation7_spill] sm:$0xff] }
 0x107   :  { %v1087_v35 = vadd.f32 %v1079_v50, %v1059_v9  ;;  %v1025_v8 = vmul.f32 %v3017_v16, %v3980_v3  ;;  %v1053_v39 = vmul.f32 %v3019_v32, %v3981_v13  ;;  %v1081_v45 = vmul.f32 %v3025_v59, %v3982_v26  ;;  %v3986_v50 = vld [vmem:[#allocation5_spill] sm:$0xff]  ;;  %v3987_v59 = vld [vmem:[#allocation6_spill] sm:$0xff]  ;;  %v3991_v44 = vld [vmem:[#allocation16_spill] sm:$0xff] }
 0x108   :  { %v1170_v38 = vadd.f32 %v1162_v51, %v1142_v14  ;;  %v1060_v4 = vadd.f32 %v1052_v17, %v1032_v58  ;;  %v1005_v47 = vadd.f32 %v997_v62, %v977_v0  ;;  %v1183_v30 = vperm.slane %v3983_v33, 3  ;;  %v3996_v9 = vld [vmem:[#allocation10_spill] sm:$0xff]  ;;  %v3997_v14 = vld [vmem:[#allocation83_spill] sm:$0xff] }
 0x109   :  { %v1115_v52 = vadd.f32 %v1107_v21, %v1087_v35  ;;  %v1203_v56 = vperm.slane %v3984_v54, 3  ;;  %v1231_v34 = vperm.slane %v3985_v55, 3  ;;  %v1259_v22 = vperm.slane %v3986_v50, 3  ;;  %v3998_v61 = vld [vmem:[#allocation19_spill] sm:$0xff]  ;;  %v3999_v35 = vld [vmem:[#allocation20_spill] sm:$0xff] }
 0x10a   :  { %1452 = vst [vmem:[%s3530_s2 + $0xa0] sm:$0xff] %v1170_v38  ;;  %v1088_v16 = vadd.f32 %v1080_v63, %v1060_v4  ;;  %v1033_v32 = vadd.f32 %v1025_v8, %v1005_v47  ;;  %v3129_v19 = vperm.slane %v1183_v30, 3  ;;  %v1287_v51 = vperm.slane %v3987_v59, 3  ;;  %v3992_v63 = vld [vmem:[#allocation17_spill] sm:$0xff] }
 0x10b   :  { %v1143_v42 = vadd.f32 %v1135_v27, %v1115_v52  ;;  %v1109_v21 = vmul.f32 %v3029_v1, %v3988_v5  ;;  %v3134_v11 = vperm.slane %v1203_v56, 3  ;;  %v3136_v31 = vperm.slane %v1231_v34, 3 }
 0x10c   :  { %v1116_v12 = vadd.f32 %v1108_v57, %v1088_v16  ;;  %v1061_v53 = vadd.f32 %v1053_v39, %v1033_v32  ;;  %v1137_v18 = vmul.f32 %v3031_v60, %v3989_v2  ;;  %v1195_v29 = vmul.f32 %v3990_v20, %v3129_v19  ;;  %v4002_v32 = vld [vmem:[#allocation23_spill] sm:$0xff]  ;;  %v4005_v20 = vld [vmem:[#allocation26_spill] sm:$0xff] }
 0x10d   :  { %v1171_v23 = vadd.f32 %v1163_v24, %v1143_v42  ;;  %v1215_v46 = vmul.f32 %v3991_v44, %v3134_v11  ;;  %v3144_v27 = vperm.slane %v1259_v22, 3  ;;  %v3146_v17 = vperm.slane %v1287_v51, 3  ;;  %v3994_v24 = vld [vmem:[#allocation8_spill] sm:$0xff] }
 0x10e   :  { %v1144_v1 = vadd.f32 %v1136_v41, %v1116_v12  ;;  %v1089_v25 = vadd.f32 %v1081_v45, %v1061_v53  ;;  %v1243_v48 = vmul.f32 %v3992_v63, %v3136_v31  ;;  %v1315_v40 = vperm.slane %v3993_v37, 3  ;;  %v4004_v53 = vld [vmem:[#allocation24_spill] sm:$0xff] }
 0x10f   :  { %1453 = vst [vmem:[%s3530_s2 + $0xa8] sm:$0xff] %v1171_v23  ;;  %v1223_v60 = vadd.f32 %v1215_v46, %v1195_v29  ;;  %v1343_v36 = vperm.slane %v3994_v24, 3  ;;  %v1371_v7 = vperm.slane %v3995_v49, 3  ;;  %v1399_v6 = vperm.slane %v3996_v9, 3  ;;  %v4006_v46 = vld [vmem:[#allocation25_spill] sm:$0xff] }
 0x110   :  { %v1172_v57 = vadd.f32 %v1164_v28, %v1144_v1  ;;  %v1117_v43 = vadd.f32 %v1109_v21, %v1089_v25  ;;  %v3157_v41 = vperm.slane %v1315_v40, 3  ;;  %v1184_v10 = vperm.slane %v3983_v33, 7  ;;  %v4001_v33 = vld [vmem:[#allocation22_spill] sm:$0xff] }
 0x111   :  { %v1165_v58 = vmul.f32 %v3046_v15, %v3997_v14  ;;  %v1251_v0 = vadd.f32 %v1243_v48, %v1223_v60  ;;  %v1271_v62 = vmul.f32 %v3998_v61, %v3144_v27  ;;  %v1299_v3 = vmul.f32 %v3999_v35, %v3146_v17  ;;  %v4000_v15 = vld [vmem:[#allocation18_spill] sm:$0xff]  ;;  %v4013_v35 = vld [vmem:[#allocation31_spill] sm:$0xff] }
 0x112   :  { %1454 = vst [vmem:[%s3530_s2 + $0xb0] sm:$0xff] %v1172_v57  ;;  %v1145_v28 = vadd.f32 %v1137_v18, %v1117_v43  ;;  %v3169_v8 = vperm.slane %v1343_v36, 3  ;;  %v3171_v13 = vperm.slane %v1184_v10, 3  ;;  %v1204_v39 = vperm.slane %v3984_v54, 7  ;;  %v4010_v43 = vld [vmem:[#allocation29_spill] sm:$0xff]  ;;  %v4012_v61 = vld [vmem:[#allocation30_spill] sm:$0xff] }
 0x113   :  { %v1279_v26 = vadd.f32 %v1271_v62, %v1251_v0  ;;  %v1327_v45 = vmul.f32 %v4000_v15, %v3157_v41  ;;  %v3176_v38 = vperm.slane %v1371_v7, 3  ;;  %v3178_v4 = vperm.slane %v1399_v6, 3  ;;  %v4009_v6 = vld [vmem:[#allocation28_spill] sm:$0xff] }
 0x114   :  { %v1173_v47 = vadd.f32 %v1165_v58, %v1145_v28  ;;  %v1196_v30 = vmul.f32 %v4001_v33, %v3171_v13  ;;  %v3182_v52 = vperm.slane %v1204_v39, 3  ;;  %v1232_v56 = vperm.slane %v3985_v55, 7  ;;  %v4011_v58 = vld [vmem:[#allocation53_spill] sm:$0xff] }
 0x115   :  { %v1307_v34 = vadd.f32 %v1299_v3, %v1279_v26  ;;  %v1260_v22 = vperm.slane %v3986_v50, 7  ;;  %v1288_v54 = vperm.slane %v3987_v59, 7  ;;  %v1316_v16 = vperm.slane %v3993_v37, 7  ;;  %v4003_v50 = vld [vmem:[#allocation21_spill] sm:$0xff]  ;;  %v4007_v37 = vld [vmem:[#allocation52_spill] sm:$0xff] }
 0x116   :  { %1455 = vst [vmem:[%s3530_s2 + $0xb8] sm:$0xff] %v1173_v47  ;;  %v1216_v51 = vmul.f32 %v4002_v32, %v3182_v52  ;;  %v3193_v42 = vperm.slane %v1232_v56, 3  ;;  %v1344_v5 = vperm.slane %v3994_v24, 7  ;;  %v1372_v55 = vperm.slane %v3995_v49, 7  ;;  %v4008_v49 = vld [vmem:[#allocation27_spill] sm:$0xff]  ;;  %v4015_v32 = vld [vmem:[#allocation32_spill] sm:$0xff] }
 0x117   :  { %v1335_v21 = vadd.f32 %v1327_v45, %v1307_v34  ;;  %v1355_v12 = vmul.f32 %v4003_v50, %v3169_v8  ;;  %v3199_v59 = vperm.slane %v1260_v22, 3  ;;  %v1383_v2 = vmul.f32 %v4004_v53, %v3176_v38  ;;  %v4014_v45 = vld [vmem:[#allocation58_spill] sm:$0xff]  ;;  %v1520_v56 = vld [vmem:[%s3529_s0 + $0x10] sm:$0xff]  ;;  %v4017_v53 = vld [vmem:[#allocation33_spill] sm:$0xff] }
 0x118   :  { %v1224_v18 = vadd.f32 %v1216_v51, %v1196_v30  ;;  %v1244_v29 = vmul.f32 %v4005_v20, %v3193_v42  ;;  %v3205_v23 = vperm.slane %v1288_v54, 3  ;;  %v1411_v1 = vmul.f32 %v4006_v46, %v3178_v4  ;;  %v1521_v22 = vld [vmem:[%s3529_s0 + $0x50] sm:$0xff]  ;;  %v1522_v50 = vld [vmem:[%s3529_s0 + $0x1c8] sm:$0xff] }
 0x119   :  { %v1363_v44 = vadd.f32 %v1355_v12, %v1335_v21  ;;  %v3209_v25 = vperm.slane %v1316_v16, 3  ;;  %v3211_v63 = vperm.slane %v1344_v5, 3  ;;  %v1272_v40 = vmul.f32 %v4007_v37, %v3199_v59  ;;  %v1523_v20 = vld [vmem:[%s3529_s0 + $0x90] sm:$0xff]  ;;  %v4018_v46 = vld [vmem:[#allocation34_spill] sm:$0xff] }
 0x11a   :  { %v1252_v48 = vadd.f32 %v1244_v29, %v1224_v18  ;;  %v3215_v60 = vperm.slane %v1372_v55, 3  ;;  %v1400_v24 = vperm.slane %v3996_v9, 7  ;;  %v1185_v7 = vperm.slane %v4008_v49, 3  ;;  %v4016_v55 = vld [vmem:[#allocation13_spill] sm:$0xff]  ;;  %v1524_v37 = vld [vmem:[%s3529_s0 + $0x208] sm:$0xff] }
 0x11b   :  { %v1391_v36 = vadd.f32 %v1383_v2, %v1363_v44  ;;  %v1205_v57 = vperm.slane %v4009_v6, 3  ;;  %v1233_v10 = vperm.slane %v4010_v43, 3  ;;  %v1300_v0 = vmul.f32 %v4011_v58, %v3205_v23 }
 0x11c   :  { %v1280_v14 = vadd.f32 %v1272_v40, %v1252_v48  ;;  %v1261_v62 = vperm.slane %v4012_v61, 3  ;;  %v1289_v3 = vperm.slane %v4013_v35, 3  ;;  %v3225_v39 = vperm.slane %v1185_v7, 3 }
 0x11d   :  { %v1419_v28 = vadd.f32 %v1411_v1, %v1391_v36  ;;  %v3227_v26 = vperm.slane %v1205_v57, 3  ;;  %v3229_v9 = vperm.slane %v1233_v10, 3  ;;  %v1328_v47 = vmul.f32 %v4014_v45, %v3209_v25  ;;  %v1525_v57 = vld [vmem:[%s3529_s0 + $0xd0] sm:$0xff] }
 0x11e   :  { %v1308_v15 = vadd.f32 %v1300_v0, %v1280_v14  ;;  %v3233_v33 = vperm.slane %v1400_v24, 3  ;;  %v3235_v30 = vperm.slane %v1261_v62, 3  ;;  %v1197_v34 = vmul.f32 %v1520_v56, %v3225_v39  ;;  %v1526_v14 = vld [vmem:[%s3529_s0 + $0x110] sm:$0xff] }
 0x11f   :  { %1456 = vst [vmem:[%s3530_s2 + $0xc0] sm:$0xff] %v1419_v28  ;;  %v1217_v54 = vmul.f32 %v1521_v22, %v3227_v26  ;;  %v3248_v16 = vperm.slane %v1289_v3, 3  ;;  %v1317_v51 = vperm.slane %v4015_v32, 3  ;;  %v1356_v21 = vmul.f32 %v4016_v55, %v3211_v63  ;;  %v4019_v0 = vld [vmem:[#allocation35_spill] sm:$0xff] }
 0x120   :  { %v1336_v5 = vadd.f32 %v1328_v47, %v1308_v15  ;;  %v1384_v12 = vmul.f32 %v1522_v50, %v3215_v60  ;;  %v1345_v2 = vperm.slane %v4017_v53, 3  ;;  %v1245_v29 = vmul.f32 %v1523_v20, %v3229_v9  ;;  %v1527_v45 = vld [vmem:[%s3529_s0 + $0x150] sm:$0xff] }
 0x121   :  { %v1225_v18 = vadd.f32 %v1217_v54, %v1197_v34  ;;  %v3262_v44 = vperm.slane %v1317_v51, 3  ;;  %v1373_v1 = vperm.slane %v4018_v46, 3  ;;  %v1412_v40 = vmul.f32 %v1524_v37, %v3233_v33  ;;  %v1528_v54 = vld [vmem:[%s3529_s0 + $0x18] sm:$0xff] }
 0x122   :  { %v1364_v48 = vadd.f32 %v1356_v21, %v1336_v5  ;;  %v1186_v24 = vperm.slane %v4008_v49, 7  ;;  %v1206_v36 = vperm.slane %v4009_v6, 7  ;;  %v1273_v10 = vmul.f32 %v1525_v57, %v3235_v30  ;;  %v1529_v5 = vld [vmem:[%s3529_s0 + $0x58] sm:$0xff]  ;;  %v1532_v57 = vld [vmem:[%s3529_s0 + $0x1d0] sm:$0xff] }
 0x123   :  { %v1253_v7 = vadd.f32 %v1245_v29, %v1225_v18  ;;  %v1301_v58 = vmul.f32 %v1526_v14, %v3248_v16  ;;  %v1401_v62 = vperm.slane %v4019_v0, 3  ;;  %v3280_v28 = vperm.slane %v1345_v2, 3 }
 0x124   :  { %v1392_v3 = vadd.f32 %v1384_v12, %v1364_v48  ;;  %v3282_v49 = vperm.slane %v1186_v24, 3  ;;  %v3284_v6 = vperm.slane %v1206_v36, 3  ;;  %v1329_v47 = vmul.f32 %v1527_v45, %v3262_v44 }
 0x125   :  { %v1281_v15 = vadd.f32 %v1273_v10, %v1253_v7  ;;  %v3290_v56 = vperm.slane %v1373_v1, 3  ;;  %v1234_v34 = vperm.slane %v4010_v43, 7  ;;  %v1262_v21 = vperm.slane %v4012_v61, 7  ;;  %v1530_v61 = vld [vmem:[%s3529_s0 + $0x190] sm:$0xff] }
 0x126   :  { %v1420_v22 = vadd.f32 %v1412_v40, %v1392_v3  ;;  %v1198_v51 = vmul.f32 %v1528_v54, %v3282_v49  ;;  %v1218_v55 = vmul.f32 %v1529_v5, %v3284_v6  ;;  %v1290_v43 = vperm.slane %v4013_v35, 7 }
 0x127   :  { %v1309_v50 = vadd.f32 %v1301_v58, %v1281_v15  ;;  %v3302_v12 = vperm.slane %v1234_v34, 3  ;;  %v1318_v2 = vperm.slane %v4015_v32, 7  ;;  %v3309_v18 = vperm.slane %v1401_v62, 3  ;;  %v1531_v32 = vld [vmem:[%s3529_s0 + $0x98] sm:$0xff]  ;;  %v1535_v15 = vld [vmem:[%s3529_s0 + $0x20] sm:$0xff] }
 0x128   :  { %1457 = vst [vmem:[%s3530_s2 + $0xc8] sm:$0xff] %v1420_v22  ;;  %v1226_v20 = vadd.f32 %v1218_v55, %v1198_v51  ;;  %v3311_v29 = vperm.slane %v1262_v21, 3  ;;  %v1346_v1 = vperm.slane %v4017_v53, 7  ;;  %v1357_v35 = vmul.f32 %v1530_v61, %v3280_v28  ;;  %v1533_v58 = vld [vmem:[%s3529_s0 + $0xd8] sm:$0xff]  ;;  %v1537_v51 = vld [vmem:[%s3529_s0 + $0x60] sm:$0xff] }
 0x129   :  { %v1337_v48 = vadd.f32 %v1329_v47, %v1309_v50  ;;  %v1246_v37 = vmul.f32 %v1531_v32, %v3302_v12  ;;  %v3322_v40 = vperm.slane %v1290_v43, 3  ;;  %v3324_v24 = vperm.slane %v1318_v2, 3  ;;  %v1536_v22 = vld [vmem:[%s3529_s0 + $0x118] sm:$0xff] }
 0x12a   :  { %v1374_v36 = vperm.slane %v4018_v46, 7  ;;  %v1402_v53 = vperm.slane %v4019_v0, 7  ;;  %v1385_v10 = vmul.f32 %v1532_v57, %v3290_v56  ;;  %v1274_v62 = vmul.f32 %v1533_v58, %v3311_v29  ;;  %v1534_v46 = vld [vmem:[%s3529_s0 + $0x210] sm:$0xff]  ;;  %v1538_v55 = vld [vmem:[%s3529_s0 + $0x158] sm:$0xff] }
 0x12b   :  { %v1365_v7 = vadd.f32 %v1357_v35, %v1337_v48  ;;  %v1254_v14 = vadd.f32 %v1246_v37, %v1226_v20  ;;  %v1413_v0 = vmul.f32 %v1534_v46, %v3309_v18  ;;  %v3340_v3 = vperm.slane %v1346_v1, 3  ;;  %v1539_v1 = vld [vmem:[%s3529_s0 + $0xa0] sm:$0xff]  ;;  %v1541_v35 = vld [vmem:[%s3529_s0 + $0x68] sm:$0xff]  ;;  %v1546_v46 = vld [vmem:[%s3529_s0 + $0x218] sm:$0xff] }
 0x12c   :  { %v1199_v45 = vmul.f32 %v1535_v15, %v3129_v19  ;;  %v1302_v54 = vmul.f32 %v1536_v22, %v3322_v40  ;;  %v1219_v5 = vmul.f32 %v1537_v51, %v3134_v11  ;;  %v1330_v19 = vmul.f32 %v1538_v55, %v3324_v24  ;;  %v1540_v11 = vld [vmem:[%s3529_s0 + $0x28] sm:$0xff]  ;;  %v1547_v15 = vld [vmem:[%s3529_s0 + $0x120] sm:$0xff]  ;;  %v1549_v22 = vld [vmem:[%s3529_s0 + $0x30] sm:$0xff] }
 0x12d   :  { %v1393_v47 = vadd.f32 %v1385_v10, %v1365_v7  ;;  %v1282_v34 = vadd.f32 %v1274_v62, %v1254_v14  ;;  %v3358_v21 = vperm.slane %v1374_v36, 3  ;;  %v3360_v50 = vperm.slane %v1402_v53, 3  ;;  %v1545_v14 = vld [vmem:[%s3529_s0 + $0xa8] sm:$0xff]  ;;  %v1550_v51 = vld [vmem:[%s3529_s0 + $0x70] sm:$0xff] }
 0x12e   :  { %v1227_v20 = vadd.f32 %v1219_v5, %v1199_v45  ;;  %v1247_v48 = vmul.f32 %v1539_v1, %v3136_v31  ;;  %v1200_v61 = vmul.f32 %v1540_v11, %v3171_v13  ;;  %v1220_v32 = vmul.f32 %v1541_v35, %v3182_v52  ;;  %v1542_v31 = vld [vmem:[%s3529_s0 + $0x198] sm:$0xff]  ;;  %v1543_v13 = vld [vmem:[%s3529_s0 + $0xe0] sm:$0xff] }
 0x12f   :  { %v1421_v43 = vadd.f32 %v1413_v0, %v1393_v47  ;;  %v1310_v2 = vadd.f32 %v1302_v54, %v1282_v34  ;;  %v1358_v36 = vmul.f32 %v1542_v31, %v3340_v3  ;;  %v1275_v7 = vmul.f32 %v1543_v13, %v3144_v27  ;;  %v1544_v52 = vld [vmem:[%s3529_s0 + $0x1d8] sm:$0xff]  ;;  %v1548_v34 = vld [vmem:[%s3529_s0 + $0xe8] sm:$0xff] }
 0x130   :  { %v1255_v53 = vadd.f32 %v1247_v48, %v1227_v20  ;;  %v1386_v57 = vmul.f32 %v1544_v52, %v3358_v21  ;;  %v1228_v10 = vadd.f32 %v1220_v32, %v1200_v61  ;;  %v1248_v58 = vmul.f32 %v1545_v14, %v3193_v42  ;;  %v1553_v20 = vld [vmem:[%s3529_s0 + $0x128] sm:$0xff]  ;;  %v1554_v48 = vld [vmem:[%s3529_s0 + $0xb0] sm:$0xff] }
 0x131   :  { %1458 = vst [vmem:[%s3530_s2 + $0xd0] sm:$0xff] %v1421_v43  ;;  %v1338_v37 = vadd.f32 %v1330_v19, %v1310_v2  ;;  %v1414_v27 = vmul.f32 %v1546_v46, %v3360_v50  ;;  %v1303_v45 = vmul.f32 %v1547_v15, %v3146_v17  ;;  %v1276_v42 = vmul.f32 %v1548_v34, %v3199_v59  ;;  %v1551_v19 = vld [vmem:[%s3529_s0 + $0x160] sm:$0xff]  ;;  %v1556_v32 = vld [vmem:[%s3529_s0 + $0xf0] sm:$0xff] }
 0x132   :  { %v1283_v0 = vadd.f32 %v1275_v7, %v1255_v53  ;;  %v1256_v47 = vadd.f32 %v1248_v58, %v1228_v10  ;;  %v1201_v54 = vmul.f32 %v1549_v22, %v3225_v39  ;;  %v1221_v5 = vmul.f32 %v1550_v51, %v3227_v26  ;;  %v1552_v43 = vld [vmem:[%s3529_s0 + $0x1a0] sm:$0xff]  ;;  %v1558_v53 = vld [vmem:[%s3529_s0 + $0x78] sm:$0xff]  ;;  %v1565_v15 = vld [vmem:[%s3529_s0 + $0x170] sm:$0xff] }
 0x133   :  { %v1366_v62 = vadd.f32 %v1358_v36, %v1338_v37  ;;  %v1331_v59 = vmul.f32 %v1551_v19, %v3157_v41  ;;  %v1359_v39 = vmul.f32 %v1552_v43, %v3169_v8  ;;  %v1304_v26 = vmul.f32 %v1553_v20, %v3205_v23  ;;  %v1555_v8 = vld [vmem:[%s3529_s0 + $0x168] sm:$0xff] }
 0x134   :  { %v1311_v55 = vadd.f32 %v1303_v45, %v1283_v0  ;;  %v1284_v2 = vadd.f32 %v1276_v42, %v1256_v47  ;;  %v1229_v1 = vadd.f32 %v1221_v5, %v1201_v54  ;;  %v1249_v41 = vmul.f32 %v1554_v48, %v3229_v9  ;;  %v1557_v9 = vld [vmem:[%s3529_s0 + $0x38] sm:$0xff] }
 0x135   :  { %v1394_v17 = vadd.f32 %v1386_v57, %v1366_v62  ;;  %v1332_v35 = vmul.f32 %v1555_v8, %v3209_v25  ;;  %v1277_v23 = vmul.f32 %v1556_v32, %v3235_v30  ;;  %v1202_v36 = vmul.f32 %v1557_v9, %v3282_v49  ;;  %v1559_v30 = vld [vmem:[%s3529_s0 + $0x1e0] sm:$0xff]  ;;  %v1560_v49 = vld [vmem:[%s3529_s0 + $0x1a8] sm:$0xff]  ;;  %v1562_v62 = vld [vmem:[%s3529_s0 + $0xb8] sm:$0xff] }
 0x136   :  { %v1339_v61 = vadd.f32 %v1331_v59, %v1311_v55  ;;  %v1312_v37 = vadd.f32 %v1304_v26, %v1284_v2  ;;  %v1257_v31 = vadd.f32 %v1249_v41, %v1229_v1  ;;  %v1222_v25 = vmul.f32 %v1558_v53, %v3284_v6  ;;  %v1561_v6 = vld [vmem:[%s3529_s0 + $0x130] sm:$0xff]  ;;  %v1566_v42 = vld [vmem:[%s3529_s0 + $0xf8] sm:$0xff] }
 0x137   :  { %v1422_v11 = vadd.f32 %v1414_v27, %v1394_v17  ;;  %v1387_v7 = vmul.f32 %v1559_v30, %v3176_v38  ;;  %v1360_v52 = vmul.f32 %v1560_v49, %v3211_v63  ;;  %v1305_v57 = vmul.f32 %v1561_v6, %v3248_v16  ;;  %v1563_v63 = vld [vmem:[%s3529_s0 + $0x220] sm:$0xff]  ;;  %v1564_v16 = vld [vmem:[%s3529_s0 + $0x1e8] sm:$0xff]  ;;  %v1571_v2 = vld [vmem:[%s3529_s0 + $0x178] sm:$0xff] }
 0x138   :  { %v1367_v13 = vadd.f32 %v1359_v39, %v1339_v61  ;;  %v1340_v10 = vadd.f32 %v1332_v35, %v1312_v37  ;;  %v1285_v14 = vadd.f32 %v1277_v23, %v1257_v31  ;;  %v1230_v58 = vadd.f32 %v1222_v25, %v1202_v36  ;;  %v1572_v26 = vld [vmem:[%s3529_s0 + $0x230] sm:$0xff]  ;;  %v1573_v48 = vld [vmem:[%s3529_s0 + $0x1b8] sm:$0xff] }
 0x139   :  { %1459 = vst [vmem:[%s3530_s2 + $0xd8] sm:$0xff] %v1422_v11  ;;  %v1250_v38 = vmul.f32 %v1562_v62, %v3302_v12  ;;  %v1415_v27 = vmul.f32 %v1563_v63, %v3178_v4  ;;  %v1388_v0 = vmul.f32 %v1564_v16, %v3215_v60  ;;  %v1333_v45 = vmul.f32 %v1565_v15, %v3262_v44  ;;  %v1567_v60 = vld [vmem:[%s3529_s0 + $0x228] sm:$0xff]  ;;  %v1568_v44 = vld [vmem:[%s3529_s0 + $0x1b0] sm:$0xff]  ;;  %v1574_v61 = vld [vmem:[%s3529_s0 + $0x1f8] sm:$0xff] }
 0x13a   :  { %v1395_v46 = vadd.f32 %v1387_v7, %v1367_v13  ;;  %v1368_v12 = vadd.f32 %v1360_v52, %v1340_v10  ;;  %v1313_v47 = vadd.f32 %v1305_v57, %v1285_v14  ;;  %v1278_v4 = vmul.f32 %v1566_v42, %v3311_v29  ;;  %v1569_v29 = vld [vmem:[%s3529_s0 + $0x138] sm:$0xff] }
 0x13b   :  { %v1258_v34 = vadd.f32 %v1250_v38, %v1230_v58  ;;  %v1416_v54 = vmul.f32 %v1567_v60, %v3233_v33  ;;  %v1361_v51 = vmul.f32 %v1568_v44, %v3280_v28  ;;  %v1306_v19 = vmul.f32 %v1569_v29, %v3322_v40  ;;  %v1570_v33 = vld [vmem:[%s3529_s0 + $0x1f0] sm:$0xff]  ;;  %v1575_v35 = vld [vmem:[%s3529_s0 + $0x238] sm:$0xff] }
 0x13c   :  { %v1423_v22 = vadd.f32 %v1415_v27, %v1395_v46  ;;  %v1396_v5 = vadd.f32 %v1388_v0, %v1368_v12  ;;  %v1341_v17 = vadd.f32 %v1333_v45, %v1313_v47  ;;  %v1389_v59 = vmul.f32 %v1570_v33, %v3290_v56 }
 0x13d   :  { %v1286_v55 = vadd.f32 %v1278_v4, %v1258_v34  ;;  %v1334_v20 = vmul.f32 %v1571_v2, %v3324_v24  ;;  %v1417_v56 = vmul.f32 %v1572_v26, %v3309_v18  ;;  %v1362_v41 = vmul.f32 %v1573_v48, %v3340_v3 }
 0x13e   :  { %1460 = vst [vmem:[%s3530_s2 + $0xe0] sm:$0xff] %v1423_v22  ;;  %v1424_v28 = vadd.f32 %v1416_v54, %v1396_v5  ;;  %v1369_v43 = vadd.f32 %v1361_v51, %v1341_v17  ;;  %v1390_v8 = vmul.f32 %v1574_v61, %v3358_v21  ;;  %v1418_v32 = vmul.f32 %v1575_v35, %v3360_v50 }
 0x13f   :  { %v1314_v39 = vadd.f32 %v1306_v19, %v1286_v55 }
 0x140   :  { %1461 = vst [vmem:[%s3530_s2 + $0xe8] sm:$0xff] %v1424_v28  ;;  %v1397_v40 = vadd.f32 %v1389_v59, %v1369_v43 }
 0x141   :  { %v1342_v1 = vadd.f32 %v1334_v20, %v1314_v39 }
 0x142   :  { %v1425_v11 = vadd.f32 %v1417_v56, %v1397_v40 }
 0x143   :  { %v1370_v24 = vadd.f32 %v1362_v41, %v1342_v1 }
 0x144   :  { %1462 = vst [vmem:[%s3530_s2 + $0xf0] sm:$0xff] %v1425_v11 }
 0x145   :  { %v1398_v18 = vadd.f32 %v1390_v8, %v1370_v24 }
 0x147   :  { %v1426_v3 = vadd.f32 %v1418_v32, %v1398_v18 }
 0x149   :  { %1463 = vst [vmem:[%s3530_s2 + $0xf8] sm:$0xff] %v1426_v3 }

// kernel: carafe_pallas.7
= control target key start
LH: loop header
LB: loop body
LE: loop exit
PB: predicated region body
PF: predicated region fallthrough
CT: control target
= control target key end

     0   :  { %s671_s12 = smov 0   ;;  %s673_s13 = smov 0   ;;  %s833_s0 = inlined_call_operand.vmem [shape: f32[16,16], index: 0, kind: input, shape index: {}]   ;;  %s834_s1 = inlined_call_operand.vmem [shape: f32[16,1], index: 1, kind: input, shape index: {}]   ;;  %s835_s2 = inlined_call_operand.vmem [shape: f32[16,2048], index: 2, kind: input, shape index: {}]   ;;  %s836_s3 = inlined_call_operand.vmem [shape: f32[16,2048], index: 3, kind: output, shape index: {}]  }
   0x1   :  { %s675_s14 = smov 0  }
   0x2 LB: > { %s567_s15 = sadd.s32 4294967295, %s648_s14   ;;  %s688_s16 = sadd.s32 1, %s648_s14   ;;  %s648_s14 = sphi %s675_s14, %s840_s14   ;;  %s644_s13 = sphi %s673_s13, %s839_s13   ;;  %s640_s12 = sphi %s671_s12, %s838_s12  }
   0x3   : > { %s59_s17 = ssub.s32 %s648_s14, %s688_s16  ;;  %s62_s18 = sadd.s32 1, %s644_s13 }
   0x4   : > { %p60_p0 = scmp.eq.s32.totalorder %s59_s17, 0  ;;  %p69_p1 = scmp.ne.s32.totalorder %s644_s13, %s640_s12 }
   0x5   : > { %p70_p2 = scmp.eq.s32.totalorder %s648_s14, 0  ;;  %p99_p3 = scmp.eq.s32.totalorder %s567_s15, 1 }
   0x6   : > { %s699_s19 = scalar_select %p60_p0, %s644_s13, %s62_s18  }
   0x7   : > { %p71_p4 = por %p70_p2, %p69_p1  ;;  %p701_p5 = por %p99_p3, %p69_p1 }
   0x8   : > { %p570_p6 = scmp.ge.s32.totalorder %s648_s14, 2 }
   0xa   : > { %127 = sbr.rel (%p570_p6) target bundleno = 35 (0x23), region = 24 }
   0xf   : > { %130 = sbr.rel (!%p71_p4) target bundleno = 35 (0x23), region = 28  ;;  %s132_s21 = sand.u32 (%p71_p4), 1, %s644_s13  }
  0x10   : > { %s598_s22 = sshll.u32 (%p71_p4), %s648_s14, 6  ;;  %s571_s23 = sshll.u32 (%p71_p4), %s132_s21, 7 }
  0x11   : > { %s711_s26 = scalar_lea.vmem (%p71_p4), %s835_s2, %s598_s22  ;;  %s134_s27 = scalar_lea.vmem (%p71_p4), [#allocation2], %s571_s23 }
  0x12   : > { %v150_v0 = vld [vmem:[%s711_s26] sm:$0xff] (%p71_p4)  ;;  %v152_v1 = vld [vmem:[%s711_s26 + $0x8] sm:$0xff] (%p71_p4)  ;;  %v154_v2 = vld [vmem:[%s711_s26 + $0x10] sm:$0xff] (%p71_p4) }
  0x13   : > { %151 = vst [vmem:[%s134_s27] sm:$0xff] (%p71_p4), %v150_v0  ;;  %v156_v3 = vld [vmem:[%s711_s26 + $0x18] sm:$0xff] (%p71_p4)  ;;  %v158_v4 = vld [vmem:[%s711_s26 + $0x20] sm:$0xff] (%p71_p4)  ;;  %v160_v5 = vld [vmem:[%s711_s26 + $0x28] sm:$0xff] (%p71_p4) }
  0x14   : > { %153 = vst [vmem:[%s134_s27 + $0x8] sm:$0xff] %v152_v1  ;;  %v162_v6 = vld [vmem:[%s711_s26 + $0x30] sm:$0xff]  ;;  %v164_v7 = vld [vmem:[%s711_s26 + $0x38] sm:$0xff]  ;;  %v166_v8 = vld [vmem:[%s711_s26 + $0x80] sm:$0xff] }
  0x15   : > { %155 = vst [vmem:[%s134_s27 + $0x10] sm:$0xff] %v154_v2  ;;  %v168_v9 = vld [vmem:[%s711_s26 + $0x88] sm:$0xff]  ;;  %v170_v10 = vld [vmem:[%s711_s26 + $0x90] sm:$0xff]  ;;  %v172_v11 = vld [vmem:[%s711_s26 + $0x98] sm:$0xff] }
  0x16   : > { %157 = vst [vmem:[%s134_s27 + $0x18] sm:$0xff] %v156_v3  ;;  %v174_v12 = vld [vmem:[%s711_s26 + $0xa0] sm:$0xff]  ;;  %v176_v13 = vld [vmem:[%s711_s26 + $0xa8] sm:$0xff]  ;;  %v178_v14 = vld [vmem:[%s711_s26 + $0xb0] sm:$0xff] }
  0x17   : > { %159 = vst [vmem:[%s134_s27 + $0x20] sm:$0xff] %v158_v4  ;;  %v180_v15 = vld [vmem:[%s711_s26 + $0xb8] sm:$0xff] }
  0x18   : > { %161 = vst [vmem:[%s134_s27 + $0x28] sm:$0xff] %v160_v5 }
  0x19   : > { %163 = vst [vmem:[%s134_s27 + $0x30] sm:$0xff] %v162_v6 }
  0x1a   : > { %165 = vst [vmem:[%s134_s27 + $0x38] sm:$0xff] %v164_v7 }
  0x1b   : > { %167 = vst [vmem:[%s134_s27 + $0x40] sm:$0xff] %v166_v8 }
  0x1c   : > { %169 = vst [vmem:[%s134_s27 + $0x48] sm:$0xff] %v168_v9 }
  0x1d   : > { %171 = vst [vmem:[%s134_s27 + $0x50] sm:$0xff] %v170_v10 }
  0x1e   : > { %173 = vst [vmem:[%s134_s27 + $0x58] sm:$0xff] %v172_v11 }
  0x1f   : > { %175 = vst [vmem:[%s134_s27 + $0x60] sm:$0xff] %v174_v12 }
  0x20   : > { %177 = vst [vmem:[%s134_s27 + $0x68] sm:$0xff] %v176_v13 }
  0x21   : > { %179 = vst [vmem:[%s134_s27 + $0x70] sm:$0xff] %v178_v14 }
  0x22   : > { %181 = vst [vmem:[%s134_s27 + $0x78] sm:$0xff] %v180_v15 }
  0x23 PF: > { %p574_p7 = scmp.ge.s32.totalorder %s648_s14, 1  ;;  %p186_p8 = scmp.lt.s32.totalorder %s648_s14, 3 }
  0x25   : > { %p187_p9 = pnand %p574_p7, %p186_p8 }
  0x26   : > { %s193_s28 = sand.u32 (!%p187_p9), 1, %s640_s12  }
  0x27   : > { %190 = sbr.rel (%p187_p9) target bundleno = 219 (0xdb), region = 51  ;;  %s735_s4 = sshll.u32 (!%p187_p9), %s193_s28, 7 }
  0x28   : > { %s738_s5 = scalar_lea.vmem (!%p187_p9), [#allocation2], %s735_s4  ;;  %s782_s12 = scalar_lea.vmem (!%p187_p9), [#allocation3], %s735_s4 }
  0x2c   : > { %v235_v16 = vld [vmem:[%s834_s1] sm:$0xff]  ;;  %v650_v17 = vmov 0   ;;  %v228_v19 = vld [vmem:[%s738_s5 + $0x48] sm:$0xff]  ;;  %v229_v20 = vld [vmem:[%s738_s5 + $0x50] sm:$0xff]  ;;  %vm247_vm0 = vcmask 130048   ;;  %s599_s17 = sshll.u32 (%p701_p5), %s567_s15, 6 }
  0x2d   : > { %625 = vset.pattern.permute.xlu0 %v650_v17  ;;  %v227_v18 = vld [vmem:[%s738_s5 + $0x40] sm:$0xff]  ;;  %291 = vmatpush.msra.mxu1 %v228_v19  ;;  %v230_v21 = vld [vmem:[%s738_s5 + $0x58] sm:$0xff]  ;;  %v220_v23 = vld [vmem:[%s738_s5 + $0x8] sm:$0xff]  ;;  %s463_s20 = scalar_lea.vmem (%p701_p5), %s836_s3, %s599_s17 }
  0x2e   : > { %239 = vperm.xlu0 %625, %v235_v16   ;;  %268 = vmatpush.msra.mxu0 %v227_v18  ;;  %v219_v22 = vld [vmem:[%s738_s5] sm:$0xff]  ;;  %v221_v24 = vld [vmem:[%s738_s5 + $0x10] sm:$0xff]  ;;  %v222_v25 = vld [vmem:[%s738_s5 + $0x18] sm:$0xff] }
  0x2f   : > { %314 = vmatpush.msra.mxu2 %v229_v20  ;;  %337 = vmatpush.msra.mxu3 %v230_v21  ;;  %v217_v26 = vld [vmem:[%s833_s0] sm:$0xff]  ;;  %v233_v27 = vld [vmem:[%s738_s5 + $0x70] sm:$0xff]  ;;  %v234_v28 = vld [vmem:[%s738_s5 + $0x78] sm:$0xff] }
  0x30   : > { %269 = vmatpush.msra.mxu0 %v219_v22  ;;  %292 = vmatpush.msra.mxu1 %v220_v23  ;;  %v231_v29 = vld [vmem:[%s738_s5 + $0x60] sm:$0xff]  ;;  %v232_v30 = vld [vmem:[%s738_s5 + $0x68] sm:$0xff]  ;;  %v225_v31 = vld [vmem:[%s738_s5 + $0x30] sm:$0xff] }
  0x31   : > { %315 = vmatpush.msra.mxu2 %v221_v24  ;;  %338 = vmatpush.msra.mxu3 %v222_v25  ;;  %v226_v32 = vld [vmem:[%s738_s5 + $0x38] sm:$0xff]  ;;  %v223_v33 = vld [vmem:[%s738_s5 + $0x20] sm:$0xff]  ;;  %v224_v34 = vld [vmem:[%s738_s5 + $0x28] sm:$0xff] }
  0x32   : > { %577 = vmatmul.msk.f32.vlgmr.msra.gmra.mxu0 %vm247_vm0, %v217_v26  ;;  %579 = vmatmul.msk.f32.vlgmr.msra.gmra.mxu1 %vm247_vm0, %v217_v26  ;;  %v236_v35 = vld [vmem:[%s834_s1 + $0x8] sm:$0xff] }
  0x33   : > { %581 = vmatmul.msk.f32.vlgmr.msra.gmra.mxu2 %vm247_vm0, %v217_v26  ;;  %583 = vmatmul.msk.f32.vlgmr.msra.gmra.mxu3 %vm247_vm0, %v217_v26  ;;  %v218_v36 = vld [vmem:[%s833_s0 + $0x8] sm:$0xff] }
  0x34   : > { %406 = vmatpush.msrb.mxu2 %v233_v27  ;;  %429 = vmatpush.msrb.mxu3 %v234_v28 }
  0x35   : > { %360 = vmatpush.msrb.mxu0 %v231_v29  ;;  %383 = vmatpush.msrb.mxu1 %v232_v30 }
  0x36   : > { %407 = vmatpush.msrb.mxu2 %v225_v31  ;;  %430 = vmatpush.msrb.mxu3 %v226_v32 }
  0x37   : > { %361 = vmatpush.msrb.mxu0 %v223_v33  ;;  %384 = vmatpush.msrb.mxu1 %v224_v34 }
  0x38   : > { %244 = vperm.xlu0 %625, %v236_v35  }
  0x3a   : > { %578 = vmatmul.msk.f32.gmra.mxu0 %vm247_vm0, %v218_v36  ;;  %580 = vmatmul.msk.f32.gmra.mxu1 %vm247_vm0, %v218_v36 }
  0x3b   : > { %582 = vmatmul.msk.f32.gmra.mxu2 %vm247_vm0, %v218_v36  ;;  %584 = vmatmul.msk.f32.gmra.mxu3 %vm247_vm0, %v218_v36 }
  0x42   : > { %585 = vmatmul.msk.f32.vlgmr.msrb.gmra.mxu0 %vm247_vm0, %v217_v26  ;;  %587 = vmatmul.msk.f32.vlgmr.msrb.gmra.mxu1 %vm247_vm0, %v217_v26 }
  0x43   : > { %589 = vmatmul.msk.f32.vlgmr.msrb.gmra.mxu2 %vm247_vm0, %v217_v26  ;;  %591 = vmatmul.msk.f32.vlgmr.msrb.gmra.mxu3 %vm247_vm0, %v217_v26 }
  0x4a   : > { %586 = vmatmul.msk.f32.gmra.mxu0 %vm247_vm0, %v218_v36  ;;  %588 = vmatmul.msk.f32.gmra.mxu1 %vm247_vm0, %v218_v36 }
  0x4b   : > { %590 = vmatmul.msk.f32.gmra.mxu2 %vm247_vm0, %v218_v36  ;;  %592 = vmatmul.msk.f32.gmra.mxu3 %vm247_vm0, %v218_v36 }
  0xa0   : > { %v240_v37 = vpop.permute.xlu0 %239 }
  0xaa   : > { %v245_v42 = vpop.permute.xlu0 %244 }
  0xaf   : > { %v271_v38 = vpop.f32.mrf.mxu0  ;;  %v294_v39 = vpop.f32.mrf.mxu1 }
  0xb0   : > { %v272_v40 = vadd.f32 %v271_v38, %v240_v37  ;;  %v295_v41 = vadd.f32 %v294_v39, %v240_v37 }
  0xb2   : > { %438 = vst [vmem:[%s782_s12] sm:$0xff] %v272_v40 }
  0xb3   : > { %439 = vst [vmem:[%s782_s12 + $0x8] sm:$0xff] %v295_v41 }
  0xb6   : > { %v317_v43 = vpop.f32.mrf.mxu2  ;;  %v340_v44 = vpop.f32.mrf.mxu3 }
  0xb7   : > { %v318_v45 = vadd.f32 %v317_v43, %v240_v37  ;;  %v341_v46 = vadd.f32 %v340_v44, %v240_v37  ;;  %v274_v47 = vpop.f32.mrf.mxu0  ;;  %v297_v48 = vpop.f32.mrf.mxu1 }
  0xb8   : > { %v275_v49 = vadd.f32 %v274_v47, %v245_v42  ;;  %v298_v50 = vadd.f32 %v297_v48, %v245_v42 }
  0xb9   : > { %440 = vst [vmem:[%s782_s12 + $0x10] sm:$0xff] %v318_v45  ;;  %v476_v7 = vld [vmem:[%s782_s12] sm:$0xff] (%p701_p5) }
  0xba   : > { %441 = vst [vmem:[%s782_s12 + $0x18] sm:$0xff] %v341_v46  ;;  %v478_v8 = vld [vmem:[%s782_s12 + $0x8] sm:$0xff] (%p701_p5) }
  0xbb   : > { %446 = vst [vmem:[%s782_s12 + $0x40] sm:$0xff] %v275_v49 }
  0xbc   : > { %447 = vst [vmem:[%s782_s12 + $0x48] sm:$0xff] %v298_v50 }
  0xbd   : > { %477 = vst [vmem:[%s463_s20] sm:$0xff] (%p701_p5), %v476_v7 }
  0xbe   : > { %v320_v51 = vpop.f32.mrf.mxu2  ;;  %v343_v52 = vpop.f32.mrf.mxu3  ;;  %479 = vst [vmem:[%s463_s20 + $0x8] sm:$0xff] (%p701_p5), %v478_v8 }
  0xbf   : > { %v321_v53 = vadd.f32 %v320_v51, %v245_v42  ;;  %v344_v54 = vadd.f32 %v343_v52, %v245_v42  ;;  %v363_v55 = vpop.f32.mrf.mxu0  ;;  %v386_v56 = vpop.f32.mrf.mxu1 }
  0xc0   : > { %v364_v57 = vadd.f32 %v363_v55, %v240_v37  ;;  %v387_v58 = vadd.f32 %v386_v56, %v240_v37  ;;  %v480_v9 = vld [vmem:[%s782_s12 + $0x10] sm:$0xff] (%p701_p5) }
  0xc1   : > { %448 = vst [vmem:[%s782_s12 + $0x50] sm:$0xff] %v321_v53  ;;  %v482_v10 = vld [vmem:[%s782_s12 + $0x18] sm:$0xff] (%p701_p5) }
  0xc2   : > { %449 = vst [vmem:[%s782_s12 + $0x58] sm:$0xff] %v344_v54  ;;  %v492_v15 = vld [vmem:[%s782_s12 + $0x40] sm:$0xff] (%p701_p5) }
  0xc3   : > { %442 = vst [vmem:[%s782_s12 + $0x20] sm:$0xff] %v364_v57  ;;  %v494_v16 = vld [vmem:[%s782_s12 + $0x48] sm:$0xff] (%p701_p5) }
  0xc4   : > { %443 = vst [vmem:[%s782_s12 + $0x28] sm:$0xff] %v387_v58 }
  0xc5   : > { %481 = vst [vmem:[%s463_s20 + $0x10] sm:$0xff] (%p701_p5), %v480_v9 }
  0xc6   : > { %v409_v59 = vpop.f32.mrf.mxu2  ;;  %v432_v60 = vpop.f32.mrf.mxu3  ;;  %483 = vst [vmem:[%s463_s20 + $0x18] sm:$0xff] (%p701_p5), %v482_v10 }
  0xc7   : > { %v410_v61 = vadd.f32 %v409_v59, %v240_v37  ;;  %v433_v62 = vadd.f32 %v432_v60, %v240_v37  ;;  %v366_v63 = vpop.f32.mrf.mxu0  ;;  %v389_v0 = vpop.f32.mrf.mxu1  ;;  %493 = vst [vmem:[%s463_s20 + $0x80] sm:$0xff] (%p701_p5), %v492_v15 }
  0xc8   : > { %v367_v1 = vadd.f32 %v366_v63, %v245_v42  ;;  %v390_v2 = vadd.f32 %v389_v0, %v245_v42  ;;  %v496_v17 = vld [vmem:[%s782_s12 + $0x50] sm:$0xff] (%p701_p5)  ;;  %495 = vst [vmem:[%s463_s20 + $0x88] sm:$0xff] (%p701_p5), %v494_v16 }
  0xc9   : > { %444 = vst [vmem:[%s782_s12 + $0x30] sm:$0xff] %v410_v61  ;;  %v498_v18 = vld [vmem:[%s782_s12 + $0x58] sm:$0xff] (%p701_p5) }
  0xca   : > { %445 = vst [vmem:[%s782_s12 + $0x38] sm:$0xff] %v433_v62  ;;  %v484_v11 = vld [vmem:[%s782_s12 + $0x20] sm:$0xff] (%p701_p5) }
  0xcb   : > { %450 = vst [vmem:[%s782_s12 + $0x60] sm:$0xff] %v367_v1  ;;  %v486_v12 = vld [vmem:[%s782_s12 + $0x28] sm:$0xff] (%p701_p5) }
  0xcc   : > { %451 = vst [vmem:[%s782_s12 + $0x68] sm:$0xff] %v390_v2 }
  0xcd   : > { %485 = vst [vmem:[%s463_s20 + $0x20] sm:$0xff] (%p701_p5), %v484_v11 }
  0xce   : > { %v412_v3 = vpop.f32.mrf.mxu2  ;;  %v435_v4 = vpop.f32.mrf.mxu3  ;;  %460 = sbr.rel (!%p701_p5) target bundleno = 219 (0xdb), region = 59  ;;  %487 = vst [vmem:[%s463_s20 + $0x28] sm:$0xff] (%p701_p5), %v486_v12 }
  0xcf   : > { %v413_v5 = vadd.f32 %v412_v3, %v245_v42  ;;  %v436_v6 = vadd.f32 %v435_v4, %v245_v42  ;;  %497 = vst [vmem:[%s463_s20 + $0x90] sm:$0xff] (%p701_p5), %v496_v17 }
  0xd0   : > { %v488_v13 = vld [vmem:[%s782_s12 + $0x30] sm:$0xff] (%p701_p5)  ;;  %499 = vst [vmem:[%s463_s20 + $0x98] sm:$0xff] (%p701_p5), %v498_v18 }
  0xd1   : > { %452 = vst [vmem:[%s782_s12 + $0x70] sm:$0xff] %v413_v5  ;;  %v490_v14 = vld [vmem:[%s782_s12 + $0x38] sm:$0xff] (%p701_p5) }
  0xd2   : > { %453 = vst [vmem:[%s782_s12 + $0x78] sm:$0xff] %v436_v6  ;;  %v500_v19 = vld [vmem:[%s782_s12 + $0x60] sm:$0xff] (%p701_p5) }
  0xd3   : > { %489 = vst [vmem:[%s463_s20 + $0x30] sm:$0xff] %v488_v13  ;;  %v502_v20 = vld [vmem:[%s782_s12 + $0x68] sm:$0xff] }
  0xd4   : > { %491 = vst [vmem:[%s463_s20 + $0x38] sm:$0xff] %v490_v14 }
  0xd5   : > { %501 = vst [vmem:[%s463_s20 + $0xa0] sm:$0xff] %v500_v19 }
  0xd6   : > { %503 = vst [vmem:[%s463_s20 + $0xa8] sm:$0xff] %v502_v20 }
  0xd8   : > { %v504_v21 = vld [vmem:[%s782_s12 + $0x70] sm:$0xff] }
  0xd9   : > { %v506_v22 = vld [vmem:[%s782_s12 + $0x78] sm:$0xff]  ;;  %505 = vst [vmem:[%s463_s20 + $0xb0] sm:$0xff] %v504_v21 }
  0xda   : > { %507 = vst [vmem:[%s463_s20 + $0xb8] sm:$0xff] %v506_v22 }
  0xdb PF: > { %p10_p10 = scmp.ge.s32.totalorder %s688_s16, 4   ;;  %s838_s12 = smov %s644_s13 }
  0xdc   : > { %s839_s13 = smov %s699_s19  ;;  %s840_s14 = smov %s688_s16 }
  0xdd   :  { %12 = sbr.rel (!%p10_p10) target bundleno = 2 (0x2), region = 113 }

</bundles_post_ra>
